<compile_context>
chip_gen: v5e
topology: v5e:2x2
jax: 0.10.0
libtpu: 0.0.40
codegen_flags: <defaults>
</compile_context>

<pallas_src>
import numpy as np
import jax
import jax.numpy as jnp
from jax.experimental import pallas as pl
from jax.experimental.pallas import tpu as pltpu


def _round_up(x, m):
    return ((x + m - 1) // m) * m


# ------------------------------ fused decoder kernel ------------------------------ #
def decoder_attn_kernel(xw_ref, fm_ref, fmflat_ref,
                        wenc_ref, benc_ref, whid_ref, hshift_ref,
                        wdec_ref, bdec_ref, watt_ref,
                        wihw_ref, wihc_ref, whh_ref, blstm_ref,
                        wlin_ref, blin_ref,
                        out_ref, gw_sc):
    """Whole DecoderAttn forward (attention + LSTMCell recurrence + vocab linear).

    Bp = padded batch, M = map size, F = feature, E = embed, A = attention, H = hidden,
    Vp = padded vocab, T = max(lengths) - 1.
      xw_ref     (T*Bp, E)   time-major word embeddings (row = t*Bp + b)
      fm_ref     (M*Bp, F)   feature map, map-major rows (row = m*Bp + b)
      fmflat_ref (Bp, M*F)   feature map flattened per batch row (torch .view order)
      out_ref    (T, Bp, Vp) per-step vocab logits
      gw_sc      (T*Bp, 4H)  VMEM scratch: precomputed word half of the gate pre-activations
    """
    t_steps, b_pad, _ = out_ref.shape
    mb, f_dim = fm_ref.shape
    m_dim = mb // b_pad
    h_dim = whh_ref.shape[0]
    a_dim = wdec_ref.shape[1]

    # ---------- prologue: loop-invariant precompute (one MXU pass each, not per step) -------
    # (a) word half of the LSTM input projection for ALL timesteps, LSTM biases folded in.
    gw_sc[...] = (jnp.dot(xw_ref[...], wihw_ref[...], preferred_element_type=jnp.float32)
                  + blstm_ref[...])
    # (b) encoder half of the attention (depends only on the feature map).
    enc = (jnp.dot(fm_ref[...], wenc_ref[...], preferred_element_type=jnp.float32)
           + benc_ref[...]).reshape(m_dim, b_pad, a_dim)                      # (M, Bp, A)
    fm = fm_ref[...].reshape(m_dim, b_pad, f_dim)                             # (M, Bp, F)
    # (c) h0 = c0 = tanh(batchnorm(hidden(features)))  (eval-mode BN folded into the weights).
    h0 = jnp.tanh(jnp.dot(fmflat_ref[...], whid_ref[...], preferred_element_type=jnp.float32)
                  + hshift_ref[...])                                          # (Bp, H)

    # hoist the small loop-invariant weight loads out of the recurrence
    wdec = wdec_ref[...]
    bdec = bdec_ref[...]
    watt = watt_ref[...][None]                                                # (1, 1, A)
    wihc = wihc_ref[...]
    whh = whh_ref[...]
    wlin = wlin_ref[...]
    blin = blin_ref[...]

    def step(t, carry):
        h, c = carry
        # ---- Attention(feature_map, h) -------------------------------------------------- #
        dec = jnp.dot(h, wdec, preferred_element_type=jnp.float32) + bdec     # (Bp, A)
        tot = jnp.tanh(enc + dec[None, :, :])                                 # (M, Bp, A)
        att = jnp.sum(tot * watt, axis=-1, keepdims=True)                     # (M, Bp, 1)
        # (the 1-unit linear's bias is constant over the map axis -> cancels in log_softmax)
        att_max = jnp.max(att, axis=0, keepdims=True)                         # (1, Bp, 1)
        lse = jnp.log(jnp.sum(jnp.exp(att - att_max), axis=0, keepdims=True)) + att_max
        score = att - lse                                                     # log_softmax over map
        ctx = jnp.sum(fm * score, axis=0)                                     # (Bp, F)
        # ---- LSTMCell with input [word_embedding ; context] ------------------------------ #
        row0 = pl.multiple_of(t * b_pad, b_pad)
        gates = (gw_sc[pl.ds(row0, b_pad), :]
                 + jnp.dot(h, whh, preferred_element_type=jnp.float32)
                 + jnp.dot(ctx, wihc, preferred_element_type=jnp.float32))    # (Bp, 4H)
        i_g = jax.nn.sigmoid(gates[:, 0 * h_dim:1 * h_dim])
        f_g = jax.nn.sigmoid(gates[:, 1 * h_dim:2 * h_dim])
        g_g = jnp.tanh(gates[:, 2 * h_dim:3 * h_dim])
        o_g = jax.nn.sigmoid(gates[:, 3 * h_dim:4 * h_dim])
        c_new = f_g * c + i_g * g_g
        h_new = o_g * jnp.tanh(c_new)
        # ---- fused vocab projection (dropout == identity in eval mode), 128-lane store --- #
        out_ref[t] = jnp.dot(h_new, wlin, preferred_element_type=jnp.float32) + blin
        return h_new, c_new

    jax.lax.fori_loop(0, t_steps, step, (h0, h0), unroll=True)


# ------------------------------ parameters & preparation ------------------------------ #
def init_params(key, map_size, feature_size, embed_size, hidden_size, vocab_size,
                attention_size):
    """Parameters in PyTorch layout (Linear weights (out, in); LSTM gate order i, f, g, o)."""
    M, F, E, H, V, A = map_size, feature_size, embed_size, hidden_size, vocab_size, attention_size
    ks = jax.random.split(key, 20)

    def unif(k, shape, fan_in):
        b = 1.0 / np.sqrt(fan_in)
        return jax.random.uniform(k, shape, jnp.float32, -b, b)

    embed = 0.1 * jax.random.normal(ks[0], (V, E), jnp.float32)
    embed = embed.at[0].set(0.0)                              # padding_idx=0
    return {
        "embed": embed,
        # LSTMCell(embed + feature -> hidden)
        "w_ih": unif(ks[1], (4 * H, E + F), H),
        "w_hh": unif(ks[2], (4 * H, H), H),
        "b_ih": unif(ks[3], (4 * H,), H),
        "b_hh": unif(ks[4], (4 * H,), H),
        # Attention module
        "w_enc": unif(ks[5], (A, F), F),
        "b_enc": unif(ks[6], (A,), F),
        "w_dec": unif(ks[7], (A, H), H),
        "b_dec": unif(ks[8], (A,), H),
        "w_att": unif(ks[9], (1, A), A),
        "b_att": unif(ks[10], (1,), A),
        # output vocab linear
        "w_lin": unif(ks[11], (V, H), H),
        "b_lin": unif(ks[12], (V,), H),
        # hidden/cell init linear + BatchNorm1d (eval-mode running stats)
        "w_hid": unif(ks[13], (H, M * F), M * F),
        "b_hid": unif(ks[14], (H,), M * F),
        "bn_gamma": 1.0 + 0.1 * jax.random.normal(ks[15], (H,), jnp.float32),
        "bn_beta": 0.1 * jax.random.normal(ks[16], (H,), jnp.float32),
        "bn_mean": 0.1 * jax.random.normal(ks[17], (H,), jnp.float32),
        "bn_var": 1.0 + 0.1 * jax.random.uniform(ks[18], (H,), jnp.float32),
    }


def prepare_kernel_params(p):
    """One-time re-layout: transpose weights, fold eval-mode BN into the init linear, fold the
    two LSTM biases, split W_ih into word/context halves, pad vocab to a 128-lane multiple."""
    E = p["embed"].shape[1]
    H = p["w_hh"].shape[1]
    V = p["w_lin"].shape[0]
    V_pad = _round_up(V, 128)
    s = p["bn_gamma"] / jnp.sqrt(p["bn_var"] + 1e-5)
    return {
        "w_enc_t": p["w_enc"].T,                                            # (F, A)
        "b_enc": p["b_enc"][None, :],                                       # (1, A)
        "w_hid_eff": p["w_hid"].T * s[None, :],                             # (M*F, H), BN folded
        "h_shift": ((p["b_hid"] - p["bn_mean"]) * s + p["bn_beta"])[None, :],  # (1, H)
        "w_dec_t": p["w_dec"].T,                                            # (H, A)
        "b_dec": p["b_dec"][None, :],                                       # (1, A)
        "w_att": p["w_att"],                                                # (1, A); bias cancels
        "w_ihw_t": p["w_ih"][:, :E].T,                                      # (E, 4H)  word half
        "w_ihc_t": p["w_ih"][:, E:].T,                                      # (F, 4H)  context half
        "w_hh_t": p["w_hh"].T,                                              # (H, 4H)
        "lstm_b": (p["b_ih"] + p["b_hh"])[None, :],                         # (1, 4H)
        "w_lin_t": jnp.zeros((H, V_pad), jnp.float32).at[:, :V].set(p["w_lin"].T),
        "b_lin": jnp.zeros((1, V_pad), jnp.float32).at[:, :V].set(p["b_lin"][None, :]),
    }


# ------------------------------ forward (kernel + JAX glue) ------------------------------ #
def decoder_attn_forward(p, kp, feature_map, captions, lengths):
    """DecoderAttn.forward: returns packed logits (sum(lengths - 1), vocab_size) in
    pack_padded_sequence row order. `lengths` must be sorted descending."""
    lengths = [int(l) for l in lengths]
    B, T = captions.shape
    _, M, F = feature_map.shape
    assert all(lengths[i] >= lengths[i + 1] for i in range(len(lengths) - 1)), \
        "lengths must be sorted descending (pack_padded_sequence enforce_sorted=True)"
    assert min(lengths) >= 1 and max(lengths) - 1 <= T, "invalid lengths for given captions"

    T_steps = max(lengths) - 1
    E = p["embed"].shape[1]
    H = p["w_hh"].shape[1]
    V = p["w_lin"].shape[0]
    V_pad = kp["w_lin_t"].shape[1]
    B_pad = _round_up(B, 8)                          # f32 sublane quantum

    # ---- plain-JAX glue: gather + pad + layout plumbing (no recurrent compute) ---- #
    emb = jnp.take(p["embed"], captions[:, :T_steps], axis=0)               # (B, T_steps, E)
    emb_p = jnp.zeros((B_pad, T_steps, E), jnp.float32).at[:B].set(emb)
    xw2d = jnp.transpose(emb_p, (1, 0, 2)).reshape(T_steps * B_pad, E)      # time-major rows

    fm_p = jnp.zeros((B_pad, M, F), jnp.float32).at[:B].set(feature_map)
    fm2d = jnp.transpose(fm_p, (1, 0, 2)).reshape(M * B_pad, F)             # map-major rows
    fm_flat = fm_p.reshape(B_pad, M * F)                                    # torch .view order

    out3d = pl.pallas_call(
        decoder_attn_kernel,
        out_shape=jax.ShapeDtypeStruct((T_steps, B_pad, V_pad), jnp.float32),
        scratch_shapes=[pltpu.VMEM((T_steps * B_pad, 4 * H), jnp.float32)],
    )(xw2d, fm2d, fm_flat,
      kp["w_enc_t"], kp["b_enc"], kp["w_hid_eff"], kp["h_shift"],
      kp["w_dec_t"], kp["b_dec"], kp["w_att"],
      kp["w_ihw_t"], kp["w_ihc_t"], kp["w_hh_t"], kp["lstm_b"],
      kp["w_lin_t"], kp["b_lin"])

    # pack_padded_sequence row order: time-major over sequences still active at step t.
    pack_idx = np.array([t * B_pad + b
                         for t in range(T_steps)
                         for b in range(B) if lengths[b] - 1 > t], dtype=np.int32)
    flat = out3d.reshape(T_steps * B_pad, V_pad)
    return flat[jnp.asarray(pack_idx)][:, :V]


# ------------------------------ pure-jnp reference (for checking) ------------------------------ #
def reference_forward(p, feature_map, captions, lengths):
    lengths = [int(l) for l in lengths]
    B, T = captions.shape
    T_steps = max(lengths) - 1
    emb = jnp.take(p["embed"], captions, axis=0)                            # (B, T, E)
    s = p["bn_gamma"] / jnp.sqrt(p["bn_var"] + 1e-5)
    pre = feature_map.reshape(B, -1) @ p["w_hid"].T + p["b_hid"]
    h = jnp.tanh((pre - p["bn_mean"]) * s + p["bn_beta"])
    c = h
    rows = []
    for t in range(T_steps):
        enc = feature_map @ p["w_enc"].T + p["b_enc"]                       # (B, M, A)
        dec = h @ p["w_dec"].T + p["b_dec"]                                 # (B, A)
        tot = jnp.tanh(enc + dec[:, None, :])
        w = tot @ p["w_att"].T + p["b_att"]                                 # (B, M, 1)
        score = jax.nn.log_softmax(w, axis=1)
        ctx = jnp.sum(feature_map * score, axis=1)                          # (B, F)
        x = jnp.concatenate([emb[:, t, :], ctx], axis=1)                    # (B, E+F)
        gates = x @ p["w_ih"].T + p["b_ih"] + h @ p["w_hh"].T + p["b_hh"]
        i_g, f_g, g_g, o_g = jnp.split(gates, 4, axis=1)
        c = jax.nn.sigmoid(f_g) * c + jax.nn.sigmoid(i_g) * jnp.tanh(g_g)
        h = jax.nn.sigmoid(o_g) * jnp.tanh(c)
        logits = h @ p["w_lin"].T + p["b_lin"]                              # (B, V)
        for b in range(B):
            if lengths[b] - 1 > t:
                rows.append(logits[b])
    return jnp.stack(rows, axis=0)


if __name__ == "__main__":
    map_size, feature_size = 16, 32
    embed_size, hidden_size, vocab_size, attention_size = 32, 32, 48, 32
    B, T = 2, 8
    lengths = (8, 6)                        # sorted descending; recurrence runs max-1 = 7 steps

    key = jax.random.PRNGKey(0)
    k_par, k_fm, k_cap = jax.random.split(key, 3)

    params = init_params(k_par, map_size, feature_size, embed_size, hidden_size,
                         vocab_size, attention_size)
    kparams = prepare_kernel_params(params)

    feature_map = jax.random.normal(k_fm, (B, map_size, feature_size), jnp.float32)
    captions = jax.random.randint(k_cap, (B, T), 0, vocab_size, dtype=jnp.int32)

    fwd = jax.jit(decoder_attn_forward, static_argnums=(4,))
    out = jax.block_until_ready(fwd(params, kparams, feature_map, captions, lengths))

    total_words = sum(l - 1 for l in lengths)
    assert out.shape == (total_words, vocab_size)

    ref = jax.block_until_ready(reference_forward(params, feature_map, captions, lengths))
    assert float(jnp.max(jnp.abs(out - ref))) < 5e-2, "kernel output mismatch vs reference"

    print("KERNEL_OK")
</pallas_src>

<mosaic_0001>
module attributes {stable_mosaic.version = 11 : i64} {
  func.func @decoder_attn_kernel(%arg0: memref<56x32xf32, #tpu.memory_space<vmem>>, %arg1: memref<128x32xf32, #tpu.memory_space<vmem>>, %arg2: memref<8x512xf32, #tpu.memory_space<vmem>>, %arg3: memref<32x32xf32, #tpu.memory_space<vmem>>, %arg4: memref<1x32xf32, #tpu.memory_space<vmem>>, %arg5: memref<512x32xf32, #tpu.memory_space<vmem>>, %arg6: memref<1x32xf32, #tpu.memory_space<vmem>>, %arg7: memref<32x32xf32, #tpu.memory_space<vmem>>, %arg8: memref<1x32xf32, #tpu.memory_space<vmem>>, %arg9: memref<1x32xf32, #tpu.memory_space<vmem>>, %arg10: memref<32x128xf32, #tpu.memory_space<vmem>>, %arg11: memref<32x128xf32, #tpu.memory_space<vmem>>, %arg12: memref<32x128xf32, #tpu.memory_space<vmem>>, %arg13: memref<1x128xf32, #tpu.memory_space<vmem>>, %arg14: memref<32x128xf32, #tpu.memory_space<vmem>>, %arg15: memref<1x128xf32, #tpu.memory_space<vmem>>, %arg16: memref<7x8x128xf32, #tpu.memory_space<vmem>>, %arg17: memref<56x128xf32, #tpu.memory_space<vmem>>) attributes {dimension_semantics = [], scalar_prefetch = 0 : i64, scratch_operands = 1 : i64, tpu.core_type = #tpu.core_type<tc>} {
    %c0 = arith.constant 0 : index
    %c0_0 = arith.constant 0 : index
    %0 = vector.load %arg0[%c0, %c0_0] : memref<56x32xf32, #tpu.memory_space<vmem>>, vector<56x32xf32>
    %c0_1 = arith.constant 0 : index
    %c0_2 = arith.constant 0 : index
    %1 = vector.load %arg10[%c0_1, %c0_2] : memref<32x128xf32, #tpu.memory_space<vmem>>, vector<32x128xf32>
    %cst = arith.constant dense<0.000000e+00> : vector<56x128xf32>
    %2 = tpu.matmul %0, %1, %cst {dimension_numbers = #tpu.dot_dimension_numbers<[1], [0], [0], [1], [0, 0, 1, 1], [], []>} : vector<56x32xf32>, vector<32x128xf32>, vector<56x128xf32> -> vector<56x128xf32>
    %c0_3 = arith.constant 0 : index
    %c0_4 = arith.constant 0 : index
    %3 = vector.load %arg13[%c0_3, %c0_4] : memref<1x128xf32, #tpu.memory_space<vmem>>, vector<1x128xf32>
    %4 = vector.broadcast %3 : vector<1x128xf32> to vector<56x128xf32>
    %5 = arith.addf %2, %4 : vector<56x128xf32>
    %c0_5 = arith.constant 0 : index
    %c0_6 = arith.constant 0 : index
    %6 = vector.load %arg17[%c0_5, %c0_6] : memref<56x128xf32, #tpu.memory_space<vmem>>, vector<56x128xf32>
    tpu.vector_store %arg17[%c0_5, %c0_6], %5 {strides = array<i32>} : memref<56x128xf32, #tpu.memory_space<vmem>>, vector<56x128xf32>,
    %c0_7 = arith.constant 0 : index
    %c0_8 = arith.constant 0 : index
    %7 = vector.load %arg1[%c0_7, %c0_8] : memref<128x32xf32, #tpu.memory_space<vmem>>, vector<128x32xf32>
    %c0_9 = arith.constant 0 : index
    %c0_10 = arith.constant 0 : index
    %8 = vector.load %arg3[%c0_9, %c0_10] : memref<32x32xf32, #tpu.memory_space<vmem>>, vector<32x32xf32>
    %cst_11 = arith.constant dense<0.000000e+00> : vector<128x32xf32>
    %9 = tpu.matmul %7, %8, %cst_11 {dimension_numbers = #tpu.dot_dimension_numbers<[1], [0], [0], [1], [0, 0, 1, 1], [], []>} : vector<128x32xf32>, vector<32x32xf32>, vector<128x32xf32> -> vector<128x32xf32>
    %c0_12 = arith.constant 0 : index
    %c0_13 = arith.constant 0 : index
    %10 = vector.load %arg4[%c0_12, %c0_13] : memref<1x32xf32, #tpu.memory_space<vmem>>, vector<1x32xf32>
    %11 = vector.broadcast %10 : vector<1x32xf32> to vector<128x32xf32>
    %12 = arith.addf %9, %11 : vector<128x32xf32>
    %13 = vector.shape_cast %12 : vector<128x32xf32> to vector<16x8x32xf32>
    %c0_14 = arith.constant 0 : index
    %c0_15 = arith.constant 0 : index
    %14 = vector.load %arg1[%c0_14, %c0_15] : memref<128x32xf32, #tpu.memory_space<vmem>>, vector<128x32xf32>
    %15 = vector.shape_cast %14 : vector<128x32xf32> to vector<16x8x32xf32>
    %c0_16 = arith.constant 0 : index
    %c0_17 = arith.constant 0 : index
    %16 = vector.load %arg2[%c0_16, %c0_17] : memref<8x512xf32, #tpu.memory_space<vmem>>, vector<8x512xf32>
    %c0_18 = arith.constant 0 : index
    %c0_19 = arith.constant 0 : index
    %17 = vector.load %arg5[%c0_18, %c0_19] : memref<512x32xf32, #tpu.memory_space<vmem>>, vector<512x32xf32>
    %cst_20 = arith.constant dense<0.000000e+00> : vector<8x32xf32>
    %18 = tpu.matmul %16, %17, %cst_20 {dimension_numbers = #tpu.dot_dimension_numbers<[1], [0], [0], [1], [0, 0, 1, 1], [], []>} : vector<8x512xf32>, vector<512x32xf32>, vector<8x32xf32> -> vector<8x32xf32>
    %c0_21 = arith.constant 0 : index
    %c0_22 = arith.constant 0 : index
    %19 = vector.load %arg6[%c0_21, %c0_22] : memref<1x32xf32, #tpu.memory_space<vmem>>, vector<1x32xf32>
    %20 = vector.broadcast %19 : vector<1x32xf32> to vector<8x32xf32>
    %21 = arith.addf %18, %20 : vector<8x32xf32>
    %22 = math.tanh %21 : vector<8x32xf32>
    %c0_23 = arith.constant 0 : index
    %c0_24 = arith.constant 0 : index
    %23 = vector.load %arg7[%c0_23, %c0_24] : memref<32x32xf32, #tpu.memory_space<vmem>>, vector<32x32xf32>
    %c0_25 = arith.constant 0 : index
    %c0_26 = arith.constant 0 : index
    %24 = vector.load %arg8[%c0_25, %c0_26] : memref<1x32xf32, #tpu.memory_space<vmem>>, vector<1x32xf32>
    %c0_27 = arith.constant 0 : index
    %c0_28 = arith.constant 0 : index
    %25 = vector.load %arg9[%c0_27, %c0_28] : memref<1x32xf32, #tpu.memory_space<vmem>>, vector<1x32xf32>
    %26 = vector.shape_cast %25 : vector<1x32xf32> to vector<1x1x32xf32>
    %c0_29 = arith.constant 0 : index
    %c0_30 = arith.constant 0 : index
    %27 = vector.load %arg11[%c0_29, %c0_30] : memref<32x128xf32, #tpu.memory_space<vmem>>, vector<32x128xf32>
    %c0_31 = arith.constant 0 : index
    %c0_32 = arith.constant 0 : index
    %28 = vector.load %arg12[%c0_31, %c0_32] : memref<32x128xf32, #tpu.memory_space<vmem>>, vector<32x128xf32>
    %c0_33 = arith.constant 0 : index
    %c0_34 = arith.constant 0 : index
    %29 = vector.load %arg14[%c0_33, %c0_34] : memref<32x128xf32, #tpu.memory_space<vmem>>, vector<32x128xf32>
    %c0_35 = arith.constant 0 : index
    %c0_36 = arith.constant 0 : index
    %30 = vector.load %arg15[%c0_35, %c0_36] : memref<1x128xf32, #tpu.memory_space<vmem>>, vector<1x128xf32>
    %c0_i32 = arith.constant 0 : i32
    %cst_37 = arith.constant dense<0.000000e+00> : vector<8x32xf32>
    %31 = tpu.matmul %22, %23, %cst_37 {dimension_numbers = #tpu.dot_dimension_numbers<[1], [0], [0], [1], [0, 0, 1, 1], [], []>} : vector<8x32xf32>, vector<32x32xf32>, vector<8x32xf32> -> vector<8x32xf32>
    %32 = vector.broadcast %24 : vector<1x32xf32> to vector<8x32xf32>
    %33 = arith.addf %31, %32 : vector<8x32xf32>
    %34 = vector.shape_cast %33 : vector<8x32xf32> to vector<1x8x32xf32>
    %35 = vector.broadcast %34 : vector<1x8x32xf32> to vector<16x8x32xf32>
    %36 = arith.addf %13, %35 : vector<16x8x32xf32>
    %37 = math.tanh %36 : vector<16x8x32xf32>
    %38 = vector.broadcast %26 : vector<1x1x32xf32> to vector<16x8x32xf32>
    %39 = arith.mulf %37, %38 : vector<16x8x32xf32>
    %cst_38 = arith.constant dense<0.000000e+00> : vector<16x8xf32>
    %40 = vector.multi_reduction <add>, %39, %cst_38 [2] : vector<16x8x32xf32> to vector<16x8xf32>
    %41 = vector.shape_cast %40 : vector<16x8xf32> to vector<16x8x1xf32>
    %cst_39 = arith.constant dense<0xFF800000> : vector<8x1xf32>
    %42 = vector.multi_reduction <maximumf>, %41, %cst_39 [0] : vector<16x8x1xf32> to vector<8x1xf32>
    %43 = vector.shape_cast %42 : vector<8x1xf32> to vector<1x8x1xf32>
    %44 = vector.broadcast %43 : vector<1x8x1xf32> to vector<16x8x1xf32>
    %45 = arith.subf %41, %44 : vector<16x8x1xf32>
    %46 = math.exp %45 : vector<16x8x1xf32>
    %cst_40 = arith.constant dense<0.000000e+00> : vector<8x1xf32>
    %47 = vector.multi_reduction <add>, %46, %cst_40 [0] : vector<16x8x1xf32> to vector<8x1xf32>
    %48 = vector.shape_cast %47 : vector<8x1xf32> to vector<1x8x1xf32>
    %49 = math.log %48 : vector<1x8x1xf32>
    %50 = arith.addf %49, %43 : vector<1x8x1xf32>
    %51 = vector.broadcast %50 : vector<1x8x1xf32> to vector<16x8x1xf32>
    %52 = arith.subf %41, %51 : vector<16x8x1xf32>
    %53 = vector.broadcast %52 : vector<16x8x1xf32> to vector<16x8x32xf32>
    %54 = arith.mulf %15, %53 : vector<16x8x32xf32>
    %cst_41 = arith.constant dense<0.000000e+00> : vector<8x32xf32>
    %55 = vector.multi_reduction <add>, %54, %cst_41 [0] : vector<16x8x32xf32> to vector<8x32xf32>
    %c8_i32 = arith.constant 8 : i32
    %56 = arith.muli %c0_i32, %c8_i32 : i32
    %57 = tpu.assume_multiple %56, 8 : i32
    %58 = arith.index_cast %57 : i32 to index
    %c0_42 = arith.constant 0 : index
    %59 = vector.load %arg17[%58, %c0_42] : memref<56x128xf32, #tpu.memory_space<vmem>>, vector<8x128xf32>
    %cst_43 = arith.constant dense<0.000000e+00> : vector<8x128xf32>
    %60 = tpu.matmul %22, %28, %cst_43 {dimension_numbers = #tpu.dot_dimension_numbers<[1], [0], [0], [1], [0, 0, 1, 1], [], []>} : vector<8x32xf32>, vector<32x128xf32>, vector<8x128xf32> -> vector<8x128xf32>
    %61 = arith.addf %59, %60 : vector<8x128xf32>
    %cst_44 = arith.constant dense<0.000000e+00> : vector<8x128xf32>
    %62 = tpu.matmul %55, %27, %cst_44 {dimension_numbers = #tpu.dot_dimension_numbers<[1], [0], [0], [1], [0, 0, 1, 1], [], []>} : vector<8x32xf32>, vector<32x128xf32>, vector<8x128xf32> -> vector<8x128xf32>
    %63 = arith.addf %61, %62 : vector<8x128xf32>
    %64 = vector.extract_strided_slice %63 {offsets = [0, 0], sizes = [8, 32], strides = [1, 1]} : vector<8x128xf32> to vector<8x32xf32>
    %65 = arith.negf %64 : vector<8x32xf32>
    %66 = math.exp %65 : vector<8x32xf32>
    %cst_45 = arith.constant 1.000000e+00 : f32
    %67 = vector.broadcast %cst_45 : f32 to vector<8x32xf32>
    %68 = arith.addf %67, %66 : vector<8x32xf32>
    %69 = arith.divf %67, %68 : vector<8x32xf32>
    %70 = vector.extract_strided_slice %63 {offsets = [0, 32], sizes = [8, 32], strides = [1, 1]} : vector<8x128xf32> to vector<8x32xf32>
    %71 = arith.negf %70 : vector<8x32xf32>
    %72 = math.exp %71 : vector<8x32xf32>
    %cst_46 = arith.constant 1.000000e+00 : f32
    %73 = vector.broadcast %cst_46 : f32 to vector<8x32xf32>
    %74 = arith.addf %73, %72 : vector<8x32xf32>
    %75 = arith.divf %73, %74 : vector<8x32xf32>
    %76 = vector.extract_strided_slice %63 {offsets = [0, 64], sizes = [8, 32], strides = [1, 1]} : vector<8x128xf32> to vector<8x32xf32>
    %77 = math.tanh %76 : vector<8x32xf32>
    %78 = vector.extract_strided_slice %63 {offsets = [0, 96], sizes = [8, 32], strides = [1, 1]} : vector<8x128xf32> to vector<8x32xf32>
    %79 = arith.negf %78 : vector<8x32xf32>
    %80 = math.exp %79 : vector<8x32xf32>
    %cst_47 = arith.constant 1.000000e+00 : f32
    %81 = vector.broadcast %cst_47 : f32 to vector<8x32xf32>
    %82 = arith.addf %81, %80 : vector<8x32xf32>
    %83 = arith.divf %81, %82 : vector<8x32xf32>
    %84 = arith.mulf %75, %22 : vector<8x32xf32>
    %85 = arith.mulf %69, %77 : vector<8x32xf32>
    %86 = arith.addf %84, %85 : vector<8x32xf32>
    %87 = math.tanh %86 : vector<8x32xf32>
    %88 = arith.mulf %83, %87 : vector<8x32xf32>
    %cst_48 = arith.constant dense<0.000000e+00> : vector<8x128xf32>
    %89 = tpu.matmul %88, %29, %cst_48 {dimension_numbers = #tpu.dot_dimension_numbers<[1], [0], [0], [1], [0, 0, 1, 1], [], []>} : vector<8x32xf32>, vector<32x128xf32>, vector<8x128xf32> -> vector<8x128xf32>
    %90 = vector.broadcast %30 : vector<1x128xf32> to vector<8x128xf32>
    %91 = arith.addf %89, %90 : vector<8x128xf32>
    %92 = arith.index_cast %c0_i32 : i32 to index
    %c0_49 = arith.constant 0 : index
    %c0_50 = arith.constant 0 : index
    %93 = vector.load %arg16[%92, %c0_49, %c0_50] : memref<7x8x128xf32, #tpu.memory_space<vmem>>, vector<1x8x128xf32>
    %94 = vector.shape_cast %93 : vector<1x8x128xf32> to vector<8x128xf32>
    %95 = vector.shape_cast %91 : vector<8x128xf32> to vector<1x8x128xf32>
    tpu.vector_store %arg16[%92, %c0_49, %c0_50], %95 {strides = array<i32>} : memref<7x8x128xf32, #tpu.memory_space<vmem>>, vector<1x8x128xf32>,
    %c1_i32 = arith.constant 1 : i32
    %cst_51 = arith.constant dense<0.000000e+00> : vector<8x32xf32>
    %96 = tpu.matmul %88, %23, %cst_51 {dimension_numbers = #tpu.dot_dimension_numbers<[1], [0], [0], [1], [0, 0, 1, 1], [], []>} : vector<8x32xf32>, vector<32x32xf32>, vector<8x32xf32> -> vector<8x32xf32>
    %97 = vector.broadcast %24 : vector<1x32xf32> to vector<8x32xf32>
    %98 = arith.addf %96, %97 : vector<8x32xf32>
    %99 = vector.shape_cast %98 : vector<8x32xf32> to vector<1x8x32xf32>
    %100 = vector.broadcast %99 : vector<1x8x32xf32> to vector<16x8x32xf32>
    %101 = arith.addf %13, %100 : vector<16x8x32xf32>
    %102 = math.tanh %101 : vector<16x8x32xf32>
    %103 = vector.broadcast %26 : vector<1x1x32xf32> to vector<16x8x32xf32>
    %104 = arith.mulf %102, %103 : vector<16x8x32xf32>
    %cst_52 = arith.constant dense<0.000000e+00> : vector<16x8xf32>
    %105 = vector.multi_reduction <add>, %104, %cst_52 [2] : vector<16x8x32xf32> to vector<16x8xf32>
    %106 = vector.shape_cast %105 : vector<16x8xf32> to vector<16x8x1xf32>
    %cst_53 = arith.constant dense<0xFF800000> : vector<8x1xf32>
    %107 = vector.multi_reduction <maximumf>, %106, %cst_53 [0] : vector<16x8x1xf32> to vector<8x1xf32>
    %108 = vector.shape_cast %107 : vector<8x1xf32> to vector<1x8x1xf32>
    %109 = vector.broadcast %108 : vector<1x8x1xf32> to vector<16x8x1xf32>
    %110 = arith.subf %106, %109 : vector<16x8x1xf32>
    %111 = math.exp %110 : vector<16x8x1xf32>
    %cst_54 = arith.constant dense<0.000000e+00> : vector<8x1xf32>
    %112 = vector.multi_reduction <add>, %111, %cst_54 [0] : vector<16x8x1xf32> to vector<8x1xf32>
    %113 = vector.shape_cast %112 : vector<8x1xf32> to vector<1x8x1xf32>
    %114 = math.log %113 : vector<1x8x1xf32>
    %115 = arith.addf %114, %108 : vector<1x8x1xf32>
    %116 = vector.broadcast %115 : vector<1x8x1xf32> to vector<16x8x1xf32>
    %117 = arith.subf %106, %116 : vector<16x8x1xf32>
    %118 = vector.broadcast %117 : vector<16x8x1xf32> to vector<16x8x32xf32>
    %119 = arith.mulf %15, %118 : vector<16x8x32xf32>
    %cst_55 = arith.constant dense<0.000000e+00> : vector<8x32xf32>
    %120 = vector.multi_reduction <add>, %119, %cst_55 [0] : vector<16x8x32xf32> to vector<8x32xf32>
    %c8_i32_56 = arith.constant 8 : i32
    %121 = arith.muli %c1_i32, %c8_i32_56 : i32
    %122 = tpu.assume_multiple %121, 8 : i32
    %123 = arith.index_cast %122 : i32 to index
    %c0_57 = arith.constant 0 : index
    %124 = vector.load %arg17[%123, %c0_57] : memref<56x128xf32, #tpu.memory_space<vmem>>, vector<8x128xf32>
    %cst_58 = arith.constant dense<0.000000e+00> : vector<8x128xf32>
    %125 = tpu.matmul %88, %28, %cst_58 {dimension_numbers = #tpu.dot_dimension_numbers<[1], [0], [0], [1], [0, 0, 1, 1], [], []>} : vector<8x32xf32>, vector<32x128xf32>, vector<8x128xf32> -> vector<8x128xf32>
    %126 = arith.addf %124, %125 : vector<8x128xf32>
    %cst_59 = arith.constant dense<0.000000e+00> : vector<8x128xf32>
    %127 = tpu.matmul %120, %27, %cst_59 {dimension_numbers = #tpu.dot_dimension_numbers<[1], [0], [0], [1], [0, 0, 1, 1], [], []>} : vector<8x32xf32>, vector<32x128xf32>, vector<8x128xf32> -> vector<8x128xf32>
    %128 = arith.addf %126, %127 : vector<8x128xf32>
    %129 = vector.extract_strided_slice %128 {offsets = [0, 0], sizes = [8, 32], strides = [1, 1]} : vector<8x128xf32> to vector<8x32xf32>
    %130 = arith.negf %129 : vector<8x32xf32>
    %131 = math.exp %130 : vector<8x32xf32>
    %cst_60 = arith.constant 1.000000e+00 : f32
    %132 = vector.broadcast %cst_60 : f32 to vector<8x32xf32>
    %133 = arith.addf %132, %131 : vector<8x32xf32>
    %134 = arith.divf %132, %133 : vector<8x32xf32>
    %135 = vector.extract_strided_slice %128 {offsets = [0, 32], sizes = [8, 32], strides = [1, 1]} : vector<8x128xf32> to vector<8x32xf32>
    %136 = arith.negf %135 : vector<8x32xf32>
    %137 = math.exp %136 : vector<8x32xf32>
    %cst_61 = arith.constant 1.000000e+00 : f32
    %138 = vector.broadcast %cst_61 : f32 to vector<8x32xf32>
    %139 = arith.addf %138, %137 : vector<8x32xf32>
    %140 = arith.divf %138, %139 : vector<8x32xf32>
    %141 = vector.extract_strided_slice %128 {offsets = [0, 64], sizes = [8, 32], strides = [1, 1]} : vector<8x128xf32> to vector<8x32xf32>
    %142 = math.tanh %141 : vector<8x32xf32>
    %143 = vector.extract_strided_slice %128 {offsets = [0, 96], sizes = [8, 32], strides = [1, 1]} : vector<8x128xf32> to vector<8x32xf32>
    %144 = arith.negf %143 : vector<8x32xf32>
    %145 = math.exp %144 : vector<8x32xf32>
    %cst_62 = arith.constant 1.000000e+00 : f32
    %146 = vector.broadcast %cst_62 : f32 to vector<8x32xf32>
    %147 = arith.addf %146, %145 : vector<8x32xf32>
    %148 = arith.divf %146, %147 : vector<8x32xf32>
    %149 = arith.mulf %140, %86 : vector<8x32xf32>
    %150 = arith.mulf %134, %142 : vector<8x32xf32>
    %151 = arith.addf %149, %150 : vector<8x32xf32>
    %152 = math.tanh %151 : vector<8x32xf32>
    %153 = arith.mulf %148, %152 : vector<8x32xf32>
    %cst_63 = arith.constant dense<0.000000e+00> : vector<8x128xf32>
    %154 = tpu.matmul %153, %29, %cst_63 {dimension_numbers = #tpu.dot_dimension_numbers<[1], [0], [0], [1], [0, 0, 1, 1], [], []>} : vector<8x32xf32>, vector<32x128xf32>, vector<8x128xf32> -> vector<8x128xf32>
    %155 = vector.broadcast %30 : vector<1x128xf32> to vector<8x128xf32>
    %156 = arith.addf %154, %155 : vector<8x128xf32>
    %157 = arith.index_cast %c1_i32 : i32 to index
    %c0_64 = arith.constant 0 : index
    %c0_65 = arith.constant 0 : index
    %158 = vector.load %arg16[%157, %c0_64, %c0_65] : memref<7x8x128xf32, #tpu.memory_space<vmem>>, vector<1x8x128xf32>
    %159 = vector.shape_cast %158 : vector<1x8x128xf32> to vector<8x128xf32>
    %160 = vector.shape_cast %156 : vector<8x128xf32> to vector<1x8x128xf32>
    tpu.vector_store %arg16[%157, %c0_64, %c0_65], %160 {strides = array<i32>} : memref<7x8x128xf32, #tpu.memory_space<vmem>>, vector<1x8x128xf32>,
    %c2_i32 = arith.constant 2 : i32
    %cst_66 = arith.constant dense<0.000000e+00> : vector<8x32xf32>
    %161 = tpu.matmul %153, %23, %cst_66 {dimension_numbers = #tpu.dot_dimension_numbers<[1], [0], [0], [1], [0, 0, 1, 1], [], []>} : vector<8x32xf32>, vector<32x32xf32>, vector<8x32xf32> -> vector<8x32xf32>
    %162 = vector.broadcast %24 : vector<1x32xf32> to vector<8x32xf32>
    %163 = arith.addf %161, %162 : vector<8x32xf32>
    %164 = vector.shape_cast %163 : vector<8x32xf32> to vector<1x8x32xf32>
    %165 = vector.broadcast %164 : vector<1x8x32xf32> to vector<16x8x32xf32>
    %166 = arith.addf %13, %165 : vector<16x8x32xf32>
    %167 = math.tanh %166 : vector<16x8x32xf32>
    %168 = vector.broadcast %26 : vector<1x1x32xf32> to vector<16x8x32xf32>
    %169 = arith.mulf %167, %168 : vector<16x8x32xf32>
    %cst_67 = arith.constant dense<0.000000e+00> : vector<16x8xf32>
    %170 = vector.multi_reduction <add>, %169, %cst_67 [2] : vector<16x8x32xf32> to vector<16x8xf32>
    %171 = vector.shape_cast %170 : vector<16x8xf32> to vector<16x8x1xf32>
    %cst_68 = arith.constant dense<0xFF800000> : vector<8x1xf32>
    %172 = vector.multi_reduction <maximumf>, %171, %cst_68 [0] : vector<16x8x1xf32> to vector<8x1xf32>
    %173 = vector.shape_cast %172 : vector<8x1xf32> to vector<1x8x1xf32>
    %174 = vector.broadcast %173 : vector<1x8x1xf32> to vector<16x8x1xf32>
    %175 = arith.subf %171, %174 : vector<16x8x1xf32>
    %176 = math.exp %175 : vector<16x8x1xf32>
    %cst_69 = arith.constant dense<0.000000e+00> : vector<8x1xf32>
    %177 = vector.multi_reduction <add>, %176, %cst_69 [0] : vector<16x8x1xf32> to vector<8x1xf32>
    %178 = vector.shape_cast %177 : vector<8x1xf32> to vector<1x8x1xf32>
    %179 = math.log %178 : vector<1x8x1xf32>
    %180 = arith.addf %179, %173 : vector<1x8x1xf32>
    %181 = vector.broadcast %180 : vector<1x8x1xf32> to vector<16x8x1xf32>
    %182 = arith.subf %171, %181 : vector<16x8x1xf32>
    %183 = vector.broadcast %182 : vector<16x8x1xf32> to vector<16x8x32xf32>
    %184 = arith.mulf %15, %183 : vector<16x8x32xf32>
    %cst_70 = arith.constant dense<0.000000e+00> : vector<8x32xf32>
    %185 = vector.multi_reduction <add>, %184, %cst_70 [0] : vector<16x8x32xf32> to vector<8x32xf32>
    %c8_i32_71 = arith.constant 8 : i32
    %186 = arith.muli %c2_i32, %c8_i32_71 : i32
    %187 = tpu.assume_multiple %186, 8 : i32
    %188 = arith.index_cast %187 : i32 to index
    %c0_72 = arith.constant 0 : index
    %189 = vector.load %arg17[%188, %c0_72] : memref<56x128xf32, #tpu.memory_space<vmem>>, vector<8x128xf32>
    %cst_73 = arith.constant dense<0.000000e+00> : vector<8x128xf32>
    %190 = tpu.matmul %153, %28, %cst_73 {dimension_numbers = #tpu.dot_dimension_numbers<[1], [0], [0], [1], [0, 0, 1, 1], [], []>} : vector<8x32xf32>, vector<32x128xf32>, vector<8x128xf32> -> vector<8x128xf32>
    %191 = arith.addf %189, %190 : vector<8x128xf32>
    %cst_74 = arith.constant dense<0.000000e+00> : vector<8x128xf32>
    %192 = tpu.matmul %185, %27, %cst_74 {dimension_numbers = #tpu.dot_dimension_numbers<[1], [0], [0], [1], [0, 0, 1, 1], [], []>} : vector<8x32xf32>, vector<32x128xf32>, vector<8x128xf32> -> vector<8x128xf32>
    %193 = arith.addf %191, %192 : vector<8x128xf32>
    %194 = vector.extract_strided_slice %193 {offsets = [0, 0], sizes = [8, 32], strides = [1, 1]} : vector<8x128xf32> to vector<8x32xf32>
    %195 = arith.negf %194 : vector<8x32xf32>
    %196 = math.exp %195 : vector<8x32xf32>
    %cst_75 = arith.constant 1.000000e+00 : f32
    %197 = vector.broadcast %cst_75 : f32 to vector<8x32xf32>
    %198 = arith.addf %197, %196 : vector<8x32xf32>
    %199 = arith.divf %197, %198 : vector<8x32xf32>
    %200 = vector.extract_strided_slice %193 {offsets = [0, 32], sizes = [8, 32], strides = [1, 1]} : vector<8x128xf32> to vector<8x32xf32>
    %201 = arith.negf %200 : vector<8x32xf32>
    %202 = math.exp %201 : vector<8x32xf32>
    %cst_76 = arith.constant 1.000000e+00 : f32
    %203 = vector.broadcast %cst_76 : f32 to vector<8x32xf32>
    %204 = arith.addf %203, %202 : vector<8x32xf32>
    %205 = arith.divf %203, %204 : vector<8x32xf32>
    %206 = vector.extract_strided_slice %193 {offsets = [0, 64], sizes = [8, 32], strides = [1, 1]} : vector<8x128xf32> to vector<8x32xf32>
    %207 = math.tanh %206 : vector<8x32xf32>
    %208 = vector.extract_strided_slice %193 {offsets = [0, 96], sizes = [8, 32], strides = [1, 1]} : vector<8x128xf32> to vector<8x32xf32>
    %209 = arith.negf %208 : vector<8x32xf32>
    %210 = math.exp %209 : vector<8x32xf32>
    %cst_77 = arith.constant 1.000000e+00 : f32
    %211 = vector.broadcast %cst_77 : f32 to vector<8x32xf32>
    %212 = arith.addf %211, %210 : vector<8x32xf32>
    %213 = arith.divf %211, %212 : vector<8x32xf32>
    %214 = arith.mulf %205, %151 : vector<8x32xf32>
    %215 = arith.mulf %199, %207 : vector<8x32xf32>
    %216 = arith.addf %214, %215 : vector<8x32xf32>
    %217 = math.tanh %216 : vector<8x32xf32>
    %218 = arith.mulf %213, %217 : vector<8x32xf32>
    %cst_78 = arith.constant dense<0.000000e+00> : vector<8x128xf32>
    %219 = tpu.matmul %218, %29, %cst_78 {dimension_numbers = #tpu.dot_dimension_numbers<[1], [0], [0], [1], [0, 0, 1, 1], [], []>} : vector<8x32xf32>, vector<32x128xf32>, vector<8x128xf32> -> vector<8x128xf32>
    %220 = vector.broadcast %30 : vector<1x128xf32> to vector<8x128xf32>
    %221 = arith.addf %219, %220 : vector<8x128xf32>
    %222 = arith.index_cast %c2_i32 : i32 to index
    %c0_79 = arith.constant 0 : index
    %c0_80 = arith.constant 0 : index
    %223 = vector.load %arg16[%222, %c0_79, %c0_80] : memref<7x8x128xf32, #tpu.memory_space<vmem>>, vector<1x8x128xf32>
    %224 = vector.shape_cast %223 : vector<1x8x128xf32> to vector<8x128xf32>
    %225 = vector.shape_cast %221 : vector<8x128xf32> to vector<1x8x128xf32>
    tpu.vector_store %arg16[%222, %c0_79, %c0_80], %225 {strides = array<i32>} : memref<7x8x128xf32, #tpu.memory_space<vmem>>, vector<1x8x128xf32>,
    %c3_i32 = arith.constant 3 : i32
    %cst_81 = arith.constant dense<0.000000e+00> : vector<8x32xf32>
    %226 = tpu.matmul %218, %23, %cst_81 {dimension_numbers = #tpu.dot_dimension_numbers<[1], [0], [0], [1], [0, 0, 1, 1], [], []>} : vector<8x32xf32>, vector<32x32xf32>, vector<8x32xf32> -> vector<8x32xf32>
    %227 = vector.broadcast %24 : vector<1x32xf32> to vector<8x32xf32>
    %228 = arith.addf %226, %227 : vector<8x32xf32>
    %229 = vector.shape_cast %228 : vector<8x32xf32> to vector<1x8x32xf32>
    %230 = vector.broadcast %229 : vector<1x8x32xf32> to vector<16x8x32xf32>
    %231 = arith.addf %13, %230 : vector<16x8x32xf32>
    %232 = math.tanh %231 : vector<16x8x32xf32>
    %233 = vector.broadcast %26 : vector<1x1x32xf32> to vector<16x8x32xf32>
    %234 = arith.mulf %232, %233 : vector<16x8x32xf32>
    %cst_82 = arith.constant dense<0.000000e+00> : vector<16x8xf32>
    %235 = vector.multi_reduction <add>, %234, %cst_82 [2] : vector<16x8x32xf32> to vector<16x8xf32>
    %236 = vector.shape_cast %235 : vector<16x8xf32> to vector<16x8x1xf32>
    %cst_83 = arith.constant dense<0xFF800000> : vector<8x1xf32>
    %237 = vector.multi_reduction <maximumf>, %236, %cst_83 [0] : vector<16x8x1xf32> to vector<8x1xf32>
    %238 = vector.shape_cast %237 : vector<8x1xf32> to vector<1x8x1xf32>
    %239 = vector.broadcast %238 : vector<1x8x1xf32> to vector<16x8x1xf32>
    %240 = arith.subf %236, %239 : vector<16x8x1xf32>
    %241 = math.exp %240 : vector<16x8x1xf32>
    %cst_84 = arith.constant dense<0.000000e+00> : vector<8x1xf32>
    %242 = vector.multi_reduction <add>, %241, %cst_84 [0] : vector<16x8x1xf32> to vector<8x1xf32>
    %243 = vector.shape_cast %242 : vector<8x1xf32> to vector<1x8x1xf32>
    %244 = math.log %243 : vector<1x8x1xf32>
    %245 = arith.addf %244, %238 : vector<1x8x1xf32>
    %246 = vector.broadcast %245 : vector<1x8x1xf32> to vector<16x8x1xf32>
    %247 = arith.subf %236, %246 : vector<16x8x1xf32>
    %248 = vector.broadcast %247 : vector<16x8x1xf32> to vector<16x8x32xf32>
    %249 = arith.mulf %15, %248 : vector<16x8x32xf32>
    %cst_85 = arith.constant dense<0.000000e+00> : vector<8x32xf32>
    %250 = vector.multi_reduction <add>, %249, %cst_85 [0] : vector<16x8x32xf32> to vector<8x32xf32>
    %c8_i32_86 = arith.constant 8 : i32
    %251 = arith.muli %c3_i32, %c8_i32_86 : i32
    %252 = tpu.assume_multiple %251, 8 : i32
    %253 = arith.index_cast %252 : i32 to index
    %c0_87 = arith.constant 0 : index
    %254 = vector.load %arg17[%253, %c0_87] : memref<56x128xf32, #tpu.memory_space<vmem>>, vector<8x128xf32>
    %cst_88 = arith.constant dense<0.000000e+00> : vector<8x128xf32>
    %255 = tpu.matmul %218, %28, %cst_88 {dimension_numbers = #tpu.dot_dimension_numbers<[1], [0], [0], [1], [0, 0, 1, 1], [], []>} : vector<8x32xf32>, vector<32x128xf32>, vector<8x128xf32> -> vector<8x128xf32>
    %256 = arith.addf %254, %255 : vector<8x128xf32>
    %cst_89 = arith.constant dense<0.000000e+00> : vector<8x128xf32>
    %257 = tpu.matmul %250, %27, %cst_89 {dimension_numbers = #tpu.dot_dimension_numbers<[1], [0], [0], [1], [0, 0, 1, 1], [], []>} : vector<8x32xf32>, vector<32x128xf32>, vector<8x128xf32> -> vector<8x128xf32>
    %258 = arith.addf %256, %257 : vector<8x128xf32>
    %259 = vector.extract_strided_slice %258 {offsets = [0, 0], sizes = [8, 32], strides = [1, 1]} : vector<8x128xf32> to vector<8x32xf32>
    %260 = arith.negf %259 : vector<8x32xf32>
    %261 = math.exp %260 : vector<8x32xf32>
    %cst_90 = arith.constant 1.000000e+00 : f32
    %262 = vector.broadcast %cst_90 : f32 to vector<8x32xf32>
    %263 = arith.addf %262, %261 : vector<8x32xf32>
    %264 = arith.divf %262, %263 : vector<8x32xf32>
    %265 = vector.extract_strided_slice %258 {offsets = [0, 32], sizes = [8, 32], strides = [1, 1]} : vector<8x128xf32> to vector<8x32xf32>
    %266 = arith.negf %265 : vector<8x32xf32>
    %267 = math.exp %266 : vector<8x32xf32>
    %cst_91 = arith.constant 1.000000e+00 : f32
    %268 = vector.broadcast %cst_91 : f32 to vector<8x32xf32>
    %269 = arith.addf %268, %267 : vector<8x32xf32>
    %270 = arith.divf %268, %269 : vector<8x32xf32>
    %271 = vector.extract_strided_slice %258 {offsets = [0, 64], sizes = [8, 32], strides = [1, 1]} : vector<8x128xf32> to vector<8x32xf32>
    %272 = math.tanh %271 : vector<8x32xf32>
    %273 = vector.extract_strided_slice %258 {offsets = [0, 96], sizes = [8, 32], strides = [1, 1]} : vector<8x128xf32> to vector<8x32xf32>
    %274 = arith.negf %273 : vector<8x32xf32>
    %275 = math.exp %274 : vector<8x32xf32>
    %cst_92 = arith.constant 1.000000e+00 : f32
    %276 = vector.broadcast %cst_92 : f32 to vector<8x32xf32>
    %277 = arith.addf %276, %275 : vector<8x32xf32>
    %278 = arith.divf %276, %277 : vector<8x32xf32>
    %279 = arith.mulf %270, %216 : vector<8x32xf32>
    %280 = arith.mulf %264, %272 : vector<8x32xf32>
    %281 = arith.addf %279, %280 : vector<8x32xf32>
    %282 = math.tanh %281 : vector<8x32xf32>
    %283 = arith.mulf %278, %282 : vector<8x32xf32>
    %cst_93 = arith.constant dense<0.000000e+00> : vector<8x128xf32>
    %284 = tpu.matmul %283, %29, %cst_93 {dimension_numbers = #tpu.dot_dimension_numbers<[1], [0], [0], [1], [0, 0, 1, 1], [], []>} : vector<8x32xf32>, vector<32x128xf32>, vector<8x128xf32> -> vector<8x128xf32>
    %285 = vector.broadcast %30 : vector<1x128xf32> to vector<8x128xf32>
    %286 = arith.addf %284, %285 : vector<8x128xf32>
    %287 = arith.index_cast %c3_i32 : i32 to index
    %c0_94 = arith.constant 0 : index
    %c0_95 = arith.constant 0 : index
    %288 = vector.load %arg16[%287, %c0_94, %c0_95] : memref<7x8x128xf32, #tpu.memory_space<vmem>>, vector<1x8x128xf32>
    %289 = vector.shape_cast %288 : vector<1x8x128xf32> to vector<8x128xf32>
    %290 = vector.shape_cast %286 : vector<8x128xf32> to vector<1x8x128xf32>
    tpu.vector_store %arg16[%287, %c0_94, %c0_95], %290 {strides = array<i32>} : memref<7x8x128xf32, #tpu.memory_space<vmem>>, vector<1x8x128xf32>,
    %c4_i32 = arith.constant 4 : i32
    %cst_96 = arith.constant dense<0.000000e+00> : vector<8x32xf32>
    %291 = tpu.matmul %283, %23, %cst_96 {dimension_numbers = #tpu.dot_dimension_numbers<[1], [0], [0], [1], [0, 0, 1, 1], [], []>} : vector<8x32xf32>, vector<32x32xf32>, vector<8x32xf32> -> vector<8x32xf32>
    %292 = vector.broadcast %24 : vector<1x32xf32> to vector<8x32xf32>
    %293 = arith.addf %291, %292 : vector<8x32xf32>
    %294 = vector.shape_cast %293 : vector<8x32xf32> to vector<1x8x32xf32>
    %295 = vector.broadcast %294 : vector<1x8x32xf32> to vector<16x8x32xf32>
    %296 = arith.addf %13, %295 : vector<16x8x32xf32>
    %297 = math.tanh %296 : vector<16x8x32xf32>
    %298 = vector.broadcast %26 : vector<1x1x32xf32> to vector<16x8x32xf32>
    %299 = arith.mulf %297, %298 : vector<16x8x32xf32>
    %cst_97 = arith.constant dense<0.000000e+00> : vector<16x8xf32>
    %300 = vector.multi_reduction <add>, %299, %cst_97 [2] : vector<16x8x32xf32> to vector<16x8xf32>
    %301 = vector.shape_cast %300 : vector<16x8xf32> to vector<16x8x1xf32>
    %cst_98 = arith.constant dense<0xFF800000> : vector<8x1xf32>
    %302 = vector.multi_reduction <maximumf>, %301, %cst_98 [0] : vector<16x8x1xf32> to vector<8x1xf32>
    %303 = vector.shape_cast %302 : vector<8x1xf32> to vector<1x8x1xf32>
    %304 = vector.broadcast %303 : vector<1x8x1xf32> to vector<16x8x1xf32>
    %305 = arith.subf %301, %304 : vector<16x8x1xf32>
    %306 = math.exp %305 : vector<16x8x1xf32>
    %cst_99 = arith.constant dense<0.000000e+00> : vector<8x1xf32>
    %307 = vector.multi_reduction <add>, %306, %cst_99 [0] : vector<16x8x1xf32> to vector<8x1xf32>
    %308 = vector.shape_cast %307 : vector<8x1xf32> to vector<1x8x1xf32>
    %309 = math.log %308 : vector<1x8x1xf32>
    %310 = arith.addf %309, %303 : vector<1x8x1xf32>
    %311 = vector.broadcast %310 : vector<1x8x1xf32> to vector<16x8x1xf32>
    %312 = arith.subf %301, %311 : vector<16x8x1xf32>
    %313 = vector.broadcast %312 : vector<16x8x1xf32> to vector<16x8x32xf32>
    %314 = arith.mulf %15, %313 : vector<16x8x32xf32>
    %cst_100 = arith.constant dense<0.000000e+00> : vector<8x32xf32>
    %315 = vector.multi_reduction <add>, %314, %cst_100 [0] : vector<16x8x32xf32> to vector<8x32xf32>
    %c8_i32_101 = arith.constant 8 : i32
    %316 = arith.muli %c4_i32, %c8_i32_101 : i32
    %317 = tpu.assume_multiple %316, 8 : i32
    %318 = arith.index_cast %317 : i32 to index
    %c0_102 = arith.constant 0 : index
    %319 = vector.load %arg17[%318, %c0_102] : memref<56x128xf32, #tpu.memory_space<vmem>>, vector<8x128xf32>
    %cst_103 = arith.constant dense<0.000000e+00> : vector<8x128xf32>
    %320 = tpu.matmul %283, %28, %cst_103 {dimension_numbers = #tpu.dot_dimension_numbers<[1], [0], [0], [1], [0, 0, 1, 1], [], []>} : vector<8x32xf32>, vector<32x128xf32>, vector<8x128xf32> -> vector<8x128xf32>
    %321 = arith.addf %319, %320 : vector<8x128xf32>
    %cst_104 = arith.constant dense<0.000000e+00> : vector<8x128xf32>
    %322 = tpu.matmul %315, %27, %cst_104 {dimension_numbers = #tpu.dot_dimension_numbers<[1], [0], [0], [1], [0, 0, 1, 1], [], []>} : vector<8x32xf32>, vector<32x128xf32>, vector<8x128xf32> -> vector<8x128xf32>
    %323 = arith.addf %321, %322 : vector<8x128xf32>
    %324 = vector.extract_strided_slice %323 {offsets = [0, 0], sizes = [8, 32], strides = [1, 1]} : vector<8x128xf32> to vector<8x32xf32>
    %325 = arith.negf %324 : vector<8x32xf32>
    %326 = math.exp %325 : vector<8x32xf32>
    %cst_105 = arith.constant 1.000000e+00 : f32
    %327 = vector.broadcast %cst_105 : f32 to vector<8x32xf32>
    %328 = arith.addf %327, %326 : vector<8x32xf32>
    %329 = arith.divf %327, %328 : vector<8x32xf32>
    %330 = vector.extract_strided_slice %323 {offsets = [0, 32], sizes = [8, 32], strides = [1, 1]} : vector<8x128xf32> to vector<8x32xf32>
    %331 = arith.negf %330 : vector<8x32xf32>
    %332 = math.exp %331 : vector<8x32xf32>
    %cst_106 = arith.constant 1.000000e+00 : f32
    %333 = vector.broadcast %cst_106 : f32 to vector<8x32xf32>
    %334 = arith.addf %333, %332 : vector<8x32xf32>
    %335 = arith.divf %333, %334 : vector<8x32xf32>
    %336 = vector.extract_strided_slice %323 {offsets = [0, 64], sizes = [8, 32], strides = [1, 1]} : vector<8x128xf32> to vector<8x32xf32>
    %337 = math.tanh %336 : vector<8x32xf32>
    %338 = vector.extract_strided_slice %323 {offsets = [0, 96], sizes = [8, 32], strides = [1, 1]} : vector<8x128xf32> to vector<8x32xf32>
    %339 = arith.negf %338 : vector<8x32xf32>
    %340 = math.exp %339 : vector<8x32xf32>
    %cst_107 = arith.constant 1.000000e+00 : f32
    %341 = vector.broadcast %cst_107 : f32 to vector<8x32xf32>
    %342 = arith.addf %341, %340 : vector<8x32xf32>
    %343 = arith.divf %341, %342 : vector<8x32xf32>
    %344 = arith.mulf %335, %281 : vector<8x32xf32>
    %345 = arith.mulf %329, %337 : vector<8x32xf32>
    %346 = arith.addf %344, %345 : vector<8x32xf32>
    %347 = math.tanh %346 : vector<8x32xf32>
    %348 = arith.mulf %343, %347 : vector<8x32xf32>
    %cst_108 = arith.constant dense<0.000000e+00> : vector<8x128xf32>
    %349 = tpu.matmul %348, %29, %cst_108 {dimension_numbers = #tpu.dot_dimension_numbers<[1], [0], [0], [1], [0, 0, 1, 1], [], []>} : vector<8x32xf32>, vector<32x128xf32>, vector<8x128xf32> -> vector<8x128xf32>
    %350 = vector.broadcast %30 : vector<1x128xf32> to vector<8x128xf32>
    %351 = arith.addf %349, %350 : vector<8x128xf32>
    %352 = arith.index_cast %c4_i32 : i32 to index
    %c0_109 = arith.constant 0 : index
    %c0_110 = arith.constant 0 : index
    %353 = vector.load %arg16[%352, %c0_109, %c0_110] : memref<7x8x128xf32, #tpu.memory_space<vmem>>, vector<1x8x128xf32>
    %354 = vector.shape_cast %353 : vector<1x8x128xf32> to vector<8x128xf32>
    %355 = vector.shape_cast %351 : vector<8x128xf32> to vector<1x8x128xf32>
    tpu.vector_store %arg16[%352, %c0_109, %c0_110], %355 {strides = array<i32>} : memref<7x8x128xf32, #tpu.memory_space<vmem>>, vector<1x8x128xf32>,
    %c5_i32 = arith.constant 5 : i32
    %cst_111 = arith.constant dense<0.000000e+00> : vector<8x32xf32>
    %356 = tpu.matmul %348, %23, %cst_111 {dimension_numbers = #tpu.dot_dimension_numbers<[1], [0], [0], [1], [0, 0, 1, 1], [], []>} : vector<8x32xf32>, vector<32x32xf32>, vector<8x32xf32> -> vector<8x32xf32>
    %357 = vector.broadcast %24 : vector<1x32xf32> to vector<8x32xf32>
    %358 = arith.addf %356, %357 : vector<8x32xf32>
    %359 = vector.shape_cast %358 : vector<8x32xf32> to vector<1x8x32xf32>
    %360 = vector.broadcast %359 : vector<1x8x32xf32> to vector<16x8x32xf32>
    %361 = arith.addf %13, %360 : vector<16x8x32xf32>
    %362 = math.tanh %361 : vector<16x8x32xf32>
    %363 = vector.broadcast %26 : vector<1x1x32xf32> to vector<16x8x32xf32>
    %364 = arith.mulf %362, %363 : vector<16x8x32xf32>
    %cst_112 = arith.constant dense<0.000000e+00> : vector<16x8xf32>
    %365 = vector.multi_reduction <add>, %364, %cst_112 [2] : vector<16x8x32xf32> to vector<16x8xf32>
    %366 = vector.shape_cast %365 : vector<16x8xf32> to vector<16x8x1xf32>
    %cst_113 = arith.constant dense<0xFF800000> : vector<8x1xf32>
    %367 = vector.multi_reduction <maximumf>, %366, %cst_113 [0] : vector<16x8x1xf32> to vector<8x1xf32>
    %368 = vector.shape_cast %367 : vector<8x1xf32> to vector<1x8x1xf32>
    %369 = vector.broadcast %368 : vector<1x8x1xf32> to vector<16x8x1xf32>
    %370 = arith.subf %366, %369 : vector<16x8x1xf32>
    %371 = math.exp %370 : vector<16x8x1xf32>
    %cst_114 = arith.constant dense<0.000000e+00> : vector<8x1xf32>
    %372 = vector.multi_reduction <add>, %371, %cst_114 [0] : vector<16x8x1xf32> to vector<8x1xf32>
    %373 = vector.shape_cast %372 : vector<8x1xf32> to vector<1x8x1xf32>
    %374 = math.log %373 : vector<1x8x1xf32>
    %375 = arith.addf %374, %368 : vector<1x8x1xf32>
    %376 = vector.broadcast %375 : vector<1x8x1xf32> to vector<16x8x1xf32>
    %377 = arith.subf %366, %376 : vector<16x8x1xf32>
    %378 = vector.broadcast %377 : vector<16x8x1xf32> to vector<16x8x32xf32>
    %379 = arith.mulf %15, %378 : vector<16x8x32xf32>
    %cst_115 = arith.constant dense<0.000000e+00> : vector<8x32xf32>
    %380 = vector.multi_reduction <add>, %379, %cst_115 [0] : vector<16x8x32xf32> to vector<8x32xf32>
    %c8_i32_116 = arith.constant 8 : i32
    %381 = arith.muli %c5_i32, %c8_i32_116 : i32
    %382 = tpu.assume_multiple %381, 8 : i32
    %383 = arith.index_cast %382 : i32 to index
    %c0_117 = arith.constant 0 : index
    %384 = vector.load %arg17[%383, %c0_117] : memref<56x128xf32, #tpu.memory_space<vmem>>, vector<8x128xf32>
    %cst_118 = arith.constant dense<0.000000e+00> : vector<8x128xf32>
    %385 = tpu.matmul %348, %28, %cst_118 {dimension_numbers = #tpu.dot_dimension_numbers<[1], [0], [0], [1], [0, 0, 1, 1], [], []>} : vector<8x32xf32>, vector<32x128xf32>, vector<8x128xf32> -> vector<8x128xf32>
    %386 = arith.addf %384, %385 : vector<8x128xf32>
    %cst_119 = arith.constant dense<0.000000e+00> : vector<8x128xf32>
    %387 = tpu.matmul %380, %27, %cst_119 {dimension_numbers = #tpu.dot_dimension_numbers<[1], [0], [0], [1], [0, 0, 1, 1], [], []>} : vector<8x32xf32>, vector<32x128xf32>, vector<8x128xf32> -> vector<8x128xf32>
    %388 = arith.addf %386, %387 : vector<8x128xf32>
    %389 = vector.extract_strided_slice %388 {offsets = [0, 0], sizes = [8, 32], strides = [1, 1]} : vector<8x128xf32> to vector<8x32xf32>
    %390 = arith.negf %389 : vector<8x32xf32>
    %391 = math.exp %390 : vector<8x32xf32>
    %cst_120 = arith.constant 1.000000e+00 : f32
    %392 = vector.broadcast %cst_120 : f32 to vector<8x32xf32>
    %393 = arith.addf %392, %391 : vector<8x32xf32>
    %394 = arith.divf %392, %393 : vector<8x32xf32>
    %395 = vector.extract_strided_slice %388 {offsets = [0, 32], sizes = [8, 32], strides = [1, 1]} : vector<8x128xf32> to vector<8x32xf32>
    %396 = arith.negf %395 : vector<8x32xf32>
    %397 = math.exp %396 : vector<8x32xf32>
    %cst_121 = arith.constant 1.000000e+00 : f32
    %398 = vector.broadcast %cst_121 : f32 to vector<8x32xf32>
    %399 = arith.addf %398, %397 : vector<8x32xf32>
    %400 = arith.divf %398, %399 : vector<8x32xf32>
    %401 = vector.extract_strided_slice %388 {offsets = [0, 64], sizes = [8, 32], strides = [1, 1]} : vector<8x128xf32> to vector<8x32xf32>
    %402 = math.tanh %401 : vector<8x32xf32>
    %403 = vector.extract_strided_slice %388 {offsets = [0, 96], sizes = [8, 32], strides = [1, 1]} : vector<8x128xf32> to vector<8x32xf32>
    %404 = arith.negf %403 : vector<8x32xf32>
    %405 = math.exp %404 : vector<8x32xf32>
    %cst_122 = arith.constant 1.000000e+00 : f32
    %406 = vector.broadcast %cst_122 : f32 to vector<8x32xf32>
    %407 = arith.addf %406, %405 : vector<8x32xf32>
    %408 = arith.divf %406, %407 : vector<8x32xf32>
    %409 = arith.mulf %400, %346 : vector<8x32xf32>
    %410 = arith.mulf %394, %402 : vector<8x32xf32>
    %411 = arith.addf %409, %410 : vector<8x32xf32>
    %412 = math.tanh %411 : vector<8x32xf32>
    %413 = arith.mulf %408, %412 : vector<8x32xf32>
    %cst_123 = arith.constant dense<0.000000e+00> : vector<8x128xf32>
    %414 = tpu.matmul %413, %29, %cst_123 {dimension_numbers = #tpu.dot_dimension_numbers<[1], [0], [0], [1], [0, 0, 1, 1], [], []>} : vector<8x32xf32>, vector<32x128xf32>, vector<8x128xf32> -> vector<8x128xf32>
    %415 = vector.broadcast %30 : vector<1x128xf32> to vector<8x128xf32>
    %416 = arith.addf %414, %415 : vector<8x128xf32>
    %417 = arith.index_cast %c5_i32 : i32 to index
    %c0_124 = arith.constant 0 : index
    %c0_125 = arith.constant 0 : index
    %418 = vector.load %arg16[%417, %c0_124, %c0_125] : memref<7x8x128xf32, #tpu.memory_space<vmem>>, vector<1x8x128xf32>
    %419 = vector.shape_cast %418 : vector<1x8x128xf32> to vector<8x128xf32>
    %420 = vector.shape_cast %416 : vector<8x128xf32> to vector<1x8x128xf32>
    tpu.vector_store %arg16[%417, %c0_124, %c0_125], %420 {strides = array<i32>} : memref<7x8x128xf32, #tpu.memory_space<vmem>>, vector<1x8x128xf32>,
    %c6_i32 = arith.constant 6 : i32
    %cst_126 = arith.constant dense<0.000000e+00> : vector<8x32xf32>
    %421 = tpu.matmul %413, %23, %cst_126 {dimension_numbers = #tpu.dot_dimension_numbers<[1], [0], [0], [1], [0, 0, 1, 1], [], []>} : vector<8x32xf32>, vector<32x32xf32>, vector<8x32xf32> -> vector<8x32xf32>
    %422 = vector.broadcast %24 : vector<1x32xf32> to vector<8x32xf32>
    %423 = arith.addf %421, %422 : vector<8x32xf32>
    %424 = vector.shape_cast %423 : vector<8x32xf32> to vector<1x8x32xf32>
    %425 = vector.broadcast %424 : vector<1x8x32xf32> to vector<16x8x32xf32>
    %426 = arith.addf %13, %425 : vector<16x8x32xf32>
    %427 = math.tanh %426 : vector<16x8x32xf32>
    %428 = vector.broadcast %26 : vector<1x1x32xf32> to vector<16x8x32xf32>
    %429 = arith.mulf %427, %428 : vector<16x8x32xf32>
    %cst_127 = arith.constant dense<0.000000e+00> : vector<16x8xf32>
    %430 = vector.multi_reduction <add>, %429, %cst_127 [2] : vector<16x8x32xf32> to vector<16x8xf32>
    %431 = vector.shape_cast %430 : vector<16x8xf32> to vector<16x8x1xf32>
    %cst_128 = arith.constant dense<0xFF800000> : vector<8x1xf32>
    %432 = vector.multi_reduction <maximumf>, %431, %cst_128 [0] : vector<16x8x1xf32> to vector<8x1xf32>
    %433 = vector.shape_cast %432 : vector<8x1xf32> to vector<1x8x1xf32>
    %434 = vector.broadcast %433 : vector<1x8x1xf32> to vector<16x8x1xf32>
    %435 = arith.subf %431, %434 : vector<16x8x1xf32>
    %436 = math.exp %435 : vector<16x8x1xf32>
    %cst_129 = arith.constant dense<0.000000e+00> : vector<8x1xf32>
    %437 = vector.multi_reduction <add>, %436, %cst_129 [0] : vector<16x8x1xf32> to vector<8x1xf32>
    %438 = vector.shape_cast %437 : vector<8x1xf32> to vector<1x8x1xf32>
    %439 = math.log %438 : vector<1x8x1xf32>
    %440 = arith.addf %439, %433 : vector<1x8x1xf32>
    %441 = vector.broadcast %440 : vector<1x8x1xf32> to vector<16x8x1xf32>
    %442 = arith.subf %431, %441 : vector<16x8x1xf32>
    %443 = vector.broadcast %442 : vector<16x8x1xf32> to vector<16x8x32xf32>
    %444 = arith.mulf %15, %443 : vector<16x8x32xf32>
    %cst_130 = arith.constant dense<0.000000e+00> : vector<8x32xf32>
    %445 = vector.multi_reduction <add>, %444, %cst_130 [0] : vector<16x8x32xf32> to vector<8x32xf32>
    %c8_i32_131 = arith.constant 8 : i32
    %446 = arith.muli %c6_i32, %c8_i32_131 : i32
    %447 = tpu.assume_multiple %446, 8 : i32
    %448 = arith.index_cast %447 : i32 to index
    %c0_132 = arith.constant 0 : index
    %449 = vector.load %arg17[%448, %c0_132] : memref<56x128xf32, #tpu.memory_space<vmem>>, vector<8x128xf32>
    %cst_133 = arith.constant dense<0.000000e+00> : vector<8x128xf32>
    %450 = tpu.matmul %413, %28, %cst_133 {dimension_numbers = #tpu.dot_dimension_numbers<[1], [0], [0], [1], [0, 0, 1, 1], [], []>} : vector<8x32xf32>, vector<32x128xf32>, vector<8x128xf32> -> vector<8x128xf32>
    %451 = arith.addf %449, %450 : vector<8x128xf32>
    %cst_134 = arith.constant dense<0.000000e+00> : vector<8x128xf32>
    %452 = tpu.matmul %445, %27, %cst_134 {dimension_numbers = #tpu.dot_dimension_numbers<[1], [0], [0], [1], [0, 0, 1, 1], [], []>} : vector<8x32xf32>, vector<32x128xf32>, vector<8x128xf32> -> vector<8x128xf32>
    %453 = arith.addf %451, %452 : vector<8x128xf32>
    %454 = vector.extract_strided_slice %453 {offsets = [0, 0], sizes = [8, 32], strides = [1, 1]} : vector<8x128xf32> to vector<8x32xf32>
    %455 = arith.negf %454 : vector<8x32xf32>
    %456 = math.exp %455 : vector<8x32xf32>
    %cst_135 = arith.constant 1.000000e+00 : f32
    %457 = vector.broadcast %cst_135 : f32 to vector<8x32xf32>
    %458 = arith.addf %457, %456 : vector<8x32xf32>
    %459 = arith.divf %457, %458 : vector<8x32xf32>
    %460 = vector.extract_strided_slice %453 {offsets = [0, 32], sizes = [8, 32], strides = [1, 1]} : vector<8x128xf32> to vector<8x32xf32>
    %461 = arith.negf %460 : vector<8x32xf32>
    %462 = math.exp %461 : vector<8x32xf32>
    %cst_136 = arith.constant 1.000000e+00 : f32
    %463 = vector.broadcast %cst_136 : f32 to vector<8x32xf32>
    %464 = arith.addf %463, %462 : vector<8x32xf32>
    %465 = arith.divf %463, %464 : vector<8x32xf32>
    %466 = vector.extract_strided_slice %453 {offsets = [0, 64], sizes = [8, 32], strides = [1, 1]} : vector<8x128xf32> to vector<8x32xf32>
    %467 = math.tanh %466 : vector<8x32xf32>
    %468 = vector.extract_strided_slice %453 {offsets = [0, 96], sizes = [8, 32], strides = [1, 1]} : vector<8x128xf32> to vector<8x32xf32>
    %469 = arith.negf %468 : vector<8x32xf32>
    %470 = math.exp %469 : vector<8x32xf32>
    %cst_137 = arith.constant 1.000000e+00 : f32
    %471 = vector.broadcast %cst_137 : f32 to vector<8x32xf32>
    %472 = arith.addf %471, %470 : vector<8x32xf32>
    %473 = arith.divf %471, %472 : vector<8x32xf32>
    %474 = arith.mulf %465, %411 : vector<8x32xf32>
    %475 = arith.mulf %459, %467 : vector<8x32xf32>
    %476 = arith.addf %474, %475 : vector<8x32xf32>
    %477 = math.tanh %476 : vector<8x32xf32>
    %478 = arith.mulf %473, %477 : vector<8x32xf32>
    %cst_138 = arith.constant dense<0.000000e+00> : vector<8x128xf32>
    %479 = tpu.matmul %478, %29, %cst_138 {dimension_numbers = #tpu.dot_dimension_numbers<[1], [0], [0], [1], [0, 0, 1, 1], [], []>} : vector<8x32xf32>, vector<32x128xf32>, vector<8x128xf32> -> vector<8x128xf32>
    %480 = vector.broadcast %30 : vector<1x128xf32> to vector<8x128xf32>
    %481 = arith.addf %479, %480 : vector<8x128xf32>
    %482 = arith.index_cast %c6_i32 : i32 to index
    %c0_139 = arith.constant 0 : index
    %c0_140 = arith.constant 0 : index
    %483 = vector.load %arg16[%482, %c0_139, %c0_140] : memref<7x8x128xf32, #tpu.memory_space<vmem>>, vector<1x8x128xf32>
    %484 = vector.shape_cast %483 : vector<1x8x128xf32> to vector<8x128xf32>
    %485 = vector.shape_cast %481 : vector<8x128xf32> to vector<1x8x128xf32>
    tpu.vector_store %arg16[%482, %c0_139, %c0_140], %485 {strides = array<i32>} : memref<7x8x128xf32, #tpu.memory_space<vmem>>, vector<1x8x128xf32>,
    %c7_i32 = arith.constant 7 : i32
    return
  }
}

</mosaic_0001>

<bundles_post_ra>
// kernel: decoder_attn_forward.1
= control target key start
LH: loop header
LB: loop body
LE: loop exit
PB: predicated region body
PF: predicated region fallthrough
CT: control target
= control target key end

     0   :  { %vm68_vm0 = vcmask 261120   ;;  %s3739_s18 = smov 32   ;;  %s3740_s27 = smov 64   ;;  %s6451_s5 = inlined_call_operand.vmem [shape: f32[512,32], index: 5, kind: input, shape index: {}]   ;;  %s6452_s10 = inlined_call_operand.vmem [shape: f32[32,128], index: 10, kind: input, shape index: {}]   ;;  %s6453_s0 = inlined_call_operand.vmem [shape: f32[56,32], index: 0, kind: input, shape index: {}]   ;;  %s6454_s13 = inlined_call_operand.vmem [shape: f32[1,128], index: 13, kind: input, shape index: {}]   ;;  %s6455_s2 = inlined_call_operand.vmem [shape: f32[8,512], index: 2, kind: input, shape index: {}]   ;;  %s6456_s3 = inlined_call_operand.vmem [shape: f32[32,32], index: 3, kind: input, shape index: {}]   ;;  %s6457_s1 = inlined_call_operand.vmem [shape: f32[128,32], index: 1, kind: input, shape index: {}]   ;;  %s6458_s6 = inlined_call_operand.vmem [shape: f32[1,32], index: 6, kind: input, shape index: {}]   ;;  %s6459_s4 = inlined_call_operand.vmem [shape: f32[1,32], index: 4, kind: input, shape index: {}]   ;;  %s6460_s7 = inlined_call_operand.vmem [shape: f32[32,32], index: 7, kind: input, shape index: {}]   ;;  %s6461_s12 = inlined_call_operand.vmem [shape: f32[32,128], index: 12, kind: input, shape index: {}]   ;;  %s6462_s8 = inlined_call_operand.vmem [shape: f32[1,32], index: 8, kind: input, shape index: {}]   ;;  %s6463_s9 = inlined_call_operand.vmem [shape: f32[1,32], index: 9, kind: input, shape index: {}]   ;;  %s6464_s11 = inlined_call_operand.vmem [shape: f32[32,128], index: 11, kind: input, shape index: {}]   ;;  %s6465_s14 = inlined_call_operand.vmem [shape: f32[32,128], index: 14, kind: input, shape index: {}]   ;;  %s6466_s15 = inlined_call_operand.vmem [shape: f32[1,128], index: 15, kind: input, shape index: {}]   ;;  %s6467_s16 = inlined_call_operand.vmem [shape: f32[7,8,128], index: 16, kind: output, shape index: {}]  }
   0x1   :  { %6536 = sst [smem:[#allocation26_spill]] %s6451_s5  ;;  %v63_v1 = vld [vmem:[%s6452_s10 + $0x18] sm:$0xff]  ;;  %v62_v3 = vld [vmem:[%s6452_s10 + $0x10] sm:$0xff]  ;;  %v61_v5 = vld [vmem:[%s6452_s10 + $0x8] sm:$0xff] }
   0x2   :  { %s6537_s23 = sld [smem:[#allocation26_spill]]  ;;  %102 = vmatpush.msra.mxu0 %v63_v1  ;;  %v60_v7 = vld [vmem:[%s6452_s10] sm:$0xff]  ;;  %v54_v20 = vld [vmem:[%s6453_s0 + $0x8] sm:$0xff]  ;;  %v55_v33 = vld [vmem:[%s6453_s0 + $0x10] sm:$0xff] }
   0x3   :  { %v53_v8 = vld [vmem:[%s6453_s0] sm:$0xff]  ;;  %v56_v47 = vld [vmem:[%s6453_s0 + $0x18] sm:$0xff]  ;;  %v153_v57 = vld [vmem:[%s6456_s3 + $0x10] sm:$0xff] }
   0x4   :  { %103 = vmatpush.msra.mxu0 %v62_v3  ;;  %v272_v52 = vld [vmem:[%s6455_s2] sm:$0xff]  ;;  %v154_v53 = vld [vmem:[%s6456_s3 + $0x18] sm:$0xff]  ;;  %v152_v61 = vld [vmem:[%s6456_s3 + $0x8] sm:$0xff] }
   0x5   :  { %219 = vmatpush.msra.mxu1 %v154_v53  ;;  %v57_v63 = vld [vmem:[%s6453_s0 + $0x20] sm:$0xff]  ;;  %v273_v3 = vld [vmem:[%s6455_s2 + $0x8] sm:$0xff] }
   0x6   :  { %104 = vmatpush.msra.mxu0 %v61_v5 }
   0x7   :  { %220 = vmatpush.msra.mxu1 %v153_v57  ;;  %v3125_v57 = vld [vmem:[%s6458_s6] ss:$0 sm:$0xff] }
   0x8   :  { %v291_v0 = vld [vmem:[%s6537_s23 + $0x78] sm:$0xff]  ;;  %v290_v2 = vld [vmem:[%s6537_s23 + $0x70] sm:$0xff]  ;;  %v289_v4 = vld [vmem:[%s6537_s23 + $0x68] sm:$0xff]  ;;  %105 = vmatpush.msra.mxu0 %v60_v7 }
   0x9   :  { %344 = vmatpush.msra.mxu2 %v291_v0  ;;  %v288_v6 = vld [vmem:[%s6537_s23 + $0x60] sm:$0xff]  ;;  %v287_v9 = vld [vmem:[%s6537_s23 + $0x58] sm:$0xff]  ;;  %3058 = vmatmul.msk.f32.vlgmr.msra.gmra.mxu0 %vm68_vm0, %v53_v8  ;;  %v286_v11 = vld [vmem:[%s6537_s23 + $0x50] sm:$0xff] }
   0xa   :  { %v323_v10 = vld [vmem:[%s6537_s23 + $0x178] sm:$0xff]  ;;  %v322_v12 = vld [vmem:[%s6537_s23 + $0x170] sm:$0xff]  ;;  %v285_v15 = vld [vmem:[%s6537_s23 + $0x48] sm:$0xff]  ;;  %221 = vmatpush.msra.mxu1 %v152_v61 }
   0xb   :  { %345 = vmatpush.msra.mxu2 %v290_v2  ;;  %v307_v13 = vld [vmem:[%s6537_s23 + $0xf8] sm:$0xff]  ;;  %384 = vmatpush.msrb.mxu0 %v323_v10  ;;  %v306_v14 = vld [vmem:[%s6537_s23 + $0xf0] sm:$0xff]  ;;  %v321_v16 = vld [vmem:[%s6537_s23 + $0x168] sm:$0xff] }
   0xc   :  { %364 = vmatpush.msra.mxu3 %v307_v13  ;;  %v305_v17 = vld [vmem:[%s6537_s23 + $0xe8] sm:$0xff]  ;;  %v284_v18 = vld [vmem:[%s6537_s23 + $0x40] sm:$0xff]  ;;  %v283_v22 = vld [vmem:[%s6537_s23 + $0x38] sm:$0xff] }
   0xd   :  { %346 = vmatpush.msra.mxu2 %v289_v4  ;;  %385 = vmatpush.msrb.mxu0 %v322_v12  ;;  %v320_v19 = vld [vmem:[%s6537_s23 + $0x160] sm:$0xff]  ;;  %v319_v23 = vld [vmem:[%s6537_s23 + $0x158] sm:$0xff]  ;;  %v282_v25 = vld [vmem:[%s6537_s23 + $0x30] sm:$0xff] }
   0xe   :  { %365 = vmatpush.msra.mxu3 %v306_v14  ;;  %v304_v21 = vld [vmem:[%s6537_s23 + $0xe0] sm:$0xff]  ;;  %v303_v24 = vld [vmem:[%s6537_s23 + $0xd8] sm:$0xff]  ;;  %v318_v26 = vld [vmem:[%s6537_s23 + $0x150] sm:$0xff] }
   0xf   :  { %347 = vmatpush.msra.mxu2 %v288_v6  ;;  %386 = vmatpush.msrb.mxu0 %v321_v16  ;;  %v302_v27 = vld [vmem:[%s6537_s23 + $0xd0] sm:$0xff]  ;;  %v281_v28 = vld [vmem:[%s6537_s23 + $0x28] sm:$0xff]  ;;  %v280_v31 = vld [vmem:[%s6537_s23 + $0x20] sm:$0xff] }
  0x10   :  { %366 = vmatpush.msra.mxu3 %v305_v17  ;;  %v317_v29 = vld [vmem:[%s6537_s23 + $0x148] sm:$0xff]  ;;  %v316_v32 = vld [vmem:[%s6537_s23 + $0x140] sm:$0xff]  ;;  %v279_v35 = vld [vmem:[%s6537_s23 + $0x18] sm:$0xff] }
  0x11   :  { %348 = vmatpush.msra.mxu2 %v287_v9  ;;  %387 = vmatpush.msrb.mxu0 %v320_v19  ;;  %v301_v30 = vld [vmem:[%s6537_s23 + $0xc8] sm:$0xff]  ;;  %v300_v34 = vld [vmem:[%s6537_s23 + $0xc0] sm:$0xff]  ;;  %v315_v36 = vld [vmem:[%s6537_s23 + $0x138] sm:$0xff] }
  0x12   :  { %3059 = vmatmul.msk.f32.gmra.mxu0 %vm68_vm0, %v54_v20  ;;  %367 = vmatpush.msra.mxu3 %v304_v21  ;;  %v299_v37 = vld [vmem:[%s6537_s23 + $0xb8] sm:$0xff]  ;;  %v278_v38 = vld [vmem:[%s6537_s23 + $0x10] sm:$0xff]  ;;  %v277_v41 = vld [vmem:[%s6537_s23 + $0x8] sm:$0xff] }
  0x13   :  { %349 = vmatpush.msra.mxu2 %v286_v11  ;;  %388 = vmatpush.msrb.mxu0 %v319_v23  ;;  %v314_v39 = vld [vmem:[%s6537_s23 + $0x130] sm:$0xff]  ;;  %v313_v42 = vld [vmem:[%s6537_s23 + $0x128] sm:$0xff]  ;;  %v276_v44 = vld [vmem:[%s6537_s23] sm:$0xff] }
  0x14   :  { %368 = vmatpush.msra.mxu3 %v303_v24  ;;  %v298_v40 = vld [vmem:[%s6537_s23 + $0xb0] sm:$0xff]  ;;  %v297_v43 = vld [vmem:[%s6537_s23 + $0xa8] sm:$0xff]  ;;  %v312_v45 = vld [vmem:[%s6537_s23 + $0x120] sm:$0xff] }
  0x15   :  { %350 = vmatpush.msra.mxu2 %v285_v15  ;;  %389 = vmatpush.msrb.mxu0 %v318_v26  ;;  %v339_v46 = vld [vmem:[%s6537_s23 + $0x1f8] sm:$0xff]  ;;  %v296_v48 = vld [vmem:[%s6537_s23 + $0xa0] sm:$0xff]  ;;  %v338_v50 = vld [vmem:[%s6537_s23 + $0x1f0] sm:$0xff] }
  0x16   :  { %369 = vmatpush.msra.mxu3 %v302_v27  ;;  %v311_v49 = vld [vmem:[%s6537_s23 + $0x118] sm:$0xff]  ;;  %v337_v54 = vld [vmem:[%s6537_s23 + $0x1e8] sm:$0xff]  ;;  %v310_v55 = vld [vmem:[%s6537_s23 + $0x110] sm:$0xff] }
  0x17   :  { %351 = vmatpush.msra.mxu2 %v284_v18  ;;  %390 = vmatpush.msrb.mxu0 %v317_v29  ;;  %v295_v51 = vld [vmem:[%s6537_s23 + $0x98] sm:$0xff]  ;;  %v294_v56 = vld [vmem:[%s6537_s23 + $0x90] sm:$0xff]  ;;  %v336_v58 = vld [vmem:[%s6537_s23 + $0x1e0] sm:$0xff] }
  0x18   :  { %370 = vmatpush.msra.mxu3 %v301_v30  ;;  %v309_v59 = vld [vmem:[%s6537_s23 + $0x108] sm:$0xff]  ;;  %v335_v62 = vld [vmem:[%s6537_s23 + $0x1d8] sm:$0xff]  ;;  %v292_v0 = vld [vmem:[%s6537_s23 + $0x80] sm:$0xff] }
  0x19   :  { %352 = vmatpush.msra.mxu2 %v283_v22  ;;  %391 = vmatpush.msrb.mxu0 %v316_v32  ;;  %v293_v60 = vld [vmem:[%s6537_s23 + $0x88] sm:$0xff]  ;;  %v308_v1 = vld [vmem:[%s6537_s23 + $0x100] sm:$0xff]  ;;  %v334_v2 = vld [vmem:[%s6537_s23 + $0x1d0] sm:$0xff] }
  0x1a   :  { %3060 = vmatmul.msk.f32.gmra.mxu0 %vm68_vm0, %v55_v33  ;;  %371 = vmatpush.msra.mxu3 %v300_v34  ;;  %v151_v4 = vld [vmem:[%s6456_s3] sm:$0xff]  ;;  %v333_v5 = vld [vmem:[%s6537_s23 + $0x1c8] sm:$0xff]  ;;  %v331_v8 = vld [vmem:[%s6537_s23 + $0x1b8] sm:$0xff] }
  0x1b   :  { %353 = vmatpush.msra.mxu2 %v282_v25  ;;  %392 = vmatpush.msrb.mxu0 %v315_v36  ;;  %v4044_v6 = vld [vmem:[%s6457_s1] sm:$0xff]  ;;  %v58_v9 = vld [vmem:[%s6453_s0 + $0x28] sm:$0xff]  ;;  %v330_v10 = vld [vmem:[%s6537_s23 + $0x1b0] sm:$0xff] }
  0x1c   :  { %372 = vmatpush.msra.mxu3 %v299_v37  ;;  %v332_v7 = vld [vmem:[%s6537_s23 + $0x1c0] sm:$0xff]  ;;  %222 = vmatpush.msra.mxu1 %v151_v4  ;;  %v329_v11 = vld [vmem:[%s6537_s23 + $0x1a8] sm:$0xff]  ;;  %v327_v14 = vld [vmem:[%s6537_s23 + $0x198] sm:$0xff] }
  0x1d   :  { %354 = vmatpush.msra.mxu2 %v281_v28  ;;  %393 = vmatpush.msrb.mxu0 %v314_v39  ;;  %v4067_v12 = vld [vmem:[%s6457_s1 + $0x8] sm:$0xff]  ;;  %v328_v13 = vld [vmem:[%s6537_s23 + $0x1a0] sm:$0xff]  ;;  %v59_v15 = vld [vmem:[%s6453_s0 + $0x30] sm:$0xff] }
  0x1e   :  { %373 = vmatpush.msra.mxu3 %v298_v40  ;;  %3065 = vmatmul.msk.f32.vlgmr.msra.gmra.mxu1 %vm68_vm0, %v4044_v6  ;;  %v326_v16 = vld [vmem:[%s6537_s23 + $0x190] sm:$0xff]  ;;  %v325_v17 = vld [vmem:[%s6537_s23 + $0x188] sm:$0xff]  ;;  %v324_v19 = vld [vmem:[%s6537_s23 + $0x180] sm:$0xff] }
  0x1f   :  { %355 = vmatpush.msra.mxu2 %v280_v31  ;;  %394 = vmatpush.msrb.mxu0 %v313_v42  ;;  %v4090_v18 = vld [vmem:[%s6457_s1 + $0x10] sm:$0xff]  ;;  %v275_v20 = vld [vmem:[%s6455_s2 + $0x18] sm:$0xff]  ;;  %v4113_v23 = vld [vmem:[%s6457_s1 + $0x20] sm:$0xff] }
  0x20   :  { %374 = vmatpush.msra.mxu3 %v297_v43  ;;  %v274_v21 = vld [vmem:[%s6455_s2 + $0x10] sm:$0xff]  ;;  %v4106_v22 = vld [vmem:[%s6457_s1 + $0x18] sm:$0xff]  ;;  %v4120_v24 = vld [vmem:[%s6457_s1 + $0x28] sm:$0xff] }
  0x21   :  { %356 = vmatpush.msra.mxu2 %v279_v35  ;;  %395 = vmatpush.msrb.mxu0 %v312_v45  ;;  %v4127_v25 = vld [vmem:[%s6457_s1 + $0x30] sm:$0xff]  ;;  %v4134_v26 = vld [vmem:[%s6457_s1 + $0x38] sm:$0xff]  ;;  %v4141_v27 = vld [vmem:[%s6457_s1 + $0x40] sm:$0xff] }
  0x22   :  { %3061 = vmatmul.msk.f32.gmra.mxu0 %vm68_vm0, %v56_v47  ;;  %375 = vmatpush.msra.mxu3 %v296_v48  ;;  %v4148_v28 = vld [vmem:[%s6457_s1 + $0x48] sm:$0xff]  ;;  %v3124_v29 = vld [vmem:[%s6454_s13] ss:$0 sm:$0xff]  ;;  %v4160_v32 = vld [vmem:[%s6457_s1 + $0x50] sm:$0xff] }
  0x23   :  { %357 = vmatpush.msra.mxu2 %v278_v38  ;;  %396 = vmatpush.msrb.mxu0 %v311_v49  ;;  %v4169_v35 = vld [vmem:[%s6457_s1 + $0x58] sm:$0xff]  ;;  %v4178_v38 = vld [vmem:[%s6457_s1 + $0x60] sm:$0xff]  ;;  %v4200_v45 = vld [vmem:[%s6457_s1 + $0x70] sm:$0xff] }
  0x24   :  { %376 = vmatpush.msra.mxu3 %v295_v51  ;;  %v428_v42 = vld [vmem:[%s6460_s7 + $0x18] sm:$0xff]  ;;  %v426_v47 = vld [vmem:[%s6460_s7 + $0x8] sm:$0xff]  ;;  %v425_v48 = vld [vmem:[%s6460_s7] sm:$0xff] }
  0x25   :  { %358 = vmatpush.msra.mxu2 %v277_v41  ;;  %397 = vmatpush.msrb.mxu0 %v310_v55  ;;  %v4187_v41 = vld [vmem:[%s6457_s1 + $0x68] sm:$0xff]  ;;  %v4215_v49 = vld [vmem:[%s6461_s12 + $0x18] sm:$0xff]  ;;  %v4242_v55 = vld [vmem:[%s6461_s12] sm:$0xff] }
  0x26   :  { %377 = vmatpush.msra.mxu3 %v294_v56  ;;  %3066 = vmatmul.msk.f32.gmra.mxu1 %vm68_vm0, %v4067_v12 }
  0x27   :  { %359 = vmatpush.msra.mxu2 %v276_v44  ;;  %398 = vmatpush.msrb.mxu0 %v309_v59  ;;  %v427_v44 = vld [vmem:[%s6460_s7 + $0x10] sm:$0xff] }
  0x28   :  { %360 = vmatmul.f32.vlgmr.msra.gmra.mxu2 %v272_v52  ;;  %378 = vmatpush.msra.mxu3 %v293_v60  ;;  %v4226_v52 = vld [vmem:[%s6457_s1 + $0x78] sm:$0xff] }
  0x29   :  { %404 = vmatpush.msrb.mxu2 %v339_v46  ;;  %399 = vmatpush.msrb.mxu0 %v308_v1 }
  0x2a   :  { %3062 = vmatmul.msk.f32.gmra.mxu0 %vm68_vm0, %v57_v63  ;;  %379 = vmatpush.msra.mxu3 %v292_v0 }
  0x2b   :  { %405 = vmatpush.msrb.mxu2 %v338_v50  ;;  %380 = vmatmul.f32.vlgmr.msra.gmra.mxu3 %v273_v3  ;;  %v4220_v50 = vld [vmem:[%s6461_s12 + $0x10] sm:$0xff] }
  0x2c   :  { %462 = vmatpush.msrb.mxu3 %v428_v42  ;;  %840 = vmatpush.msra.mxu0 %v428_v42 }
  0x2d   :  { %406 = vmatpush.msrb.mxu2 %v337_v54  ;;  %v4234_v54 = vld [vmem:[%s6461_s12 + $0x8] sm:$0xff] }
  0x2e   :  { %3067 = vmatmul.msk.f32.gmra.mxu1 %vm68_vm0, %v4090_v18  ;;  %463 = vmatpush.msrb.mxu3 %v427_v44 }
  0x2f   :  { %407 = vmatpush.msrb.mxu2 %v336_v58  ;;  %841 = vmatpush.msra.mxu0 %v427_v44 }
  0x30   :  { %464 = vmatpush.msrb.mxu3 %v426_v47 }
  0x31   :  { %408 = vmatpush.msrb.mxu2 %v335_v62  ;;  %842 = vmatpush.msra.mxu0 %v426_v47 }
  0x32   :  { %3063 = vmatmul.msk.f32.gmra.mxu0 %vm68_vm0, %v58_v9  ;;  %465 = vmatpush.msrb.mxu3 %v425_v48 }
  0x33   :  { %409 = vmatpush.msrb.mxu2 %v334_v2  ;;  %843 = vmatpush.msra.mxu0 %v425_v48 }
  0x34   :  { %726 = vmatpush.msra.mxu3 %v4215_v49 }
  0x35   :  { %410 = vmatpush.msrb.mxu2 %v333_v5 }
  0x36   :  { %3068 = vmatmul.msk.f32.gmra.mxu1 %vm68_vm0, %v4106_v22  ;;  %727 = vmatpush.msra.mxu3 %v4220_v50 }
  0x37   :  { %411 = vmatpush.msrb.mxu2 %v332_v7 }
  0x38   :  { %728 = vmatpush.msra.mxu3 %v4234_v54 }
  0x39   :  { %412 = vmatpush.msrb.mxu2 %v331_v8 }
  0x3a   :  { %3064 = vmatmul.msk.f32.gmra.mxu0 %vm68_vm0, %v59_v15  ;;  %729 = vmatpush.msra.mxu3 %v4242_v55 }
  0x3b   :  { %413 = vmatpush.msrb.mxu2 %v330_v10 }
  0x3d   :  { %414 = vmatpush.msrb.mxu2 %v329_v11 }
  0x3e   :  { %3069 = vmatmul.msk.f32.gmra.mxu1 %vm68_vm0, %v4113_v23 }
  0x3f   :  { %415 = vmatpush.msrb.mxu2 %v328_v13 }
  0x41   :  { %416 = vmatpush.msrb.mxu2 %v327_v14 }
  0x42   :  { %400 = vmatmul.f32.vlgmr.msrb.gmra.mxu0 %v274_v21 }
  0x43   :  { %417 = vmatpush.msrb.mxu2 %v326_v16 }
  0x45   :  { %418 = vmatpush.msrb.mxu2 %v325_v17 }
  0x46   :  { %3070 = vmatmul.msk.f32.gmra.mxu1 %vm68_vm0, %v4120_v24 }
  0x47   :  { %419 = vmatpush.msrb.mxu2 %v324_v19  ;;  %v4263_v19 = vld [vmem:[%s6459_s4] ss:$0 sm:$0xff] }
  0x48   :  { %420 = vmatmul.f32.vlgmr.msrb.gmra.mxu2 %v275_v20  ;;  %v4268_v20 = vld [vmem:[%s6462_s8] ss:$0 sm:$0xff] }
  0x49   :  { %1102 = vmatpush.msra.mxu2 %v4215_v49 }
  0x4b   :  { %1103 = vmatpush.msra.mxu2 %v4220_v50 }
  0x4d   :  { %1104 = vmatpush.msra.mxu2 %v4234_v54 }
  0x4e   :  { %3071 = vmatmul.msk.f32.gmra.mxu1 %vm68_vm0, %v4127_v25 }
  0x4f   :  { %1105 = vmatpush.msra.mxu2 %v4242_v55 }
  0x51   :  { %1211 = vmatpush.msrb.mxu2 %v428_v42 }
  0x53   :  { %1212 = vmatpush.msrb.mxu2 %v427_v44 }
  0x55   :  { %1213 = vmatpush.msrb.mxu2 %v426_v47 }
  0x56   :  { %3072 = vmatmul.msk.f32.gmra.mxu1 %vm68_vm0, %v4134_v26 }
  0x57   :  { %1214 = vmatpush.msrb.mxu2 %v425_v48 }
  0x5e   :  { %3073 = vmatmul.msk.f32.gmra.mxu1 %vm68_vm0, %v4141_v27 }
  0x66   :  { %3074 = vmatmul.msk.f32.gmra.mxu1 %vm68_vm0, %v4148_v28 }
  0x6e   :  { %3075 = vmatmul.msk.f32.gmra.mxu1 %vm68_vm0, %v4160_v32 }
  0x76   :  { %3076 = vmatmul.msk.f32.gmra.mxu1 %vm68_vm0, %v4169_v35 }
  0x7e   :  { %3077 = vmatmul.msk.f32.gmra.mxu1 %vm68_vm0, %v4178_v38 }
  0x86   :  { %v107_v30 = vpop.f32.mrf.mxu0  ;;  %3078 = vmatmul.msk.f32.gmra.mxu1 %vm68_vm0, %v4187_v41 }
  0x87   :  { %v4155_v31 = vadd.f32 %v3124_v29, %v107_v30 }
  0x8e   :  { %3079 = vmatmul.msk.f32.gmra.mxu1 %vm68_vm0, %v4200_v45 }
  0x8f   :  { %v110_v33 = vpop.f32.mrf.mxu0 }
  0x90   :  { %v4164_v34 = vadd.f32 %v3124_v29, %v110_v33 }
  0x92   :  { %6538 = vst [vmem:[#allocation3_spill] sm:$0xff] %v4164_v34 }
  0x96   :  { %3080 = vmatmul.msk.f32.gmra.mxu1 %vm68_vm0, %v4226_v52 }
  0x97   :  { %v113_v36 = vpop.f32.mrf.mxu0 }
  0x98   :  { %v4173_v37 = vadd.f32 %v3124_v29, %v113_v36 }
  0x9a   :  { %6539 = vst [vmem:[#allocation4_spill] sm:$0xff] %v4173_v37 }
  0x9b   :  { %v224_v4 = vpop.f32.mrf.mxu1 }
  0x9f   :  { %v116_v39 = vpop.f32.mrf.mxu0 }
  0xa0   :  { %v4182_v40 = vadd.f32 %v3124_v29, %v116_v39 }
  0xa2   :  { %6540 = vst [vmem:[#allocation5_spill] sm:$0xff] %v4182_v40 }
  0xa3   :  { %v227_v5 = vpop.f32.mrf.mxu1 }
  0xa7   :  { %v119_v43 = vpop.f32.mrf.mxu0 }
  0xa8   :  { %v4202_v46 = vadd.f32 %v3124_v29, %v119_v43 }
  0xaa   :  { %6541 = vst [vmem:[#allocation6_spill] sm:$0xff] %v4202_v46 }
  0xab   :  { %v361_v59 = vpop.f32.mrf.mxu2  ;;  %v230_v7 = vpop.f32.mrf.mxu1 }
  0xac   :  { %v362_v60 = vadd.f32 %v3125_v57, %v361_v59  ;;  %v4274_v30 = vadd.f32 %v4263_v19, %v230_v7 }
  0xae   :  { %v381_v61 = vpop.f32.mrf.mxu3  ;;  %6545 = vst [vmem:[#allocation10_spill] sm:$0xff] %v4274_v30 }
  0xaf   :  { %v122_v51 = vpop.f32.mrf.mxu0  ;;  %v382_v62 = vadd.f32 %v381_v61, %v362_v60  ;;  %v4308_v60 = vld [vmem:[%s6463_s9] ss:$0 sm:$0xff] }
  0xb0   :  { %v4229_v53 = vadd.f32 %v3124_v29, %v122_v51  ;;  %v4297_v51 = vadd.f32 %v4263_v19, %v227_v5  ;;  %6550 = vst [vmem:[#allocation15_spill] sm:$0xff] %v4308_v60 }
  0xb2   :  { %6542 = vst [vmem:[#allocation7_spill] sm:$0xff] %v4229_v53 }
  0xb3   :  { %v233_v8 = vpop.f32.mrf.mxu1  ;;  %6549 = vst [vmem:[#allocation14_spill] sm:$0xff] %v4297_v51 }
  0xb4   :  { %v4294_v48 = vadd.f32 %v4263_v19, %v233_v8 }
  0xb6   :  { %6548 = vst [vmem:[#allocation13_spill] sm:$0xff] %v4294_v48 }
  0xb7   :  { %v125_v56 = vpop.f32.mrf.mxu0 }
  0xb8   :  { %v4252_v58 = vadd.f32 %v3124_v29, %v125_v56  ;;  %v4271_v29 = vadd.f32 %v4263_v19, %v224_v4 }
  0xba   :  { %6543 = vst [vmem:[#allocation8_spill] sm:$0xff] %v4252_v58 }
  0xbb   :  { %v236_v9 = vpop.f32.mrf.mxu1  ;;  %6544 = vst [vmem:[#allocation9_spill] sm:$0xff] %v4271_v29 }
  0xbc   :  { %v4277_v33 = vadd.f32 %v4263_v19, %v236_v9 }
  0xbe   :  { %6546 = vst [vmem:[#allocation11_spill] sm:$0xff] %v4277_v33 }
  0xbf   :  { %v401_v63 = vpop.f32.mrf.mxu0 }
  0xc0   :  { %v402_v0 = vadd.f32 %v401_v63, %v382_v62 }
  0xc3   :  { %v239_v10 = vpop.f32.mrf.mxu1 }
  0xc4   :  { %v4285_v42 = vadd.f32 %v4263_v19, %v239_v10 }
  0xc6   :  { %6547 = vst [vmem:[#allocation12_spill] sm:$0xff] %v4285_v42 }
  0xcb   :  { %v421_v1 = vpop.f32.mrf.mxu2  ;;  %v242_v11 = vpop.f32.mrf.mxu1 }
  0xcc   :  { %v422_v2 = vadd.f32 %v421_v1, %v402_v0  ;;  %v4318_v5 = vadd.f32 %v4263_v19, %v242_v11 }
  0xce   :  { %3130 = vtanh.f32 %v422_v2  ;;  %6553 = vst [vmem:[#allocation18_spill] sm:$0xff] %v4318_v5 }
  0xd3   :  { %v245_v13 = vpop.f32.mrf.mxu1 }
  0xd4   :  { %v4254_v3 = vpop.eup %3130  ;;  %v4314_v0 = vadd.f32 %v4263_v19, %v245_v13 }
  0xd5   :  { %3081 = vmatmul.msk.f32.vlgmr.msrb.gmra.mxu3 %vm68_vm0, %v4254_v3 }
  0xd6   :  { %6552 = vst [vmem:[#allocation17_spill] sm:$0xff] %v4314_v0 }
  0xdb   :  { %v248_v14 = vpop.f32.mrf.mxu1 }
  0xdc   :  { %v4311_v62 = vadd.f32 %v4263_v19, %v248_v14 }
  0xdd   :  { %3082 = vmatmul.msk.f32.vlgmr.msra.gmra.mxu3 %vm68_vm0, %v4254_v3 }
  0xde   :  { %6551 = vst [vmem:[#allocation16_spill] sm:$0xff] %v4311_v62 }
  0xe3   :  { %v251_v15 = vpop.f32.mrf.mxu1 }
  0xeb   :  { %v254_v16 = vpop.f32.mrf.mxu1 }
  0xf3   :  { %v257_v17 = vpop.f32.mrf.mxu1 }
  0xfb   :  { %v4282_v39 = vpop.f32.mrf.mxu1 }
 0x103   :  { %v263_v1 = vpop.f32.mrf.mxu1 }
 0x158   :  { %v467_v21 = vpop.f32.mrf.mxu3 }
 0x159   :  { %v4280_v36 = vadd.f32 %v4268_v20, %v467_v21 }
 0x15b   :  { %v474_v43 = vadd.f32 %v4280_v36, %v4277_v33  ;;  %v472_v44 = vadd.f32 %v4280_v36, %v4274_v30  ;;  %v470_v47 = vadd.f32 %v4280_v36, %v4271_v29  ;;  %v475_v56 = vadd.f32 %v4280_v36, %v4285_v42 }
 0x15c   :  { %v473_v57 = vadd.f32 %v4280_v36, %v4294_v48  ;;  %v471_v59 = vadd.f32 %v4280_v36, %v4297_v51  ;;  %v478_v8 = vadd.f32 %v4280_v36, %v4311_v62  ;;  %v477_v13 = vadd.f32 %v4280_v36, %v4314_v0 }
 0x15d   :  { %3132 = vtanh.f32 %v474_v43  ;;  %v476_v11 = vadd.f32 %v4280_v36, %v4318_v5 }
 0x15e   :  { %3134 = vtanh.f32 %v472_v44 }
 0x15f   :  { %3136 = vtanh.f32 %v470_v47 }
 0x160   :  { %3138 = vtanh.f32 %v475_v56  ;;  %v4332_v56 = vadd.f32 %v4263_v19, %v257_v17 }
 0x161   :  { %3140 = vtanh.f32 %v473_v57  ;;  %v4335_v57 = vadd.f32 %v4263_v19, %v254_v16 }
 0x162   :  { %3142 = vtanh.f32 %v471_v59  ;;  %6554 = vst [vmem:[#allocation19_spill] sm:$0xff] %v4332_v56  ;;  %v481_v17 = vadd.f32 %v4280_v36, %v4332_v56 }
 0x163   :  { %v3133_v61 = vpop.eup %3132  ;;  %3144 = vtanh.f32 %v478_v8  ;;  %6555 = vst [vmem:[#allocation20_spill] sm:$0xff] %v4335_v57  ;;  %v480_v16 = vadd.f32 %v4280_v36, %v4335_v57 }
 0x164   :  { %v3135_v63 = vpop.eup %3134  ;;  %v509_v2 = vmul.f32 %v3133_v61, %v4308_v60  ;;  %3146 = vtanh.f32 %v477_v13 }
 0x165   :  { %v3137_v4 = vpop.eup %3136  ;;  %v507_v7 = vmul.f32 %v3135_v63, %v4308_v60  ;;  %3148 = vtanh.f32 %v476_v11  ;;  %v4356_v11 = vadd.f32 %v4263_v19, %v263_v1 }
 0x166   :  { %v533_v9 = vsel %vm68_vm0, %v509_v2, 0.0  ;;  %v505_v10 = vmul.f32 %v3137_v4, %v4308_v60  ;;  %v3139_v14 = vpop.eup %3138  ;;  %v4341_v2 = vadd.f32 %v4263_v19, %v251_v15  ;;  %v266_v4 = vpop.f32.mrf.mxu1  ;;  %3150 = vtanh.f32 %v481_v17 }
 0x167   :  { %534 = vadd.xlane.f32.xlu2 %v533_v9  ;;  %v527_v21 = vsel %vm68_vm0, %v507_v7, 0.0  ;;  %v3141_v43 = vpop.eup %3140  ;;  %v510_v59 = vmul.f32 %v3139_v14, %v4308_v60  ;;  %6558 = vst [vmem:[#allocation23_spill] sm:$0xff] %v4356_v11  ;;  %3152 = vtanh.f32 %v480_v16  ;;  %v483_v1 = vadd.f32 %v4280_v36, %v4356_v11 }
 0x168   :  { %528 = vadd.xlane.f32.xlu1 %v527_v21  ;;  %v521_v44 = vsel %vm68_vm0, %v505_v10, 0.0  ;;  %v3143_v47 = vpop.eup %3142  ;;  %v508_v61 = vmul.f32 %v3141_v43, %v4308_v60  ;;  %6556 = vst [vmem:[#allocation21_spill] sm:$0xff] %v4341_v2  ;;  %v479_v10 = vadd.f32 %v4280_v36, %v4341_v2  ;;  %v4353_v21 = vadd.f32 %v4263_v19, %v266_v4 }
 0x169   :  { %522 = vadd.xlane.f32.xlu0 %v521_v44  ;;  %v506_v63 = vmul.f32 %v3143_v47, %v4308_v60  ;;  %v536_v7 = vsel %vm68_vm0, %v510_v59, 0.0  ;;  %v3145_v8 = vpop.eup %3144  ;;  %v4361_v44 = vadd.f32 %v4263_v19, %v4282_v39 }
 0x16a   :  { %v530_v9 = vsel %vm68_vm0, %v508_v61, 0.0  ;;  %v3147_v13 = vpop.eup %3146  ;;  %6557 = vst [vmem:[#allocation22_spill] sm:$0xff] %v4353_v21  ;;  %v513_v43 = vmul.f32 %v3145_v8, %v4308_v60  ;;  %3154 = vtanh.f32 %v479_v10  ;;  %v484_v61 = vadd.f32 %v4280_v36, %v4353_v21 }
 0x16b   :  { %v524_v15 = vsel %vm68_vm0, %v506_v63, 0.0  ;;  %v3149_v14 = vpop.eup %3148  ;;  %6559 = vst [vmem:[#allocation24_spill] sm:$0xff] %v4361_v44  ;;  %v512_v47 = vmul.f32 %v3147_v13, %v4308_v60  ;;  %v482_v39 = vadd.f32 %v4280_v36, %v4361_v44 }
 0x16c   :  { %v511_v59 = vmul.f32 %v3149_v14, %v4308_v60  ;;  %v545_v63 = vsel %vm68_vm0, %v513_v43, 0.0  ;;  %v3151_v17 = vpop.eup %3150  ;;  %3156 = vtanh.f32 %v484_v61 }
 0x16d   :  { %v542_v4 = vsel %vm68_vm0, %v512_v47, 0.0  ;;  %v516_v10 = vmul.f32 %v3151_v17, %v4308_v60  ;;  %3158 = vtanh.f32 %v483_v1 }
 0x16e   :  { %v269_v16 = vpop.f32.mrf.mxu1  ;;  %v539_v8 = vsel %vm68_vm0, %v511_v59, 0.0  ;;  %3160 = vtanh.f32 %v482_v39 }
 0x16f   :  { %537 = vadd.xlane.f32.xlu2 %v536_v7  ;;  %v3153_v7 = vpop.eup %3152  ;;  %v4376_v13 = vadd.f32 %v4263_v19, %v269_v16  ;;  %v554_v43 = vsel %vm68_vm0, %v516_v10, 0.0 }
 0x170   :  { %531 = vadd.xlane.f32.xlu1 %v530_v9  ;;  %v3155_v9 = vpop.eup %3154 }
 0x171   :  { %525 = vadd.xlane.f32.xlu0 %v524_v15  ;;  %6560 = vst [vmem:[#allocation25_spill] sm:$0xff] %v4376_v13  ;;  %v515_v15 = vmul.f32 %v3153_v7, %v4308_v60  ;;  %v514_v14 = vmul.f32 %v3155_v9, %v4308_v60  ;;  %v485_v61 = vadd.f32 %v4280_v36, %v4376_v13 }
 0x172   :  { %v3157_v47 = vpop.eup %3156 }
 0x173   :  { %v551_v59 = vsel %vm68_vm0, %v515_v15, 0.0  ;;  %v548_v1 = vsel %vm68_vm0, %v514_v14, 0.0  ;;  %v519_v17 = vmul.f32 %v3157_v47, %v4308_v60  ;;  %3162 = vtanh.f32 %v485_v61 }
 0x175   :  { %v563_v7 = vsel %vm68_vm0, %v519_v17, 0.0 }
 0x177   :  { %546 = vadd.xlane.f32.xlu2 %v545_v63  ;;  %v3159_v63 = vpop.eup %3158 }
 0x178   :  { %543 = vadd.xlane.f32.xlu1 %v542_v4  ;;  %v3161_v19 = vpop.eup %3160  ;;  %v518_v4 = vmul.f32 %v3159_v63, %v4308_v60 }
 0x179   :  { %540 = vadd.xlane.f32.xlu0 %v539_v8  ;;  %v517_v39 = vmul.f32 %v3161_v19, %v4308_v60  ;;  %v3163_v8 = vpop.eup %3162 }
 0x17a   :  { %v560_v16 = vsel %vm68_vm0, %v518_v4, 0.0  ;;  %v520_v9 = vmul.f32 %v3163_v8, %v4308_v60 }
 0x17b   :  { %v557_v36 = vsel %vm68_vm0, %v517_v39, 0.0 }
 0x17c   :  { %v566_v10 = vsel %vm68_vm0, %v520_v9, 0.0 }
 0x17f   :  { %555 = vadd.xlane.f32.xlu2 %v554_v43 }
 0x180   :  { %552 = vadd.xlane.f32.xlu1 %v551_v59 }
 0x181   :  { %549 = vadd.xlane.f32.xlu0 %v548_v1 }
 0x187   :  { %564 = vadd.xlane.f32.xlu2 %v563_v7 }
 0x188   :  { %561 = vadd.xlane.f32.xlu1 %v560_v16 }
 0x189   :  { %558 = vadd.xlane.f32.xlu0 %v557_v36 }
 0x191   :  { %567 = vadd.xlane.f32.xlu0 %v566_v10 }
 0x19f   :  { %779 = vrot.lane.b32.xlu2 %v4254_v3, %s3739_s18 }
 0x1da   :  { %v4395_v15 = vpop.xlane.xlu2 %534 }
 0x1db   :  { %v4397_v14 = vpop.xlane.xlu1 %528 }
 0x1dc   :  { %v4399_v43 = vpop.xlane.xlu0 %522 }
 0x1dd   :  { %v569_v7 = vmax.f32 %v4399_v43, %v4395_v15 }
 0x1e2   :  { %v4403_v59 = vpop.xlane.xlu2 %537 }
 0x1e3   :  { %v4401_v47 = vpop.xlane.xlu1 %531 }
 0x1e4   :  { %v4405_v61 = vpop.xlane.xlu0 %525 }
 0x1e5   :  { %v570_v16 = vmax.f32 %v4405_v61, %v4403_v59 }
 0x1ea   :  { %v4411_v19 = vpop.xlane.xlu2 %546 }
 0x1eb   :  { %v4407_v63 = vpop.xlane.xlu1 %543  ;;  %v573_v8 = vmax.f32 %v569_v7, %v4411_v19 }
 0x1ec   :  { %v4409_v1 = vpop.xlane.xlu0 %540  ;;  %v572_v9 = vmax.f32 %v4401_v47, %v4407_v63 }
 0x1ed   :  { %v571_v10 = vmax.f32 %v4397_v14, %v4409_v1 }
 0x1f2   :  { %v4417_v4 = vpop.xlane.xlu2 %555 }
 0x1f3   :  { %v4415_v3 = vpop.xlane.xlu1 %552  ;;  %v576_v46 = vmax.f32 %v572_v9, %v4417_v4 }
 0x1f4   :  { %v4413_v17 = vpop.xlane.xlu0 %549  ;;  %v575_v40 = vmax.f32 %v571_v10, %v4415_v3 }
 0x1f5   :  { %v574_v58 = vmax.f32 %v570_v16, %v4413_v17 }
 0x1fa   :  { %v4433_v53 = vpop.xlane.xlu2 %564 }
 0x1fb   :  { %v4425_v36 = vpop.xlane.xlu1 %561  ;;  %v579_v7 = vmax.f32 %v575_v40, %v4433_v53 }
 0x1fc   :  { %v4419_v39 = vpop.xlane.xlu0 %558  ;;  %v578_v37 = vmax.f32 %v574_v58, %v4425_v36 }
 0x1fd   :  { %v577_v34 = vmax.f32 %v573_v8, %v4419_v39 }
 0x1ff   :  { %v581_v11 = vmax.f32 %v577_v34, %v578_v37 }
 0x204   :  { %v4439_v13 = vpop.xlane.xlu0 %567 }
 0x205   :  { %v580_v44 = vmax.f32 %v576_v46, %v4439_v13 }
 0x207   :  { %v582_v21 = vmax.f32 %v579_v7, %v580_v44 }
 0x209   :  { %v4443_v2 = vmax.f32 %v581_v11, %v582_v21 }
 0x20b   :  { %v584_v16 = vsub.f32 %v4399_v43, %v4443_v2  ;;  %v585_v9 = vsub.f32 %v4405_v61, %v4443_v2  ;;  %v586_v58 = vsub.f32 %v4397_v14, %v4443_v2  ;;  %v587_v8 = vsub.f32 %v4401_v47, %v4443_v2 }
 0x20c   :  { %v588_v34 = vsub.f32 %v4395_v15, %v4443_v2  ;;  %v589_v46 = vsub.f32 %v4403_v59, %v4443_v2  ;;  %v590_v11 = vsub.f32 %v4409_v1, %v4443_v2  ;;  %v591_v7 = vsub.f32 %v4407_v63, %v4443_v2 }
 0x20d   :  { %v600_v10 = vmul.f32 1.442695, %v584_v16  ;;  %v602_v40 = vmul.f32 1.442695, %v585_v9  ;;  %v604_v37 = vmul.f32 1.442695, %v586_v58  ;;  %v592_v58 = vsub.f32 %v4411_v19, %v4443_v2 }
 0x20e   :  { %v606_v21 = vmul.f32 1.442695, %v587_v8  ;;  %v608_v44 = vmul.f32 1.442695, %v588_v34  ;;  %v610_v16 = vmul.f32 1.442695, %v589_v46  ;;  %v593_v8 = vsub.f32 %v4413_v17, %v4443_v2 }
 0x20f   :  { %3164 = vpow2.f32 %v600_v10  ;;  %v612_v10 = vmul.f32 1.442695, %v590_v11  ;;  %v616_v46 = vmul.f32 1.442695, %v592_v58 }
 0x210   :  { %3166 = vpow2.f32 %v602_v40 }
 0x211   :  { %3168 = vpow2.f32 %v604_v37  ;;  %v614_v37 = vmul.f32 1.442695, %v591_v7 }
 0x212   :  { %3170 = vpow2.f32 %v606_v21  ;;  %v594_v21 = vsub.f32 %v4415_v3, %v4443_v2 }
 0x213   :  { %3172 = vpow2.f32 %v608_v44  ;;  %v595_v44 = vsub.f32 %v4417_v4, %v4443_v2 }
 0x214   :  { %3174 = vpow2.f32 %v610_v16  ;;  %v596_v16 = vsub.f32 %v4419_v39, %v4443_v2 }
 0x215   :  { %v3165_v9 = vpop.eup %3164  ;;  %3176 = vpow2.f32 %v612_v10  ;;  %v597_v10 = vsub.f32 %v4425_v36, %v4443_v2 }
 0x216   :  { %v3167_v57 = vpop.eup %3166  ;;  %3178 = vpow2.f32 %v614_v37  ;;  %v598_v37 = vsub.f32 %v4433_v53, %v4443_v2 }
 0x217   :  { %v632_v56 = vadd.f32 %v3167_v57, %v3165_v9  ;;  %v3169_v40 = vpop.eup %3168  ;;  %v618_v57 = vmul.f32 1.442695, %v593_v8  ;;  %3180 = vpow2.f32 %v616_v46  ;;  %v599_v46 = vsub.f32 %v4439_v13, %v4443_v2 }
 0x218   :  { %v3171_v5 = vpop.eup %3170  ;;  %v628_v60 = vmul.f32 1.442695, %v598_v37 }
 0x219   :  { %v633_v34 = vadd.f32 %v3169_v40, %v632_v56  ;;  %v3173_v62 = vpop.eup %3172  ;;  %v620_v56 = vmul.f32 1.442695, %v594_v21  ;;  %3182 = vpow2.f32 %v618_v57  ;;  %v626_v21 = vmul.f32 1.442695, %v597_v10 }
 0x21a   :  { %v3175_v9 = vpop.eup %3174 }
 0x21b   :  { %v634_v0 = vadd.f32 %v3171_v5, %v633_v34  ;;  %v3177_v40 = vpop.eup %3176  ;;  %v622_v5 = vmul.f32 1.442695, %v595_v44  ;;  %3184 = vpow2.f32 %v620_v56 }
 0x21c   :  { %v3179_v34 = vpop.eup %3178 }
 0x21d   :  { %v635_v11 = vadd.f32 %v3173_v62, %v634_v0  ;;  %v624_v62 = vmul.f32 1.442695, %v596_v16  ;;  %v3181_v8 = vpop.eup %3180  ;;  %3186 = vpow2.f32 %v622_v5 }
 0x21f   :  { %v636_v7 = vadd.f32 %v3175_v9, %v635_v11  ;;  %v3183_v9 = vpop.eup %3182  ;;  %3188 = vpow2.f32 %v624_v62 }
 0x220   :  { %3190 = vpow2.f32 %v626_v21 }
 0x221   :  { %v637_v58 = vadd.f32 %v3177_v40, %v636_v7  ;;  %v3185_v44 = vpop.eup %3184  ;;  %v630_v7 = vmul.f32 1.442695, %v599_v46  ;;  %3192 = vpow2.f32 %v628_v60 }
 0x223   :  { %v638_v0 = vadd.f32 %v3179_v34, %v637_v58  ;;  %v3187_v48 = vpop.eup %3186  ;;  %3194 = vpow2.f32 %v630_v7 }
 0x225   :  { %v639_v11 = vadd.f32 %v3181_v8, %v638_v0  ;;  %v3189_v16 = vpop.eup %3188 }
 0x226   :  { %v3191_v34 = vpop.eup %3190 }
 0x227   :  { %v640_v57 = vadd.f32 %v3183_v9, %v639_v11  ;;  %v3193_v42 = vpop.eup %3192 }
 0x229   :  { %v641_v40 = vadd.f32 %v3185_v44, %v640_v57  ;;  %v3195_v10 = vpop.eup %3194 }
 0x22b   :  { %v642_v56 = vadd.f32 %v3187_v48, %v641_v40 }
 0x22d   :  { %v643_v58 = vadd.f32 %v3189_v16, %v642_v56 }
 0x22f   :  { %v644_v33 = vadd.f32 %v3191_v34, %v643_v58 }
 0x231   :  { %v645_v5 = vadd.f32 %v3193_v42, %v644_v33 }
 0x233   :  { %v646_v0 = vadd.f32 %v3195_v10, %v645_v5 }
 0x235   :  { %3196 = vlog2.f32 %v646_v0 }
 0x23b   :  { %v3197_v62 = vpop.eup %3196 }
 0x23c   :  { %v648_v37 = vmul.f32 0.6931472, %v3197_v62 }
 0x23e   :  { %v4478_v8 = vadd.f32 %v648_v37, %v4443_v2  ;;  %v4493_v2 = vld [vmem:[%s6464_s11 + $0x18] sm:$0xff] }
 0x23f   :  { %750 = vmatpush.msrb.mxu3 %v4493_v2 }
 0x240   :  { %v650_v46 = vsub.f32 %v4399_v43, %v4478_v8  ;;  %v651_v48 = vsub.f32 %v4405_v61, %v4478_v8  ;;  %v652_v60 = vsub.f32 %v4397_v14, %v4478_v8  ;;  %v653_v33 = vsub.f32 %v4401_v47, %v4478_v8  ;;  %v4498_v43 = vld [vmem:[%s6464_s11 + $0x10] sm:$0xff] }
 0x241   :  { %v654_v14 = vsub.f32 %v4395_v15, %v4478_v8  ;;  %751 = vmatpush.msrb.mxu3 %v4498_v43  ;;  %v656_v57 = vsub.f32 %v4409_v1, %v4478_v8  ;;  %v657_v7 = vsub.f32 %v4407_v63, %v4478_v8  ;;  %v658_v1 = vsub.f32 %v4411_v19, %v4478_v8 }
 0x242   :  { %v666_v42 = vmul.f32 %v650_v46, %v4044_v6  ;;  %v667_v21 = vmul.f32 %v651_v48, %v4067_v12  ;;  %v668_v61 = vmul.f32 %v652_v60, %v4090_v18  ;;  %v4507_v6 = vld [vmem:[%s6464_s11 + $0x8] sm:$0xff]  ;;  %v655_v12 = vsub.f32 %v4403_v59, %v4478_v8  ;;  %v4518_v18 = vld [vmem:[%s6464_s11] sm:$0xff] }
 0x243   :  { %v669_v47 = vmul.f32 %v653_v33, %v4106_v22  ;;  %v670_v44 = vmul.f32 %v654_v14, %v4113_v23  ;;  %752 = vmatpush.msrb.mxu3 %v4507_v6  ;;  %v672_v23 = vmul.f32 %v656_v57, %v4127_v25  ;;  %v659_v5 = vsub.f32 %v4413_v17, %v4478_v8 }
 0x244   :  { %v682_v11 = vsel %vm68_vm0, %v666_v42, 0.0  ;;  %v683_v9 = vsel %vm68_vm0, %v667_v21, 0.0  ;;  %v685_v59 = vsel %vm68_vm0, %v668_v61, 0.0  ;;  %v671_v40 = vmul.f32 %v655_v12, %v4120_v24 }
 0x245   :  { %v684_v15 = vadd.f32 %v683_v9, %v682_v11  ;;  %v687_v56 = vsel %vm68_vm0, %v669_v47, 0.0  ;;  %753 = vmatpush.msrb.mxu3 %v4518_v18  ;;  %v689_v58 = vsel %vm68_vm0, %v670_v44, 0.0  ;;  %v673_v63 = vmul.f32 %v657_v7, %v4134_v26 }
 0x246   :  { %v691_v24 = vsel %vm68_vm0, %v671_v40, 0.0  ;;  %v660_v0 = vsub.f32 %v4415_v3, %v4478_v8  ;;  %v674_v62 = vmul.f32 %v658_v1, %v4141_v27  ;;  %v693_v19 = vsel %vm68_vm0, %v672_v23, 0.0 }
 0x247   :  { %v686_v22 = vadd.f32 %v685_v59, %v684_v15  ;;  %v661_v25 = vsub.f32 %v4417_v4, %v4478_v8  ;;  %v675_v46 = vmul.f32 %v659_v5, %v4148_v28  ;;  %v695_v17 = vsel %vm68_vm0, %v673_v63, 0.0 }
 0x248   :  { %v662_v26 = vsub.f32 %v4419_v39, %v4478_v8  ;;  %v676_v60 = vmul.f32 %v660_v0, %v4160_v32  ;;  %v697_v3 = vsel %vm68_vm0, %v674_v62, 0.0  ;;  %v663_v27 = vsub.f32 %v4425_v36, %v4478_v8 }
 0x249   :  { %v688_v16 = vadd.f32 %v687_v56, %v686_v22  ;;  %v677_v42 = vmul.f32 %v661_v25, %v4169_v35  ;;  %v699_v4 = vsel %vm68_vm0, %v675_v46, 0.0  ;;  %v664_v28 = vsub.f32 %v4433_v53, %v4478_v8 }
 0x24a   :  { %v678_v14 = vmul.f32 %v662_v26, %v4178_v38  ;;  %v701_v39 = vsel %vm68_vm0, %v676_v60, 0.0  ;;  %v665_v32 = vsub.f32 %v4439_v13, %v4478_v8  ;;  %v679_v12 = vmul.f32 %v663_v27, %v4187_v41  ;;  %v731_v41 = vpop.f32.mrf.mxu3  ;;  %v4584_v26 = vld [vmem:[%s6465_s14 + $0x10] sm:$0xff]  ;;  %v4591_v60 = vld [vmem:[%s6465_s14 + $0x8] sm:$0xff] }
 0x24b   :  { %v690_v34 = vadd.f32 %v689_v58, %v688_v16  ;;  %v703_v36 = vsel %vm68_vm0, %v677_v42, 0.0  ;;  %v680_v35 = vmul.f32 %v664_v28, %v4200_v45  ;;  %v734_v59 = vadd.f32 %v731_v41, %v4155_v31  ;;  %v6561_v28 = vld [vmem:[#allocation12_spill] sm:$0xff] }
 0x24c   :  { %v705_v11 = vsel %vm68_vm0, %v678_v14, 0.0  ;;  %v681_v53 = vmul.f32 %v665_v32, %v4226_v52  ;;  %v707_v38 = vsel %vm68_vm0, %v679_v12, 0.0  ;;  %v6563_v12 = vld [vmem:[#allocation13_spill] sm:$0xff] }
 0x24d   :  { %v692_v10 = vadd.f32 %v691_v24, %v690_v34  ;;  %v709_v57 = vsel %vm68_vm0, %v680_v35, 0.0 }
 0x24e   :  { %v711_v13 = vsel %vm68_vm0, %v681_v53, 0.0 }
 0x24f   :  { %v694_v37 = vadd.f32 %v693_v19, %v692_v10  ;;  %v780_v19 = vpop.permute.xlu2 %779 }
 0x251   :  { %v696_v48 = vadd.f32 %v695_v17, %v694_v37 }
 0x253   :  { %v698_v33 = vadd.f32 %v697_v3, %v696_v48  ;;  %v4579_v48 = vld [vmem:[%s6465_s14 + $0x18] sm:$0xff]  ;;  %v4598_v3 = vld [vmem:[%s6465_s14] sm:$0xff] }
 0x254   :  { %819 = vmatpush.msra.mxu3 %v4579_v48  ;;  %1189 = vmatpush.msrb.mxu0 %v4579_v48 }
 0x255   :  { %v700_v21 = vadd.f32 %v699_v4, %v698_v33 }
 0x256   :  { %820 = vmatpush.msra.mxu3 %v4584_v26  ;;  %1190 = vmatpush.msrb.mxu0 %v4584_v26 }
 0x257   :  { %v702_v61 = vadd.f32 %v701_v39, %v700_v21  ;;  %v6562_v39 = vld [vmem:[#allocation11_spill] sm:$0xff] }
 0x258   :  { %821 = vmatpush.msra.mxu3 %v4591_v60  ;;  %1191 = vmatpush.msrb.mxu0 %v4591_v60 }
 0x259   :  { %v704_v47 = vadd.f32 %v703_v36, %v702_v61 }
 0x25a   :  { %822 = vmatpush.msra.mxu3 %v4598_v3  ;;  %1192 = vmatpush.msrb.mxu0 %v4598_v3 }
 0x25b   :  { %v706_v9 = vadd.f32 %v705_v11, %v704_v47  ;;  %v6564_v11 = vld [vmem:[#allocation15_spill] sm:$0xff] }
 0x25d   :  { %v708_v15 = vadd.f32 %v707_v38, %v706_v9 }
 0x25f   :  { %v710_v44 = vadd.f32 %v709_v57, %v708_v15  ;;  %v6565_v15 = vld [vmem:[#allocation16_spill] sm:$0xff] }
 0x261   :  { %v712_v8 = vadd.f32 %v711_v13, %v710_v44 }
 0x263   :  { %3083 = vmatmul.msk.f32.vlgmr.msrb.gmra.mxu3 %vm68_vm0, %v712_v8  ;;  %v6566_v8 = vld [vmem:[#allocation17_spill] sm:$0xff] }
 0x264   :  { %1126 = vmatpush.msrb.mxu3 %v4493_v2 }
 0x266   :  { %1127 = vmatpush.msrb.mxu3 %v4498_v43 }
 0x268   :  { %1128 = vmatpush.msrb.mxu3 %v4507_v6 }
 0x26a   :  { %1129 = vmatpush.msrb.mxu3 %v4518_v18 }
 0x2e6   :  { %v755_v45 = vpop.f32.mrf.mxu3 }
 0x2e7   :  { %v758_v22 = vadd.f32 %v755_v45, %v734_v59 }
 0x2e9   :  { %3198 = vtanh.f32 %v758_v22  ;;  %v3084_v52 = vmul.f32 -1.442695, %v758_v22  ;;  %v6567_v22 = vld [vmem:[#allocation18_spill] sm:$0xff] }
 0x2eb   :  { %3200 = vpow2.f32 %v3084_v52 }
 0x2ef   :  { %v3199_v7 = vpop.eup %3198 }
 0x2f0   :  { %784 = vrot.lane.b32.xlu1 %v3199_v7, %s3740_s27 }
 0x2f1   :  { %v3201_v40 = vpop.eup %3200 }
 0x2f2   :  { %v762_v56 = vadd.f32 1.0, %v3201_v40 }
 0x2f4   :  { %3202 = vrcp.f32 %v762_v56  ;;  %v774_v5 = vand.u32 2147483648, %v762_v56  ;;  %vm768_vm2 = vweird.f32 %v762_v56  ;;  %v772_v31 = vand.u32 2147483647, %v762_v56 }
 0x2f6   :  { %v775_v24 = vor.u32 1.1754944e-38, %v774_v5  ;;  %vm773_vm4 = vcmp.eq.f32.partialorder %v772_v31, 8.507059e+37  ;;  %v6569_v31 = vld [vmem:[#allocation20_spill] sm:$0xff] }
 0x2fa   :  { %v3203_v16 = vpop.eup %3202 }
 0x2fb   :  { %v764_v1 = vmul.f32 %v3203_v16, %v762_v56  ;;  %vm769_vm1 = vweird.f32 %v3203_v16 }
 0x2fc   :  { %vm770_vm3 = vmor %vm768_vm2, %vm769_vm1 }
 0x2fd   :  { %v765_v23 = vsub.f32 1.0, %v764_v1 }
 0x2ff   :  { %v766_v58 = vmul.f32 %v3203_v16, %v765_v23 }
 0x301   :  { %v767_v34 = vadd.f32 %v3203_v16, %v766_v58  ;;  %v6568_v58 = vld [vmem:[#allocation19_spill] sm:$0xff] }
 0x303   :  { %v771_v63 = vsel %vm770_vm3, %v3203_v16, %v767_v34 }
 0x304   :  { %v776_v0 = vsel %vm773_vm4, %v775_v24, %v771_v63 }
 0x305   :  { %v782_v37 = vmul.f32 %v780_v19, %v776_v0 }
 0x362   :  { %v785_v10 = vpop.permute.xlu1 %784 }
 0x363   :  { %v787_v62 = vmul.f32 %v785_v10, %v776_v0 }
 0x365   :  { %789 = vrot.lane.b32.xlu0 %v787_v62, %s3739_s18 }
 0x3d7   :  { %v790_v25 = vpop.permute.xlu0 %789 }
 0x3d8   :  { %v4572_v46 = vadd.f32 %v790_v25, %v782_v37 }
 0x3da   :  { %3204 = vtanh.f32 %v4572_v46 }
 0x3e0   :  { %v3205_v17 = vpop.eup %3204 }
 0x3e1   :  { %795 = vrot.lane.b32.xlu2 %v3205_v17, %s3740_s27 }
 0x43b   :  { %v796_v33 = vpop.permute.xlu2 %795 }
 0x43c   :  { %v798_v27 = vmul.f32 %v796_v33, %v776_v0  ;;  %v6570_v0 = vld [vmem:[#allocation21_spill] sm:$0xff] }
 0x43e   :  { %803 = vrot.lane.b32.xlu1 %v798_v27, %s3739_s18 }
 0x4b0   :  { %v804_v42 = vpop.permute.xlu1 %803 }
 0x4b1   :  { %3085 = vmatmul.msk.f32.vlgmr.msra.gmra.mxu3 %vm68_vm0, %v804_v42  ;;  %3086 = vmatmul.msk.f32.vlgmr.msra.gmra.mxu0 %vm68_vm0, %v804_v42 }
 0x4b2   :  { %3087 = vmatmul.msk.f32.vlgmr.msra.gmra.mxu2 %vm68_vm0, %v804_v42  ;;  %1473 = vmatpush.msra.mxu3 %v4215_v49  ;;  %v6571_v42 = vld [vmem:[#allocation22_spill] sm:$0xff] }
 0x4b3   :  { %1497 = vmatpush.msra.mxu0 %v4493_v2  ;;  %1560 = vmatpush.msra.mxu2 %v4579_v48 }
 0x4b4   :  { %1474 = vmatpush.msra.mxu3 %v4220_v50  ;;  %v4630_v50 = vld [vmem:[%s6466_s15] ss:$0 sm:$0xff] }
 0x4b5   :  { %1498 = vmatpush.msra.mxu0 %v4498_v43  ;;  %1561 = vmatpush.msra.mxu2 %v4584_v26 }
 0x4b6   :  { %1475 = vmatpush.msra.mxu3 %v4234_v54 }
 0x4b7   :  { %1499 = vmatpush.msra.mxu0 %v4507_v6  ;;  %1562 = vmatpush.msra.mxu2 %v4591_v60 }
 0x4b8   :  { %1476 = vmatpush.msra.mxu3 %v4242_v55 }
 0x4b9   :  { %1500 = vmatpush.msra.mxu0 %v4518_v18  ;;  %1563 = vmatpush.msra.mxu2 %v4598_v3 }
 0x52e   :  { %v845_v49 = vpop.f32.mrf.mxu0 }
 0x52f   :  { %v4625_v4 = vadd.f32 %v4268_v20, %v845_v49 }
 0x531   :  { %v850_v54 = vadd.f32 %v4625_v4, %v4274_v30  ;;  %v849_v21 = vadd.f32 %v4625_v4, %v4297_v51  ;;  %v848_v55 = vadd.f32 %v4625_v4, %v4271_v29  ;;  %v853_v14 = vadd.f32 %v4625_v4, %v6561_v28 }
 0x532   :  { %v852_v61 = vadd.f32 %v4625_v4, %v6562_v39  ;;  %v851_v36 = vadd.f32 %v4625_v4, %v6563_v12  ;;  %v856_v57 = vadd.f32 %v4625_v4, %v6565_v15  ;;  %v855_v41 = vadd.f32 %v4625_v4, %v6566_v8 }
 0x533   :  { %3206 = vtanh.f32 %v850_v54  ;;  %v854_v7 = vadd.f32 %v4625_v4, %v6567_v22  ;;  %v859_v34 = vadd.f32 %v4625_v4, %v6568_v58  ;;  %v858_v63 = vadd.f32 %v4625_v4, %v6569_v31 }
 0x534   :  { %v824_v20 = vpop.f32.mrf.mxu3  ;;  %3208 = vtanh.f32 %v849_v21  ;;  %v857_v62 = vadd.f32 %v4625_v4, %v6570_v0  ;;  %v862_v49 = vadd.f32 %v4625_v4, %v6571_v42  ;;  %v6572_v21 = vld [vmem:[#allocation23_spill] sm:$0xff] }
 0x535   :  { %v825_v32 = vadd.f32 %v4630_v50, %v824_v20  ;;  %3210 = vtanh.f32 %v848_v55  ;;  %v861_v55 = vadd.f32 %v4625_v4, %v6572_v21 }
 0x536   :  { %3212 = vtanh.f32 %v853_v14 }
 0x537   :  { %827 = vst [vmem:[%s6467_s16] sm:$0xff] %v825_v32  ;;  %3214 = vtanh.f32 %v852_v61  ;;  %v6573_v61 = vld [vmem:[#allocation24_spill] sm:$0xff] }
 0x538   :  { %3216 = vtanh.f32 %v851_v36  ;;  %v860_v32 = vadd.f32 %v4625_v4, %v6573_v61 }
 0x539   :  { %v3207_v47 = vpop.eup %3206  ;;  %3218 = vtanh.f32 %v856_v57 }
 0x53a   :  { %v3209_v35 = vpop.eup %3208  ;;  %v882_v9 = vmul.f32 %v3207_v47, %v6564_v11  ;;  %3220 = vtanh.f32 %v855_v41  ;;  %v6574_v41 = vld [vmem:[#allocation25_spill] sm:$0xff] }
 0x53b   :  { %v3211_v53 = vpop.eup %3210  ;;  %v881_v38 = vmul.f32 %v3209_v35, %v6564_v11  ;;  %3222 = vtanh.f32 %v854_v7 }
 0x53c   :  { %v902_v44 = vsel %vm68_vm0, %v882_v9, 0.0  ;;  %v880_v13 = vmul.f32 %v3211_v53, %v6564_v11  ;;  %v3213_v59 = vpop.eup %3212  ;;  %3224 = vtanh.f32 %v859_v34 }
 0x53d   :  { %903 = vadd.xlane.f32.xlu1 %v902_v44  ;;  %v899_v45 = vsel %vm68_vm0, %v881_v38, 0.0  ;;  %v3215_v52 = vpop.eup %3214  ;;  %v885_v16 = vmul.f32 %v3213_v59, %v6564_v11  ;;  %3226 = vtanh.f32 %v858_v63  ;;  %v863_v59 = vadd.f32 %v4625_v4, %v6574_v41 }
 0x53e   :  { %900 = vadd.xlane.f32.xlu2 %v899_v45  ;;  %v896_v40 = vsel %vm68_vm0, %v880_v13, 0.0  ;;  %v3217_v56 = vpop.eup %3216  ;;  %v884_v1 = vmul.f32 %v3215_v52, %v6564_v11  ;;  %3228 = vtanh.f32 %v857_v62 }
 0x53f   :  { %897 = vadd.xlane.f32.xlu0 %v896_v40  ;;  %v883_v23 = vmul.f32 %v3217_v56, %v6564_v11  ;;  %v911_v5 = vsel %vm68_vm0, %v885_v16, 0.0  ;;  %v3219_v24 = vpop.eup %3218  ;;  %3230 = vtanh.f32 %v862_v49 }
 0x540   :  { %v908_v10 = vsel %vm68_vm0, %v884_v1, 0.0  ;;  %v3221_v19 = vpop.eup %3220  ;;  %v888_v17 = vmul.f32 %v3219_v24, %v6564_v11  ;;  %3232 = vtanh.f32 %v861_v55 }
 0x541   :  { %v905_v37 = vsel %vm68_vm0, %v883_v23, 0.0  ;;  %v3223_v25 = vpop.eup %3222  ;;  %v887_v33 = vmul.f32 %v3221_v19, %v6564_v11  ;;  %3234 = vtanh.f32 %v860_v32 }
 0x542   :  { %v886_v27 = vmul.f32 %v3223_v25, %v6564_v11  ;;  %v920_v54 = vsel %vm68_vm0, %v888_v17, 0.0  ;;  %v3225_v14 = vpop.eup %3224  ;;  %3236 = vtanh.f32 %v863_v59 }
 0x543   :  { %v917_v20 = vsel %vm68_vm0, %v887_v33, 0.0  ;;  %v3227_v36 = vpop.eup %3226  ;;  %v891_v9 = vmul.f32 %v3225_v14, %v6564_v11 }
 0x544   :  { %v914_v47 = vsel %vm68_vm0, %v886_v27, 0.0  ;;  %v3229_v35 = vpop.eup %3228  ;;  %v890_v53 = vmul.f32 %v3227_v36, %v6564_v11 }
 0x545   :  { %912 = vadd.xlane.f32.xlu1 %v911_v5  ;;  %v889_v38 = vmul.f32 %v3229_v35, %v6564_v11  ;;  %v929_v57 = vsel %vm68_vm0, %v891_v9, 0.0  ;;  %v3231_v44 = vpop.eup %3230 }
 0x546   :  { %909 = vadd.xlane.f32.xlu2 %v908_v10  ;;  %v926_v13 = vsel %vm68_vm0, %v890_v53, 0.0  ;;  %v3233_v45 = vpop.eup %3232  ;;  %v894_v40 = vmul.f32 %v3231_v44, %v6564_v11 }
 0x547   :  { %906 = vadd.xlane.f32.xlu0 %v905_v37  ;;  %v923_v7 = vsel %vm68_vm0, %v889_v38, 0.0  ;;  %v3235_v52 = vpop.eup %3234  ;;  %v893_v56 = vmul.f32 %v3233_v45, %v6564_v11 }
 0x548   :  { %v892_v16 = vmul.f32 %v3235_v52, %v6564_v11  ;;  %v938_v1 = vsel %vm68_vm0, %v894_v40, 0.0  ;;  %v3237_v34 = vpop.eup %3236 }
 0x549   :  { %v935_v23 = vsel %vm68_vm0, %v893_v56, 0.0  ;;  %v895_v5 = vmul.f32 %v3237_v34, %v6564_v11 }
 0x54a   :  { %v932_v4 = vsel %vm68_vm0, %v892_v16, 0.0 }
 0x54b   :  { %v941_v63 = vsel %vm68_vm0, %v895_v5, 0.0 }
 0x54d   :  { %921 = vadd.xlane.f32.xlu1 %v920_v54 }
 0x54e   :  { %918 = vadd.xlane.f32.xlu2 %v917_v20 }
 0x54f   :  { %915 = vadd.xlane.f32.xlu0 %v914_v47 }
 0x555   :  { %930 = vadd.xlane.f32.xlu1 %v929_v57 }
 0x556   :  { %927 = vadd.xlane.f32.xlu2 %v926_v13 }
 0x557   :  { %924 = vadd.xlane.f32.xlu0 %v923_v7 }
 0x55d   :  { %939 = vadd.xlane.f32.xlu1 %v938_v1 }
 0x55e   :  { %936 = vadd.xlane.f32.xlu2 %v935_v23 }
 0x55f   :  { %933 = vadd.xlane.f32.xlu0 %v932_v4 }
 0x567   :  { %942 = vadd.xlane.f32.xlu0 %v941_v63 }
 0x5b0   :  { %v4700_v24 = vpop.xlane.xlu1 %903 }
 0x5b1   :  { %v4702_v10 = vpop.xlane.xlu2 %900 }
 0x5b2   :  { %v4704_v62 = vpop.xlane.xlu0 %897 }
 0x5b8   :  { %v4708_v37 = vpop.xlane.xlu1 %912 }
 0x5b9   :  { %v4706_v19 = vpop.xlane.xlu2 %909  ;;  %v945_v14 = vmax.f32 %v4702_v10, %v4708_v37 }
 0x5ba   :  { %v4710_v25 = vpop.xlane.xlu0 %906  ;;  %v944_v20 = vmax.f32 %v4704_v62, %v4706_v19 }
 0x5c0   :  { %v4716_v11 = vpop.xlane.xlu1 %921 }
 0x5c1   :  { %v4712_v17 = vpop.xlane.xlu2 %918  ;;  %v948_v36 = vmax.f32 %v944_v20, %v4716_v11 }
 0x5c2   :  { %v4714_v33 = vpop.xlane.xlu0 %915  ;;  %v947_v47 = vmax.f32 %v4710_v25, %v4712_v17 }
 0x5c3   :  { %v946_v35 = vmax.f32 %v4700_v24, %v4714_v33 }
 0x5c8   :  { %v4722_v54 = vpop.xlane.xlu1 %930 }
 0x5c9   :  { %v4720_v49 = vpop.xlane.xlu2 %927  ;;  %v951_v38 = vmax.f32 %v947_v47, %v4722_v54 }
 0x5ca   :  { %v4718_v27 = vpop.xlane.xlu0 %924  ;;  %v950_v57 = vmax.f32 %v946_v35, %v4720_v49 }
 0x5cb   :  { %v949_v9 = vmax.f32 %v945_v14, %v4718_v27 }
 0x5d0   :  { %v4738_v53 = vpop.xlane.xlu1 %939 }
 0x5d1   :  { %v4730_v32 = vpop.xlane.xlu2 %936  ;;  %v954_v45 = vmax.f32 %v950_v57, %v4738_v53 }
 0x5d2   :  { %v4724_v55 = vpop.xlane.xlu0 %933  ;;  %v953_v44 = vmax.f32 %v949_v9, %v4730_v32 }
 0x5d3   :  { %v952_v13 = vmax.f32 %v948_v36, %v4724_v55 }
 0x5d5   :  { %v956_v52 = vmax.f32 %v952_v13, %v953_v44 }
 0x5da   :  { %v4744_v59 = vpop.xlane.xlu0 %942 }
 0x5db   :  { %v955_v7 = vmax.f32 %v951_v38, %v4744_v59 }
 0x5dd   :  { %v957_v40 = vmax.f32 %v954_v45, %v955_v7 }
 0x5df   :  { %v4748_v56 = vmax.f32 %v956_v52, %v957_v40 }
 0x5e1   :  { %v959_v16 = vsub.f32 %v4704_v62, %v4748_v56  ;;  %v960_v1 = vsub.f32 %v4702_v10, %v4748_v56  ;;  %v961_v23 = vsub.f32 %v4700_v24, %v4748_v56  ;;  %v962_v4 = vsub.f32 %v4710_v25, %v4748_v56 }
 0x5e2   :  { %v963_v63 = vsub.f32 %v4706_v19, %v4748_v56  ;;  %v964_v20 = vsub.f32 %v4708_v37, %v4748_v56  ;;  %v965_v47 = vsub.f32 %v4714_v33, %v4748_v56  ;;  %v966_v9 = vsub.f32 %v4712_v17, %v4748_v56 }
 0x5e3   :  { %v975_v34 = vmul.f32 1.442695, %v959_v16  ;;  %v977_v5 = vmul.f32 1.442695, %v960_v1  ;;  %v979_v14 = vmul.f32 1.442695, %v961_v23  ;;  %v967_v13 = vsub.f32 %v4716_v11, %v4748_v56 }
 0x5e4   :  { %v981_v36 = vmul.f32 1.442695, %v962_v4  ;;  %v983_v35 = vmul.f32 1.442695, %v963_v63  ;;  %v985_v38 = vmul.f32 1.442695, %v964_v20  ;;  %v968_v40 = vsub.f32 %v4718_v27, %v4748_v56 }
 0x5e5   :  { %3238 = vpow2.f32 %v975_v34  ;;  %v987_v45 = vmul.f32 1.442695, %v965_v47  ;;  %v989_v16 = vmul.f32 1.442695, %v966_v9  ;;  %v969_v4 = vsub.f32 %v4720_v49, %v4748_v56 }
 0x5e6   :  { %3240 = vpow2.f32 %v977_v5  ;;  %v991_v34 = vmul.f32 1.442695, %v967_v13  ;;  %v993_v20 = vmul.f32 1.442695, %v968_v40 }
 0x5e7   :  { %3242 = vpow2.f32 %v979_v14  ;;  %v970_v14 = vsub.f32 %v4722_v54, %v4748_v56  ;;  %v995_v9 = vmul.f32 1.442695, %v969_v4 }
 0x5e8   :  { %3244 = vpow2.f32 %v981_v36 }
 0x5e9   :  { %3246 = vpow2.f32 %v983_v35  ;;  %v971_v35 = vsub.f32 %v4724_v55, %v4748_v56  ;;  %v997_v13 = vmul.f32 1.442695, %v970_v14 }
 0x5ea   :  { %3248 = vpow2.f32 %v985_v38 }
 0x5eb   :  { %v3239_v57 = vpop.eup %3238  ;;  %3250 = vpow2.f32 %v987_v45  ;;  %v999_v40 = vmul.f32 1.442695, %v971_v35 }
 0x5ec   :  { %v3241_v44 = vpop.eup %3240  ;;  %3252 = vpow2.f32 %v989_v16 }
 0x5ed   :  { %v1007_v7 = vadd.f32 %v3241_v44, %v3239_v57  ;;  %v3243_v52 = vpop.eup %3242  ;;  %3254 = vpow2.f32 %v991_v34  ;;  %v972_v44 = vsub.f32 %v4730_v32, %v4748_v56 }
 0x5ee   :  { %v3245_v23 = vpop.eup %3244  ;;  %3256 = vpow2.f32 %v993_v20 }
 0x5ef   :  { %v1008_v1 = vadd.f32 %v3243_v52, %v1007_v7  ;;  %v3247_v63 = vpop.eup %3246  ;;  %v973_v52 = vsub.f32 %v4738_v53, %v4748_v56  ;;  %3258 = vpow2.f32 %v995_v9  ;;  %v1001_v4 = vmul.f32 1.442695, %v972_v44 }
 0x5f0   :  { %v3249_v47 = vpop.eup %3248  ;;  %3260 = vpow2.f32 %v997_v13 }
 0x5f1   :  { %v1009_v5 = vadd.f32 %v3245_v23, %v1008_v1  ;;  %v3251_v57 = vpop.eup %3250  ;;  %v974_v23 = vsub.f32 %v4744_v59, %v4748_v56  ;;  %3262 = vpow2.f32 %v999_v40 }
 0x5f2   :  { %v3253_v7 = vpop.eup %3252  ;;  %3264 = vpow2.f32 %v1001_v4 }
 0x5f3   :  { %v1010_v36 = vadd.f32 %v3247_v63, %v1009_v5  ;;  %v3255_v1 = vpop.eup %3254  ;;  %v1003_v63 = vmul.f32 1.442695, %v973_v52 }
 0x5f4   :  { %v3257_v5 = vpop.eup %3256 }
 0x5f5   :  { %v1011_v38 = vadd.f32 %v3249_v47, %v1010_v36  ;;  %v3259_v14 = vpop.eup %3258  ;;  %v1005_v36 = vmul.f32 1.442695, %v974_v23  ;;  %3266 = vpow2.f32 %v1003_v63 }
 0x5f7   :  { %v1012_v45 = vadd.f32 %v3251_v57, %v1011_v38  ;;  %v3261_v38 = vpop.eup %3260  ;;  %3268 = vpow2.f32 %v1005_v36 }
 0x5f8   :  { %v3263_v35 = vpop.eup %3262 }
 0x5f9   :  { %v1013_v16 = vadd.f32 %v3253_v7, %v1012_v45  ;;  %v3265_v45 = vpop.eup %3264 }
 0x5fb   :  { %v1014_v34 = vadd.f32 %v3255_v1, %v1013_v16  ;;  %v3267_v41 = vpop.eup %3266 }
 0x5fd   :  { %v1015_v20 = vadd.f32 %v3257_v5, %v1014_v34  ;;  %v3269_v44 = vpop.eup %3268  ;;  %v4796_v5 = vld [vmem:[%s6457_s1] sm:$0xff] }
 0x5ff   :  { %v1016_v47 = vadd.f32 %v3259_v14, %v1015_v20  ;;  %v4818_v14 = vld [vmem:[%s6457_s1 + $0x18] sm:$0xff] }
 0x601   :  { %v1017_v9 = vadd.f32 %v3261_v38, %v1016_v47 }
 0x603   :  { %v1018_v57 = vadd.f32 %v3263_v35, %v1017_v9  ;;  %v4828_v35 = vld [vmem:[%s6457_s1 + $0x20] sm:$0xff] }
 0x605   :  { %v1019_v7 = vadd.f32 %v3265_v45, %v1018_v57 }
 0x607   :  { %v1020_v13 = vadd.f32 %v3267_v41, %v1019_v7 }
 0x609   :  { %v1021_v16 = vadd.f32 %v3269_v44, %v1020_v13  ;;  %v4837_v13 = vld [vmem:[%s6457_s1 + $0x28] sm:$0xff] }
 0x60b   :  { %3270 = vlog2.f32 %v1021_v16 }
 0x611   :  { %v3271_v40 = vpop.eup %3270 }
 0x612   :  { %v1023_v52 = vmul.f32 0.6931472, %v3271_v40 }
 0x614   :  { %v4783_v1 = vadd.f32 %v1023_v52, %v4748_v56  ;;  %v4846_v52 = vld [vmem:[%s6457_s1 + $0x30] sm:$0xff] }
 0x616   :  { %v1025_v23 = vsub.f32 %v4704_v62, %v4783_v1  ;;  %v1026_v4 = vsub.f32 %v4702_v10, %v4783_v1  ;;  %v1027_v34 = vsub.f32 %v4700_v24, %v4783_v1  ;;  %v1028_v41 = vsub.f32 %v4710_v25, %v4783_v1  ;;  %v4802_v62 = vld [vmem:[%s6457_s1 + $0x8] sm:$0xff]  ;;  %v4810_v25 = vld [vmem:[%s6457_s1 + $0x10] sm:$0xff] }
 0x617   :  { %v1029_v24 = vsub.f32 %v4706_v19, %v4783_v1  ;;  %v1030_v20 = vsub.f32 %v4708_v37, %v4783_v1  ;;  %v1031_v9 = vsub.f32 %v4714_v33, %v4783_v1  ;;  %v1032_v7 = vsub.f32 %v4712_v17, %v4783_v1 }
 0x618   :  { %v1041_v56 = vmul.f32 %v4796_v5, %v1025_v23  ;;  %v1042_v10 = vmul.f32 %v4802_v62, %v1026_v4  ;;  %v1043_v63 = vmul.f32 %v4810_v25, %v1027_v34  ;;  %v1044_v36 = vmul.f32 %v4818_v14, %v1028_v41  ;;  %v4855_v41 = vld [vmem:[%s6457_s1 + $0x38] sm:$0xff] }
 0x619   :  { %v1045_v37 = vmul.f32 %v4828_v35, %v1029_v24  ;;  %v1046_v33 = vmul.f32 %v4837_v13, %v1030_v20  ;;  %v1033_v40 = vsub.f32 %v4716_v11, %v4783_v1  ;;  %v1047_v17 = vmul.f32 %v4846_v52, %v1031_v9 }
 0x61a   :  { %v1057_v47 = vsel %vm68_vm0, %v1041_v56, 0.0  ;;  %v1058_v19 = vsel %vm68_vm0, %v1042_v10, 0.0  ;;  %v1060_v57 = vsel %vm68_vm0, %v1043_v63, 0.0  ;;  %v1062_v44 = vsel %vm68_vm0, %v1044_v36, 0.0  ;;  %v4864_v63 = vld [vmem:[%s6457_s1 + $0x40] sm:$0xff] }
 0x61b   :  { %v1059_v38 = vadd.f32 %v1058_v19, %v1057_v47  ;;  %v1064_v23 = vsel %vm68_vm0, %v1045_v37, 0.0  ;;  %v1034_v34 = vsub.f32 %v4718_v27, %v4783_v1  ;;  %v1048_v11 = vmul.f32 %v4855_v41, %v1032_v7  ;;  %v4873_v19 = vld [vmem:[%s6457_s1 + $0x48] sm:$0xff] }
 0x61c   :  { %v1066_v56 = vsel %vm68_vm0, %v1046_v33, 0.0  ;;  %v1035_v24 = vsub.f32 %v4720_v49, %v4783_v1  ;;  %v1049_v27 = vmul.f32 %v4864_v63, %v1033_v40  ;;  %v1068_v20 = vsel %vm68_vm0, %v1047_v17, 0.0 }
 0x61d   :  { %v1061_v45 = vadd.f32 %v1060_v57, %v1059_v38  ;;  %v1036_v47 = vsub.f32 %v4722_v54, %v4783_v1  ;;  %v1050_v49 = vmul.f32 %v4873_v19, %v1034_v34  ;;  %v1070_v38 = vsel %vm68_vm0, %v1048_v11, 0.0  ;;  %v4882_v57 = vld [vmem:[%s6457_s1 + $0x50] sm:$0xff] }
 0x61e   :  { %v1037_v37 = vsub.f32 %v4724_v55, %v4783_v1  ;;  %v1051_v54 = vmul.f32 %v4882_v57, %v1035_v24  ;;  %v1038_v33 = vsub.f32 %v4730_v32, %v4783_v1  ;;  %v1039_v17 = vsub.f32 %v4738_v53, %v4783_v1 }
 0x61f   :  { %v1063_v16 = vadd.f32 %v1062_v44, %v1061_v45  ;;  %v1072_v45 = vsel %vm68_vm0, %v1049_v27, 0.0  ;;  %v4891_v44 = vld [vmem:[%s6457_s1 + $0x58] sm:$0xff]  ;;  %v1040_v11 = vsub.f32 %v4744_v59, %v4783_v1  ;;  %v4916_v27 = vld [vmem:[%s6457_s1 + $0x70] sm:$0xff] }
 0x620   :  { %v1052_v55 = vmul.f32 %v4891_v44, %v1036_v47  ;;  %v4923_v1 = vld [vmem:[%s6457_s1 + $0x78] sm:$0xff] }
 0x621   :  { %v1065_v4 = vadd.f32 %v1064_v23, %v1063_v16  ;;  %v1074_v16 = vsel %vm68_vm0, %v1050_v49, 0.0  ;;  %v4900_v23 = vld [vmem:[%s6457_s1 + $0x60] sm:$0xff]  ;;  %v1056_v47 = vmul.f32 %v4923_v1, %v1040_v11 }
 0x622   :  { %v1053_v32 = vmul.f32 %v4900_v23, %v1037_v37 }
 0x623   :  { %v1067_v10 = vadd.f32 %v1066_v56, %v1065_v4  ;;  %v1076_v4 = vsel %vm68_vm0, %v1051_v54, 0.0  ;;  %v4909_v56 = vld [vmem:[%s6457_s1 + $0x68] sm:$0xff]  ;;  %v1086_v54 = vsel %vm68_vm0, %v1056_v47, 0.0 }
 0x624   :  { %v1054_v53 = vmul.f32 %v4909_v56, %v1038_v33  ;;  %v4939_v33 = vld [vmem:[%s6460_s7 + $0x10] sm:$0xff] }
 0x625   :  { %v1069_v36 = vadd.f32 %v1068_v20, %v1067_v10  ;;  %v1078_v10 = vsel %vm68_vm0, %v1052_v55, 0.0  ;;  %v1055_v20 = vmul.f32 %v4916_v27, %v1039_v17  ;;  %v4945_v55 = vld [vmem:[%s6460_s7 + $0x8] sm:$0xff]  ;;  %v6575_v17 = vld [vmem:[#allocation3_spill] sm:$0xff] }
 0x626   :  { %v1082_v49 = vsel %vm68_vm0, %v1054_v53, 0.0 }
 0x627   :  { %v1071_v9 = vadd.f32 %v1070_v38, %v1069_v36  ;;  %v1080_v36 = vsel %vm68_vm0, %v1053_v32, 0.0 }
 0x629   :  { %v1073_v7 = vadd.f32 %v1072_v45, %v1071_v9  ;;  %v1084_v9 = vsel %vm68_vm0, %v1055_v20, 0.0 }
 0x62b   :  { %v1075_v40 = vadd.f32 %v1074_v16, %v1073_v7  ;;  %v4933_v7 = vld [vmem:[%s6460_s7 + $0x18] sm:$0xff]  ;;  %v4951_v16 = vld [vmem:[%s6460_s7] sm:$0xff] }
 0x62d   :  { %v1077_v34 = vadd.f32 %v1076_v4, %v1075_v40  ;;  %v1107_v40 = vpop.f32.mrf.mxu2 }
 0x62e   :  { %v1110_v32 = vadd.f32 %v1107_v40, %v6575_v17 }
 0x62f   :  { %v1079_v24 = vadd.f32 %v1078_v10, %v1077_v34 }
 0x631   :  { %v1081_v59 = vadd.f32 %v1080_v36, %v1079_v24 }
 0x633   :  { %v1083_v38 = vadd.f32 %v1082_v49, %v1081_v59 }
 0x635   :  { %v1085_v37 = vadd.f32 %v1084_v9, %v1083_v38 }
 0x637   :  { %v1087_v45 = vadd.f32 %v1086_v54, %v1085_v37 }
 0x639   :  { %3088 = vmatmul.msk.f32.vlgmr.msrb.gmra.mxu3 %vm68_vm0, %v1087_v45 }
 0x63a   :  { %1582 = vmatpush.msrb.mxu3 %v4933_v7 }
 0x63c   :  { %1583 = vmatpush.msrb.mxu3 %v4939_v33 }
 0x63e   :  { %1584 = vmatpush.msrb.mxu3 %v4945_v55 }
 0x640   :  { %1585 = vmatpush.msrb.mxu3 %v4951_v16 }
 0x6bc   :  { %v1131_v4 = vpop.f32.mrf.mxu3 }
 0x6bd   :  { %v1134_v34 = vadd.f32 %v1131_v4, %v1110_v32 }
 0x6bf   :  { %3272 = vtanh.f32 %v1134_v34  ;;  %v3089_v53 = vmul.f32 -1.442695, %v1134_v34 }
 0x6c1   :  { %3274 = vpow2.f32 %v3089_v53 }
 0x6c5   :  { %v3273_v11 = vpop.eup %3272 }
 0x6c6   :  { %1157 = vrot.lane.b32.xlu2 %v3273_v11, %s3740_s27 }
 0x6c7   :  { %v3275_v10 = vpop.eup %3274 }
 0x6c8   :  { %v1138_v24 = vadd.f32 1.0, %v3275_v10 }
 0x6ca   :  { %3276 = vrcp.f32 %v1138_v24  ;;  %v1150_v38 = vand.u32 2147483648, %v1138_v24  ;;  %vm1144_vm6 = vweird.f32 %v1138_v24  ;;  %v1148_v9 = vand.u32 2147483647, %v1138_v24 }
 0x6cc   :  { %v1151_v54 = vor.u32 1.1754944e-38, %v1150_v38  ;;  %vm1149_vm8 = vcmp.eq.f32.partialorder %v1148_v9, 8.507059e+37 }
 0x6d0   :  { %v3277_v20 = vpop.eup %3276 }
 0x6d1   :  { %v1140_v36 = vmul.f32 %v3277_v20, %v1138_v24  ;;  %vm1145_vm5 = vweird.f32 %v3277_v20 }
 0x6d2   :  { %vm1146_vm7 = vmor %vm1144_vm6, %vm1145_vm5 }
 0x6d3   :  { %v1141_v59 = vsub.f32 1.0, %v1140_v36  ;;  %v4985_v36 = vld [vmem:[%s6461_s12 + $0x8] sm:$0xff] }
 0x6d5   :  { %v1142_v47 = vmul.f32 %v3277_v20, %v1141_v59 }
 0x6d7   :  { %v1143_v49 = vadd.f32 %v3277_v20, %v1142_v47 }
 0x6d9   :  { %v1147_v37 = vsel %vm1146_vm7, %v3277_v20, %v1143_v49  ;;  %v4977_v20 = vld [vmem:[%s6461_s12 + $0x10] sm:$0xff] }
 0x6da   :  { %v1152_v40 = vsel %vm1149_vm8, %v1151_v54, %v1147_v37  ;;  %v5025_v37 = vld [vmem:[%s6463_s9] ss:$0 sm:$0xff] }
 0x6db   :  { %v1155_v32 = vmul.f32 %v1152_v40, %v4572_v46  ;;  %v4969_v46 = vld [vmem:[%s6461_s12 + $0x18] sm:$0xff]  ;;  %6577 = vst [vmem:[#allocation3_spill] sm:$0xff] %v5025_v37 }
 0x720   :  { %v1158_v45 = vpop.permute.xlu2 %1157 }
 0x721   :  { %v1160_v17 = vmul.f32 %v1158_v45, %v1152_v40 }
 0x723   :  { %1162 = vrot.lane.b32.xlu1 %v1160_v17, %s3739_s18 }
 0x795   :  { %v1163_v4 = vpop.permute.xlu1 %1162 }
 0x796   :  { %v4958_v34 = vadd.f32 %v1163_v4, %v1155_v32 }
 0x798   :  { %3278 = vtanh.f32 %v4958_v34 }
 0x79e   :  { %v3279_v11 = vpop.eup %3278 }
 0x79f   :  { %1168 = vrot.lane.b32.xlu0 %v3279_v11, %s3740_s27 }
 0x811   :  { %v1169_v53 = vpop.permute.xlu0 %1168 }
 0x812   :  { %v1171_v10 = vmul.f32 %v1169_v53, %v1152_v40 }
 0x814   :  { %1173 = vrot.lane.b32.xlu2 %v1171_v10, %s3739_s18 }
 0x86e   :  { %v1174_v24 = vpop.permute.xlu2 %1173 }
 0x86f   :  { %3090 = vmatmul.msk.f32.vlgmr.msrb.gmra.mxu0 %vm68_vm0, %v1174_v24  ;;  %3092 = vmatmul.msk.f32.vlgmr.msrb.gmra.mxu2 %vm68_vm0, %v1174_v24 }
 0x870   :  { %3093 = vmatmul.msk.f32.vlgmr.msra.gmra.mxu3 %vm68_vm0, %v1174_v24  ;;  %1844 = vmatpush.msrb.mxu0 %v4969_v46 }
 0x871   :  { %1868 = vmatpush.msrb.mxu2 %v4493_v2  ;;  %1931 = vmatpush.msra.mxu3 %v4579_v48  ;;  %v4993_v2 = vld [vmem:[%s6461_s12] sm:$0xff] }
 0x872   :  { %1845 = vmatpush.msrb.mxu0 %v4977_v20 }
 0x873   :  { %1869 = vmatpush.msrb.mxu2 %v4498_v43  ;;  %1932 = vmatpush.msra.mxu3 %v4584_v26  ;;  %v5005_v26 = vld [vmem:[%s6462_s8] ss:$0 sm:$0xff] }
 0x874   :  { %1846 = vmatpush.msrb.mxu0 %v4985_v36  ;;  %6576 = vst [vmem:[#allocation15_spill] sm:$0xff] %v5005_v26 }
 0x875   :  { %1870 = vmatpush.msrb.mxu2 %v4507_v6  ;;  %1933 = vmatpush.msra.mxu3 %v4591_v60 }
 0x876   :  { %1847 = vmatpush.msrb.mxu0 %v4993_v2 }
 0x877   :  { %1871 = vmatpush.msrb.mxu2 %v4518_v18  ;;  %1934 = vmatpush.msra.mxu3 %v4598_v3 }
 0x8ec   :  { %v1194_v43 = vpop.f32.mrf.mxu0 }
 0x8ed   :  { %v1195_v48 = vadd.f32 %v4630_v50, %v1194_v43 }
 0x8ef   :  { %3091 = vst [vmem:[%s6467_s16 + $0x8] sm:$0xff] %v1195_v48 }
 0x8f2   :  { %v1216_v6 = vpop.f32.mrf.mxu2 }
 0x8f3   :  { %v5008_v60 = vadd.f32 %v5005_v26, %v1216_v6 }
 0x8f5   :  { %v1221_v18 = vadd.f32 %v5008_v60, %v4274_v30  ;;  %v1220_v3 = vadd.f32 %v5008_v60, %v4297_v51  ;;  %v1219_v50 = vadd.f32 %v5008_v60, %v4271_v29  ;;  %v1224_v59 = vadd.f32 %v5008_v60, %v6561_v28 }
 0x8f6   :  { %v1223_v47 = vadd.f32 %v5008_v60, %v6562_v39  ;;  %v1222_v49 = vadd.f32 %v5008_v60, %v6563_v12  ;;  %v1227_v17 = vadd.f32 %v5008_v60, %v6565_v15  ;;  %v1226_v11 = vadd.f32 %v5008_v60, %v6566_v8 }
 0x8f7   :  { %3280 = vtanh.f32 %v1221_v18  ;;  %v1225_v24 = vadd.f32 %v5008_v60, %v6567_v22 }
 0x8f8   :  { %3282 = vtanh.f32 %v1220_v3 }
 0x8f9   :  { %3284 = vtanh.f32 %v1219_v50 }
 0x8fa   :  { %3286 = vtanh.f32 %v1224_v59  ;;  %v1230_v59 = vadd.f32 %v5008_v60, %v6568_v58 }
 0x8fb   :  { %3288 = vtanh.f32 %v1223_v47 }
 0x8fc   :  { %3290 = vtanh.f32 %v1222_v49  ;;  %v1229_v49 = vadd.f32 %v5008_v60, %v6569_v31 }
 0x8fd   :  { %v3281_v38 = vpop.eup %3280  ;;  %3292 = vtanh.f32 %v1227_v17 }
 0x8fe   :  { %v3283_v9 = vpop.eup %3282  ;;  %v1253_v54 = vmul.f32 %v5025_v37, %v3281_v38  ;;  %3294 = vtanh.f32 %v1226_v11 }
 0x8ff   :  { %v3285_v45 = vpop.eup %3284  ;;  %v1252_v40 = vmul.f32 %v5025_v37, %v3283_v9  ;;  %3296 = vtanh.f32 %v1225_v24  ;;  %v1232_v24 = vadd.f32 %v5008_v60, %v6572_v21 }
 0x900   :  { %v1273_v32 = vsel %vm68_vm0, %v1253_v54, 0.0  ;;  %v1251_v4 = vmul.f32 %v5025_v37, %v3285_v45  ;;  %v3287_v53 = vpop.eup %3286  ;;  %v1228_v54 = vadd.f32 %v5008_v60, %v6570_v0  ;;  %3298 = vtanh.f32 %v1230_v59 }
 0x901   :  { %1274 = vadd.xlane.f32.xlu2 %v1273_v32  ;;  %v1270_v10 = vsel %vm68_vm0, %v1252_v40, 0.0  ;;  %v3289_v43 = vpop.eup %3288  ;;  %v1256_v18 = vmul.f32 %v5025_v37, %v3287_v53  ;;  %3300 = vtanh.f32 %v1229_v49  ;;  %v1233_v53 = vadd.f32 %v5008_v60, %v6571_v42 }
 0x902   :  { %1271 = vadd.xlane.f32.xlu1 %v1270_v10  ;;  %v1267_v48 = vsel %vm68_vm0, %v1251_v4, 0.0  ;;  %v3291_v6 = vpop.eup %3290  ;;  %v1255_v3 = vmul.f32 %v5025_v37, %v3289_v43  ;;  %3302 = vtanh.f32 %v1228_v54 }
 0x903   :  { %1268 = vadd.xlane.f32.xlu0 %v1267_v48  ;;  %v1254_v50 = vmul.f32 %v5025_v37, %v3291_v6  ;;  %v1282_v47 = vsel %vm68_vm0, %v1256_v18, 0.0  ;;  %v3293_v38 = vpop.eup %3292  ;;  %v1231_v6 = vadd.f32 %v5008_v60, %v6573_v61  ;;  %3304 = vtanh.f32 %v1233_v53 }
 0x904   :  { %v1279_v9 = vsel %vm68_vm0, %v1255_v3, 0.0  ;;  %v3295_v45 = vpop.eup %3294  ;;  %v1259_v32 = vmul.f32 %v5025_v37, %v3293_v38  ;;  %3306 = vtanh.f32 %v1232_v24 }
 0x905   :  { %v1276_v40 = vsel %vm68_vm0, %v1254_v50, 0.0  ;;  %v3297_v17 = vpop.eup %3296  ;;  %v1258_v4 = vmul.f32 %v5025_v37, %v3295_v45  ;;  %3308 = vtanh.f32 %v1231_v6  ;;  %v6578_v45 = vld [vmem:[#allocation25_spill] sm:$0xff] }
 0x906   :  { %v1257_v11 = vmul.f32 %v5025_v37, %v3297_v17  ;;  %v1291_v10 = vsel %vm68_vm0, %v1259_v32, 0.0  ;;  %v3299_v43 = vpop.eup %3298 }
 0x907   :  { %v1288_v48 = vsel %vm68_vm0, %v1258_v4, 0.0  ;;  %v3301_v18 = vpop.eup %3300  ;;  %v1262_v59 = vmul.f32 %v5025_v37, %v3299_v43 }
 0x908   :  { %v1285_v3 = vsel %vm68_vm0, %v1257_v11, 0.0  ;;  %v3303_v50 = vpop.eup %3302 }
 0x909   :  { %1283 = vadd.xlane.f32.xlu2 %v1282_v47  ;;  %v1261_v47 = vmul.f32 %v5025_v37, %v3301_v18  ;;  %v1260_v49 = vmul.f32 %v5025_v37, %v3303_v50  ;;  %v1300_v38 = vsel %vm68_vm0, %v1262_v59, 0.0 }
 0x90a   :  { %1280 = vadd.xlane.f32.xlu1 %v1279_v9  ;;  %v3305_v9 = vpop.eup %3304 }
 0x90b   :  { %1277 = vadd.xlane.f32.xlu0 %v1276_v40  ;;  %v1297_v54 = vsel %vm68_vm0, %v1261_v47, 0.0  ;;  %v1234_v40 = vadd.f32 %v5008_v60, %v6578_v45  ;;  %v3307_v17 = vpop.eup %3306  ;;  %v1294_v32 = vsel %vm68_vm0, %v1260_v49, 0.0  ;;  %v1265_v11 = vmul.f32 %v5025_v37, %v3305_v9 }
 0x90c   :  { %v3309_v4 = vpop.eup %3308  ;;  %v1264_v53 = vmul.f32 %v5025_v37, %v3307_v17 }
 0x90d   :  { %3310 = vtanh.f32 %v1234_v40  ;;  %v1309_v24 = vsel %vm68_vm0, %v1265_v11, 0.0 }
 0x90e   :  { %v1306_v43 = vsel %vm68_vm0, %v1264_v53, 0.0 }
 0x911   :  { %1292 = vadd.xlane.f32.xlu2 %v1291_v10  ;;  %v1263_v10 = vmul.f32 %v5025_v37, %v3309_v4 }
 0x912   :  { %1289 = vadd.xlane.f32.xlu1 %v1288_v48 }
 0x913   :  { %1286 = vadd.xlane.f32.xlu0 %v1285_v3  ;;  %v1303_v60 = vsel %vm68_vm0, %v1263_v10, 0.0  ;;  %v3311_v48 = vpop.eup %3310 }
 0x914   :  { %v1266_v6 = vmul.f32 %v5025_v37, %v3311_v48 }
 0x916   :  { %v1312_v18 = vsel %vm68_vm0, %v1266_v6, 0.0 }
 0x919   :  { %1301 = vadd.xlane.f32.xlu2 %v1300_v38 }
 0x91a   :  { %1298 = vadd.xlane.f32.xlu1 %v1297_v54 }
 0x91b   :  { %1295 = vadd.xlane.f32.xlu0 %v1294_v32 }
 0x921   :  { %1310 = vadd.xlane.f32.xlu2 %v1309_v24 }
 0x922   :  { %1307 = vadd.xlane.f32.xlu1 %v1306_v43 }
 0x923   :  { %1304 = vadd.xlane.f32.xlu0 %v1303_v60 }
 0x92b   :  { %1313 = vadd.xlane.f32.xlu0 %v1312_v18 }
 0x974   :  { %v5079_v3 = vpop.xlane.xlu2 %1274 }
 0x975   :  { %v5081_v50 = vpop.xlane.xlu1 %1271 }
 0x976   :  { %v5083_v59 = vpop.xlane.xlu0 %1268 }
 0x97c   :  { %v5087_v49 = vpop.xlane.xlu2 %1283 }
 0x97d   :  { %v5085_v47 = vpop.xlane.xlu1 %1280  ;;  %v1316_v53 = vmax.f32 %v5081_v50, %v5087_v49 }
 0x97e   :  { %v5089_v38 = vpop.xlane.xlu0 %1277  ;;  %v1315_v10 = vmax.f32 %v5083_v59, %v5085_v47 }
 0x984   :  { %v5095_v40 = vpop.xlane.xlu2 %1292 }
 0x985   :  { %v5091_v9 = vpop.xlane.xlu1 %1289  ;;  %v1319_v43 = vmax.f32 %v1315_v10, %v5095_v40 }
 0x986   :  { %v5093_v54 = vpop.xlane.xlu0 %1286  ;;  %v1318_v60 = vmax.f32 %v5089_v38, %v5091_v9 }
 0x987   :  { %v1317_v48 = vmax.f32 %v5079_v3, %v5093_v54 }
 0x98c   :  { %v5101_v4 = vpop.xlane.xlu2 %1301 }
 0x98d   :  { %v5099_v32 = vpop.xlane.xlu1 %1298  ;;  %v1322_v45 = vmax.f32 %v1318_v60, %v5101_v4 }
 0x98e   :  { %v5097_v17 = vpop.xlane.xlu0 %1295  ;;  %v1321_v61 = vmax.f32 %v1317_v48, %v5099_v32 }
 0x98f   :  { %v1320_v6 = vmax.f32 %v1316_v53, %v5097_v17 }
 0x994   :  { %v5117_v18 = vpop.xlane.xlu2 %1310 }
 0x995   :  { %v5109_v24 = vpop.xlane.xlu1 %1307  ;;  %v1325_v10 = vmax.f32 %v1321_v61, %v5117_v18 }
 0x996   :  { %v5103_v11 = vpop.xlane.xlu0 %1304  ;;  %v1324_v21 = vmax.f32 %v1320_v6, %v5109_v24 }
 0x997   :  { %v1323_v42 = vmax.f32 %v1319_v43, %v5103_v11 }
 0x999   :  { %v1327_v58 = vmax.f32 %v1323_v42, %v1324_v21 }
 0x99e   :  { %v5123_v0 = vpop.xlane.xlu0 %1313 }
 0x99f   :  { %v1326_v31 = vmax.f32 %v1322_v45, %v5123_v0 }
 0x9a1   :  { %v1328_v22 = vmax.f32 %v1325_v10, %v1326_v31 }
 0x9a3   :  { %v5127_v8 = vmax.f32 %v1327_v58, %v1328_v22 }
 0x9a5   :  { %v1330_v53 = vsub.f32 %v5083_v59, %v5127_v8  ;;  %v1331_v60 = vsub.f32 %v5081_v50, %v5127_v8  ;;  %v1332_v48 = vsub.f32 %v5079_v3, %v5127_v8  ;;  %v1333_v43 = vsub.f32 %v5089_v38, %v5127_v8 }
 0x9a6   :  { %v1334_v42 = vsub.f32 %v5085_v47, %v5127_v8  ;;  %v1335_v22 = vsub.f32 %v5087_v49, %v5127_v8  ;;  %v1336_v21 = vsub.f32 %v5093_v54, %v5127_v8  ;;  %v1337_v10 = vsub.f32 %v5091_v9, %v5127_v8 }
 0x9a7   :  { %v1346_v6 = vmul.f32 1.442695, %v1330_v53  ;;  %v1348_v61 = vmul.f32 1.442695, %v1331_v60  ;;  %v1350_v31 = vmul.f32 1.442695, %v1332_v48  ;;  %v1338_v48 = vsub.f32 %v5095_v40, %v5127_v8 }
 0x9a8   :  { %v1352_v58 = vmul.f32 1.442695, %v1333_v43  ;;  %v1354_v45 = vmul.f32 1.442695, %v1334_v42  ;;  %v1356_v53 = vmul.f32 1.442695, %v1335_v22  ;;  %v1339_v43 = vsub.f32 %v5097_v17, %v5127_v8 }
 0x9a9   :  { %3312 = vpow2.f32 %v1346_v6  ;;  %v1358_v6 = vmul.f32 1.442695, %v1336_v21  ;;  %v1362_v22 = vmul.f32 1.442695, %v1338_v48 }
 0x9aa   :  { %3314 = vpow2.f32 %v1348_v61 }
 0x9ab   :  { %3316 = vpow2.f32 %v1350_v31  ;;  %v1360_v31 = vmul.f32 1.442695, %v1337_v10 }
 0x9ac   :  { %3318 = vpow2.f32 %v1352_v58  ;;  %v1340_v58 = vsub.f32 %v5099_v32, %v5127_v8 }
 0x9ad   :  { %3320 = vpow2.f32 %v1354_v45  ;;  %v1341_v45 = vsub.f32 %v5101_v4, %v5127_v8 }
 0x9ae   :  { %3322 = vpow2.f32 %v1356_v53  ;;  %v1342_v53 = vsub.f32 %v5103_v11, %v5127_v8 }
 0x9af   :  { %v3313_v60 = vpop.eup %3312  ;;  %3324 = vpow2.f32 %v1358_v6  ;;  %v1343_v6 = vsub.f32 %v5109_v24, %v5127_v8 }
 0x9b0   :  { %v3315_v15 = vpop.eup %3314  ;;  %3326 = vpow2.f32 %v1360_v31  ;;  %v1344_v31 = vsub.f32 %v5117_v18, %v5127_v8 }
 0x9b1   :  { %v1378_v37 = vadd.f32 %v3315_v15, %v3313_v60  ;;  %v3317_v61 = vpop.eup %3316  ;;  %v1364_v15 = vmul.f32 1.442695, %v1339_v43  ;;  %3328 = vpow2.f32 %v1362_v22  ;;  %v1345_v22 = vsub.f32 %v5123_v0, %v5127_v8 }
 0x9b2   :  { %v3319_v12 = vpop.eup %3318  ;;  %v1374_v29 = vmul.f32 1.442695, %v1344_v31 }
 0x9b3   :  { %v1379_v42 = vadd.f32 %v3317_v61, %v1378_v37  ;;  %v3321_v28 = vpop.eup %3320  ;;  %v1366_v37 = vmul.f32 1.442695, %v1340_v58  ;;  %3330 = vpow2.f32 %v1364_v15  ;;  %v1372_v58 = vmul.f32 1.442695, %v1343_v6 }
 0x9b4   :  { %v3323_v60 = vpop.eup %3322 }
 0x9b5   :  { %v1380_v39 = vadd.f32 %v3319_v12, %v1379_v42  ;;  %v3325_v61 = vpop.eup %3324  ;;  %v1368_v12 = vmul.f32 1.442695, %v1341_v45  ;;  %3332 = vpow2.f32 %v1366_v37 }
 0x9b6   :  { %v3327_v42 = vpop.eup %3326 }
 0x9b7   :  { %v1381_v21 = vadd.f32 %v3321_v28, %v1380_v39  ;;  %v1370_v28 = vmul.f32 1.442695, %v1342_v53  ;;  %v3329_v43 = vpop.eup %3328  ;;  %3334 = vpow2.f32 %v1368_v12 }
 0x9b9   :  { %v1382_v10 = vadd.f32 %v3323_v60, %v1381_v21  ;;  %v3331_v60 = vpop.eup %3330  ;;  %3336 = vpow2.f32 %v1370_v28 }
 0x9ba   :  { %3338 = vpow2.f32 %v1372_v58 }
 0x9bb   :  { %v1383_v48 = vadd.f32 %v3325_v61, %v1382_v10  ;;  %v3333_v45 = vpop.eup %3332  ;;  %v1376_v10 = vmul.f32 1.442695, %v1345_v22  ;;  %3340 = vpow2.f32 %v1374_v29 }
 0x9bd   :  { %v1384_v39 = vadd.f32 %v3327_v42, %v1383_v48  ;;  %v3335_v51 = vpop.eup %3334  ;;  %3342 = vpow2.f32 %v1376_v10 }
 0x9bf   :  { %v1385_v21 = vadd.f32 %v3329_v43, %v1384_v39  ;;  %v3337_v53 = vpop.eup %3336 }
 0x9c0   :  { %v3339_v42 = vpop.eup %3338 }
 0x9c1   :  { %v1386_v15 = vadd.f32 %v3331_v60, %v1385_v21  ;;  %v3341_v26 = vpop.eup %3340 }
 0x9c3   :  { %v1387_v61 = vadd.f32 %v3333_v45, %v1386_v15  ;;  %v3343_v6 = vpop.eup %3342 }
 0x9c5   :  { %v1388_v37 = vadd.f32 %v3335_v51, %v1387_v61 }
 0x9c7   :  { %v1389_v48 = vadd.f32 %v3337_v53, %v1388_v37 }
 0x9c9   :  { %v1390_v30 = vadd.f32 %v3339_v42, %v1389_v48 }
 0x9cb   :  { %v1391_v12 = vadd.f32 %v3341_v26, %v1390_v30 }
 0x9cd   :  { %v1392_v39 = vadd.f32 %v3343_v6, %v1391_v12 }
 0x9cf   :  { %3344 = vlog2.f32 %v1392_v39 }
 0x9d5   :  { %v3345_v28 = vpop.eup %3344 }
 0x9d6   :  { %v1394_v31 = vmul.f32 0.6931472, %v3345_v28 }
 0x9d8   :  { %v1395_v43 = vadd.f32 %v1394_v31, %v5127_v8 }
 0x9da   :  { %v1396_v22 = vsub.f32 %v5083_v59, %v1395_v43  ;;  %v1397_v58 = vsub.f32 %v5081_v50, %v1395_v43  ;;  %v1398_v29 = vsub.f32 %v5079_v3, %v1395_v43  ;;  %v1399_v51 = vsub.f32 %v5089_v38, %v1395_v43 }
 0x9db   :  { %v1400_v30 = vsub.f32 %v5085_v47, %v1395_v43  ;;  %v1401_v15 = vsub.f32 %v5087_v49, %v1395_v43  ;;  %v1402_v3 = vsub.f32 %v5093_v54, %v1395_v43  ;;  %v1403_v47 = vsub.f32 %v5091_v9, %v1395_v43 }
 0x9dc   :  { %v1412_v21 = vmul.f32 %v4796_v5, %v1396_v22  ;;  %v1413_v60 = vmul.f32 %v4802_v62, %v1397_v58  ;;  %v1414_v26 = vmul.f32 %v4810_v25, %v1398_v29  ;;  %v1415_v8 = vmul.f32 %v4818_v14, %v1399_v51 }
 0x9dd   :  { %v1416_v38 = vmul.f32 %v4828_v35, %v1400_v30  ;;  %v1417_v25 = vmul.f32 %v4837_v13, %v1401_v15  ;;  %v1404_v14 = vsub.f32 %v5095_v40, %v1395_v43  ;;  %v1418_v61 = vmul.f32 %v4846_v52, %v1402_v3 }
 0x9de   :  { %v1428_v59 = vsel %vm68_vm0, %v1412_v21, 0.0  ;;  %v1429_v50 = vsel %vm68_vm0, %v1413_v60, 0.0  ;;  %v1431_v5 = vsel %vm68_vm0, %v1414_v26, 0.0  ;;  %v1433_v49 = vsel %vm68_vm0, %v1415_v8, 0.0 }
 0x9df   :  { %v1430_v45 = vadd.f32 %v1429_v50, %v1428_v59  ;;  %v1435_v37 = vsel %vm68_vm0, %v1416_v38, 0.0  ;;  %v1405_v54 = vsub.f32 %v5097_v17, %v1395_v43  ;;  %v1419_v35 = vmul.f32 %v4855_v41, %v1403_v47 }
 0x9e0   :  { %v1437_v48 = vsel %vm68_vm0, %v1417_v25, 0.0  ;;  %v1406_v9 = vsub.f32 %v5099_v32, %v1395_v43  ;;  %v1420_v13 = vmul.f32 %v4864_v63, %v1404_v14  ;;  %v1439_v12 = vsel %vm68_vm0, %v1418_v61, 0.0 }
 0x9e1   :  { %v1432_v62 = vadd.f32 %v1431_v5, %v1430_v45  ;;  %v1407_v40 = vsub.f32 %v5101_v4, %v1395_v43  ;;  %v1421_v52 = vmul.f32 %v4873_v19, %v1405_v54  ;;  %v1441_v39 = vsel %vm68_vm0, %v1419_v35, 0.0 }
 0x9e2   :  { %v1408_v17 = vsub.f32 %v5103_v11, %v1395_v43  ;;  %v1422_v41 = vmul.f32 %v4882_v57, %v1406_v9  ;;  %v1443_v31 = vsel %vm68_vm0, %v1420_v13, 0.0  ;;  %v1409_v32 = vsub.f32 %v5109_v24, %v1395_v43 }
 0x9e3   :  { %v1434_v10 = vadd.f32 %v1433_v49, %v1432_v62  ;;  %v1423_v63 = vmul.f32 %v4891_v44, %v1407_v40  ;;  %v1445_v58 = vsel %vm68_vm0, %v1421_v52, 0.0  ;;  %v1410_v4 = vsub.f32 %v5117_v18, %v1395_v43  ;;  %v5250_v40 = vld [vmem:[%s6465_s14 + $0x10] sm:$0xff]  ;;  %v5263_v52 = vld [vmem:[%s6465_s14 + $0x8] sm:$0xff] }
 0x9e4   :  { %v1424_v19 = vmul.f32 %v4900_v23, %v1408_v17  ;;  %v1447_v51 = vsel %vm68_vm0, %v1422_v41, 0.0  ;;  %v1411_v11 = vsub.f32 %v5123_v0, %v1395_v43  ;;  %v1425_v57 = vmul.f32 %v4909_v56, %v1409_v32  ;;  %v1478_v56 = vpop.f32.mrf.mxu3  ;;  %v6581_v32 = vld [vmem:[#allocation10_spill] sm:$0xff] }
 0x9e5   :  { %v1436_v53 = vadd.f32 %v1435_v37, %v1434_v10  ;;  %v1449_v60 = vsel %vm68_vm0, %v1423_v63, 0.0  ;;  %v1426_v24 = vmul.f32 %v4916_v27, %v1410_v4  ;;  %v6579_v27 = vld [vmem:[#allocation4_spill] sm:$0xff]  ;;  %v6583_v4 = vld [vmem:[#allocation9_spill] sm:$0xff] }
 0x9e6   :  { %v1451_v44 = vsel %vm68_vm0, %v1424_v19, 0.0  ;;  %v1427_v15 = vmul.f32 %v4923_v1, %v1411_v11  ;;  %v1453_v18 = vsel %vm68_vm0, %v1425_v57, 0.0  ;;  %v1481_v1 = vadd.f32 %v1478_v56, %v6579_v27  ;;  %v6585_v11 = vld [vmem:[#allocation11_spill] sm:$0xff]  ;;  %v6589_v56 = vld [vmem:[#allocation17_spill] sm:$0xff] }
 0x9e7   :  { %v1438_v42 = vadd.f32 %v1437_v48, %v1436_v53  ;;  %v1455_v8 = vsel %vm68_vm0, %v1426_v24, 0.0 }
 0x9e8   :  { %v1457_v0 = vsel %vm68_vm0, %v1427_v15, 0.0 }
 0x9e9   :  { %v1440_v6 = vadd.f32 %v1439_v12, %v1438_v42 }
 0x9eb   :  { %v1442_v28 = vadd.f32 %v1441_v39, %v1440_v6  ;;  %v5237_v6 = vld [vmem:[%s6465_s14 + $0x18] sm:$0xff]  ;;  %v5276_v39 = vld [vmem:[%s6465_s14] sm:$0xff] }
 0x9ed   :  { %v1444_v22 = vadd.f32 %v1443_v31, %v1442_v28  ;;  %v6580_v31 = vld [vmem:[#allocation15_spill] sm:$0xff] }
 0x9ef   :  { %v1446_v29 = vadd.f32 %v1445_v58, %v1444_v22  ;;  %v6582_v58 = vld [vmem:[#allocation14_spill] sm:$0xff] }
 0x9f1   :  { %v1448_v21 = vadd.f32 %v1447_v51, %v1446_v29  ;;  %v6584_v51 = vld [vmem:[#allocation12_spill] sm:$0xff] }
 0x9f3   :  { %v1450_v30 = vadd.f32 %v1449_v60, %v1448_v21  ;;  %v6586_v60 = vld [vmem:[#allocation13_spill] sm:$0xff] }
 0x9f5   :  { %v1452_v26 = vadd.f32 %v1451_v44, %v1450_v30 }
 0x9f7   :  { %v1454_v23 = vadd.f32 %v1453_v18, %v1452_v26  ;;  %v6587_v26 = vld [vmem:[#allocation3_spill] sm:$0xff] }
 0x9f9   :  { %v1456_v59 = vadd.f32 %v1455_v8, %v1454_v23  ;;  %v6588_v8 = vld [vmem:[#allocation16_spill] sm:$0xff] }
 0x9fb   :  { %v1458_v43 = vadd.f32 %v1457_v0, %v1456_v59 }
 0x9fd   :  { %3094 = vmatmul.msk.f32.vlgmr.msra.gmra.mxu0 %vm68_vm0, %v1458_v43 }
 0x9fe   :  { %1953 = vmatpush.msra.mxu0 %v4933_v7 }
 0xa00   :  { %1954 = vmatpush.msra.mxu0 %v4939_v33 }
 0xa02   :  { %1955 = vmatpush.msra.mxu0 %v4945_v55 }
 0xa04   :  { %1956 = vmatpush.msra.mxu0 %v4951_v16 }
 0xa7a   :  { %v1502_v50 = vpop.f32.mrf.mxu0 }
 0xa7b   :  { %v1505_v45 = vadd.f32 %v1502_v50, %v1481_v1 }
 0xa7d   :  { %3346 = vtanh.f32 %v1505_v45  ;;  %v3095_v38 = vmul.f32 -1.442695, %v1505_v45  ;;  %v6590_v45 = vld [vmem:[#allocation18_spill] sm:$0xff] }
 0xa7f   :  { %3348 = vpow2.f32 %v3095_v38 }
 0xa83   :  { %v3347_v3 = vpop.eup %3346 }
 0xa84   :  { %1528 = vrot.lane.b32.xlu1 %v3347_v3, %s3740_s27 }
 0xa85   :  { %v3349_v5 = vpop.eup %3348 }
 0xa86   :  { %v1509_v62 = vadd.f32 1.0, %v3349_v5 }
 0xa88   :  { %3350 = vrcp.f32 %v1509_v62  ;;  %v1521_v16 = vand.u32 2147483648, %v1509_v62  ;;  %vm1515_vm10 = vweird.f32 %v1509_v62  ;;  %v1519_v49 = vand.u32 2147483647, %v1509_v62 }
 0xa8a   :  { %v1522_v14 = vor.u32 1.1754944e-38, %v1521_v16  ;;  %vm1520_vm12 = vcmp.eq.f32.partialorder %v1519_v49, 8.507059e+37  ;;  %v6592_v49 = vld [vmem:[#allocation20_spill] sm:$0xff] }
 0xa8e   :  { %v3351_v7 = vpop.eup %3350 }
 0xa8f   :  { %v1511_v33 = vmul.f32 %v3351_v7, %v1509_v62  ;;  %vm1516_vm9 = vweird.f32 %v3351_v7 }
 0xa90   :  { %vm1517_vm11 = vmor %vm1515_vm10, %vm1516_vm9 }
 0xa91   :  { %v1512_v47 = vsub.f32 1.0, %v1511_v33 }
 0xa93   :  { %v1513_v55 = vmul.f32 %v3351_v7, %v1512_v47 }
 0xa95   :  { %v1514_v25 = vadd.f32 %v3351_v7, %v1513_v55  ;;  %v6591_v55 = vld [vmem:[#allocation19_spill] sm:$0xff] }
 0xa97   :  { %v1518_v10 = vsel %vm1517_vm11, %v3351_v7, %v1514_v25 }
 0xa98   :  { %v1523_v37 = vsel %vm1520_vm12, %v1522_v14, %v1518_v10 }
 0xa99   :  { %v1526_v54 = vmul.f32 %v1523_v37, %v4958_v34  ;;  %v5231_v34 = vld [vmem:[%s6464_s11 + $0x18] sm:$0xff] }
 0xaf6   :  { %v1529_v61 = vpop.permute.xlu1 %1528 }
 0xaf7   :  { %v1531_v53 = vmul.f32 %v1529_v61, %v1523_v37 }
 0xaf9   :  { %1533 = vrot.lane.b32.xlu2 %v1531_v53, %s3739_s18 }
 0xb53   :  { %v1534_v35 = vpop.permute.xlu2 %1533 }
 0xb54   :  { %v5219_v48 = vadd.f32 %v1534_v35, %v1526_v54 }
 0xb56   :  { %3352 = vtanh.f32 %v5219_v48 }
 0xb5c   :  { %v3353_v42 = vpop.eup %3352 }
 0xb5d   :  { %1539 = vrot.lane.b32.xlu0 %v3353_v42, %s3740_s27 }
 0xbcf   :  { %v1540_v9 = vpop.permute.xlu0 %1539 }
 0xbd0   :  { %v1542_v13 = vmul.f32 %v1540_v9, %v1523_v37  ;;  %v6593_v37 = vld [vmem:[#allocation21_spill] sm:$0xff] }
 0xbd2   :  { %1544 = vrot.lane.b32.xlu1 %v1542_v13, %s3739_s18 }
 0xc44   :  { %v1545_v12 = vpop.permute.xlu1 %1544 }
 0xc45   :  { %3096 = vmatmul.msk.f32.vlgmr.msra.gmra.mxu2 %vm68_vm0, %v1545_v12  ;;  %3098 = vmatmul.msk.f32.vlgmr.msrb.gmra.mxu3 %vm68_vm0, %v1545_v12 }
 0xc46   :  { %3099 = vmatmul.msk.f32.vlgmr.msrb.gmra.mxu0 %vm68_vm0, %v1545_v12  ;;  %2215 = vmatpush.msra.mxu2 %v4969_v46  ;;  %v5244_v46 = vld [vmem:[%s6464_s11 + $0x10] sm:$0xff] }
 0xc47   :  { %2239 = vmatpush.msrb.mxu3 %v5231_v34  ;;  %2302 = vmatpush.msrb.mxu0 %v5237_v6 }
 0xc48   :  { %2216 = vmatpush.msra.mxu2 %v4977_v20  ;;  %v5257_v20 = vld [vmem:[%s6464_s11 + $0x8] sm:$0xff] }
 0xc49   :  { %2240 = vmatpush.msrb.mxu3 %v5244_v46  ;;  %2303 = vmatpush.msrb.mxu0 %v5250_v40 }
 0xc4a   :  { %2217 = vmatpush.msra.mxu2 %v4985_v36  ;;  %v5270_v36 = vld [vmem:[%s6464_s11] sm:$0xff] }
 0xc4b   :  { %2241 = vmatpush.msrb.mxu3 %v5257_v20  ;;  %2304 = vmatpush.msrb.mxu0 %v5263_v52 }
 0xc4c   :  { %2218 = vmatpush.msra.mxu2 %v4993_v2  ;;  %v5282_v2 = vld [vmem:[%s6466_s15] ss:$0 sm:$0xff] }
 0xc4d   :  { %2242 = vmatpush.msrb.mxu3 %v5270_v36  ;;  %2305 = vmatpush.msrb.mxu0 %v5276_v39 }
 0xcc8   :  { %v1565_v28 = vpop.f32.mrf.mxu2  ;;  %v1587_v17 = vpop.f32.mrf.mxu3 }
 0xcc9   :  { %v1566_v41 = vadd.f32 %v5282_v2, %v1565_v28  ;;  %v5286_v22 = vadd.f32 %v6580_v31, %v1587_v17  ;;  %v6594_v28 = vld [vmem:[#allocation22_spill] sm:$0xff]  ;;  %v6595_v31 = vld [vmem:[#allocation23_spill] sm:$0xff] }
 0xccb   :  { %3097 = vst [vmem:[%s6467_s16 + $0x10] sm:$0xff] %v1566_v41  ;;  %v1592_v63 = vadd.f32 %v5286_v22, %v6581_v32  ;;  %v1591_v29 = vadd.f32 %v5286_v22, %v6582_v58  ;;  %v1590_v19 = vadd.f32 %v5286_v22, %v6583_v4  ;;  %v1595_v21 = vadd.f32 %v5286_v22, %v6584_v51 }
 0xccc   :  { %v1594_v57 = vadd.f32 %v5286_v22, %v6585_v11  ;;  %v1593_v30 = vadd.f32 %v5286_v22, %v6586_v60  ;;  %v1598_v59 = vadd.f32 %v5286_v22, %v6588_v8  ;;  %v1597_v27 = vadd.f32 %v5286_v22, %v6589_v56 }
 0xccd   :  { %3354 = vtanh.f32 %v1592_v63  ;;  %v1596_v3 = vadd.f32 %v5286_v22, %v6590_v45  ;;  %v1601_v25 = vadd.f32 %v5286_v22, %v6591_v55  ;;  %v1600_v10 = vadd.f32 %v5286_v22, %v6592_v49 }
 0xcce   :  { %3356 = vtanh.f32 %v1591_v29  ;;  %v1599_v53 = vadd.f32 %v5286_v22, %v6593_v37  ;;  %v1604_v17 = vadd.f32 %v5286_v22, %v6594_v28  ;;  %v1603_v63 = vadd.f32 %v5286_v22, %v6595_v31 }
 0xccf   :  { %3358 = vtanh.f32 %v1590_v19 }
 0xcd0   :  { %3360 = vtanh.f32 %v1595_v21  ;;  %v6596_v21 = vld [vmem:[#allocation24_spill] sm:$0xff] }
 0xcd1   :  { %3362 = vtanh.f32 %v1594_v57  ;;  %v1602_v57 = vadd.f32 %v5286_v22, %v6596_v21 }
 0xcd2   :  { %3364 = vtanh.f32 %v1593_v30 }
 0xcd3   :  { %v3355_v24 = vpop.eup %3354  ;;  %3366 = vtanh.f32 %v1598_v59 }
 0xcd4   :  { %v3357_v44 = vpop.eup %3356  ;;  %v1624_v15 = vmul.f32 %v6587_v26, %v3355_v24  ;;  %3368 = vtanh.f32 %v1597_v27  ;;  %v6597_v27 = vld [vmem:[#allocation25_spill] sm:$0xff] }
 0xcd5   :  { %v3359_v18 = vpop.eup %3358  ;;  %v1623_v23 = vmul.f32 %v6587_v26, %v3357_v44  ;;  %3370 = vtanh.f32 %v1596_v3 }
 0xcd6   :  { %v1644_v0 = vsel %vm68_vm0, %v1624_v15, 0.0  ;;  %v1622_v43 = vmul.f32 %v6587_v26, %v3359_v18  ;;  %v3361_v1 = vpop.eup %3360  ;;  %3372 = vtanh.f32 %v1601_v25 }
 0xcd7   :  { %1645 = vadd.xlane.f32.xlu1 %v1644_v0  ;;  %v1641_v50 = vsel %vm68_vm0, %v1623_v23, 0.0  ;;  %v3363_v38 = vpop.eup %3362  ;;  %v1627_v7 = vmul.f32 %v6587_v26, %v3361_v1  ;;  %3374 = vtanh.f32 %v1600_v10  ;;  %v1605_v1 = vadd.f32 %v5286_v22, %v6597_v27 }
 0xcd8   :  { %1642 = vadd.xlane.f32.xlu2 %v1641_v50  ;;  %v1638_v5 = vsel %vm68_vm0, %v1622_v43, 0.0  ;;  %v3365_v62 = vpop.eup %3364  ;;  %v1626_v33 = vmul.f32 %v6587_v26, %v3363_v38  ;;  %3376 = vtanh.f32 %v1599_v53 }
 0xcd9   :  { %1639 = vadd.xlane.f32.xlu0 %v1638_v5  ;;  %v1625_v47 = vmul.f32 %v6587_v26, %v3365_v62  ;;  %v1653_v16 = vsel %vm68_vm0, %v1627_v7, 0.0  ;;  %v3367_v14 = vpop.eup %3366  ;;  %3378 = vtanh.f32 %v1604_v17 }
 0xcda   :  { %v1650_v61 = vsel %vm68_vm0, %v1626_v33, 0.0  ;;  %v3369_v54 = vpop.eup %3368  ;;  %v1630_v9 = vmul.f32 %v6587_v26, %v3367_v14  ;;  %3380 = vtanh.f32 %v1603_v63 }
 0xcdb   :  { %v1647_v35 = vsel %vm68_vm0, %v1625_v47, 0.0  ;;  %v3371_v42 = vpop.eup %3370  ;;  %v1629_v13 = vmul.f32 %v6587_v26, %v3369_v54  ;;  %3382 = vtanh.f32 %v1602_v57 }
 0xcdc   :  { %v1628_v12 = vmul.f32 %v6587_v26, %v3371_v42  ;;  %v1662_v41 = vsel %vm68_vm0, %v1630_v9, 0.0  ;;  %v3373_v29 = vpop.eup %3372  ;;  %3384 = vtanh.f32 %v1605_v1 }
 0xcdd   :  { %v1659_v19 = vsel %vm68_vm0, %v1629_v13, 0.0  ;;  %v3375_v30 = vpop.eup %3374  ;;  %v1633_v15 = vmul.f32 %v6587_v26, %v3373_v29 }
 0xcde   :  { %v1656_v24 = vsel %vm68_vm0, %v1628_v12, 0.0  ;;  %v3377_v44 = vpop.eup %3376  ;;  %v1632_v18 = vmul.f32 %v6587_v26, %v3375_v30 }
 0xcdf   :  { %1654 = vadd.xlane.f32.xlu1 %v1653_v16  ;;  %v1631_v23 = vmul.f32 %v6587_v26, %v3377_v44  ;;  %v1671_v59 = vsel %vm68_vm0, %v1633_v15, 0.0  ;;  %v3379_v0 = vpop.eup %3378 }
 0xce0   :  { %1651 = vadd.xlane.f32.xlu2 %v1650_v61  ;;  %v1668_v43 = vsel %vm68_vm0, %v1632_v18, 0.0  ;;  %v3381_v50 = vpop.eup %3380  ;;  %v1636_v5 = vmul.f32 %v6587_v26, %v3379_v0 }
 0xce1   :  { %1648 = vadd.xlane.f32.xlu0 %v1647_v35  ;;  %v1665_v3 = vsel %vm68_vm0, %v1631_v23, 0.0  ;;  %v3383_v38 = vpop.eup %3382  ;;  %v1635_v62 = vmul.f32 %v6587_v26, %v3381_v50 }
 0xce2   :  { %v1634_v7 = vmul.f32 %v6587_v26, %v3383_v38  ;;  %v1680_v33 = vsel %vm68_vm0, %v1636_v5, 0.0  ;;  %v3385_v25 = vpop.eup %3384 }
 0xce3   :  { %v1677_v47 = vsel %vm68_vm0, %v1635_v62, 0.0  ;;  %v1637_v16 = vmul.f32 %v6587_v26, %v3385_v25 }
 0xce4   :  { %v1674_v22 = vsel %vm68_vm0, %v1634_v7, 0.0 }
 0xce5   :  { %v1683_v10 = vsel %vm68_vm0, %v1637_v16, 0.0 }
 0xce7   :  { %1663 = vadd.xlane.f32.xlu1 %v1662_v41 }
 0xce8   :  { %1660 = vadd.xlane.f32.xlu2 %v1659_v19 }
 0xce9   :  { %1657 = vadd.xlane.f32.xlu0 %v1656_v24 }
 0xcef   :  { %1672 = vadd.xlane.f32.xlu1 %v1671_v59 }
 0xcf0   :  { %1669 = vadd.xlane.f32.xlu2 %v1668_v43 }
 0xcf1   :  { %1666 = vadd.xlane.f32.xlu0 %v1665_v3 }
 0xcf7   :  { %1681 = vadd.xlane.f32.xlu1 %v1680_v33 }
 0xcf8   :  { %1678 = vadd.xlane.f32.xlu2 %v1677_v47 }
 0xcf9   :  { %1675 = vadd.xlane.f32.xlu0 %v1674_v22 }
 0xd01   :  { %1684 = vadd.xlane.f32.xlu0 %v1683_v10 }
 0xd4a   :  { %v5355_v14 = vpop.xlane.xlu1 %1645 }
 0xd4b   :  { %v5357_v61 = vpop.xlane.xlu2 %1642 }
 0xd4c   :  { %v5359_v53 = vpop.xlane.xlu0 %1639 }
 0xd52   :  { %v5363_v35 = vpop.xlane.xlu1 %1654 }
 0xd53   :  { %v5361_v54 = vpop.xlane.xlu2 %1651  ;;  %v1687_v29 = vmax.f32 %v5357_v61, %v5363_v35 }
 0xd54   :  { %v5365_v42 = vpop.xlane.xlu0 %1648  ;;  %v1686_v19 = vmax.f32 %v5359_v53, %v5361_v54 }
 0xd5a   :  { %v5371_v26 = vpop.xlane.xlu1 %1663 }
 0xd5b   :  { %v5367_v9 = vpop.xlane.xlu2 %1660  ;;  %v1690_v30 = vmax.f32 %v1686_v19, %v5371_v26 }
 0xd5c   :  { %v5369_v13 = vpop.xlane.xlu0 %1657  ;;  %v1689_v24 = vmax.f32 %v5365_v42, %v5367_v9 }
 0xd5d   :  { %v1688_v44 = vmax.f32 %v5355_v14, %v5369_v13 }
 0xd62   :  { %v5377_v41 = vpop.xlane.xlu1 %1672 }
 0xd63   :  { %v5375_v17 = vpop.xlane.xlu2 %1669  ;;  %v1693_v23 = vmax.f32 %v1689_v24, %v5377_v41 }
 0xd64   :  { %v5373_v12 = vpop.xlane.xlu0 %1666  ;;  %v1692_v59 = vmax.f32 %v1688_v44, %v5375_v17 }
 0xd65   :  { %v1691_v15 = vmax.f32 %v1687_v29, %v5373_v12 }
 0xd6a   :  { %v5393_v18 = vpop.xlane.xlu1 %1681 }
 0xd6b   :  { %v5385_v57 = vpop.xlane.xlu2 %1678  ;;  %v1696_v50 = vmax.f32 %v1692_v59, %v5393_v18 }
 0xd6c   :  { %v5379_v63 = vpop.xlane.xlu0 %1675  ;;  %v1695_v0 = vmax.f32 %v1691_v15, %v5385_v57 }
 0xd6d   :  { %v1694_v43 = vmax.f32 %v1690_v30, %v5379_v63 }
 0xd6f   :  { %v1698_v38 = vmax.f32 %v1694_v43, %v1695_v0 }
 0xd74   :  { %v5399_v1 = vpop.xlane.xlu0 %1684 }
 0xd75   :  { %v1697_v3 = vmax.f32 %v1693_v23, %v5399_v1 }
 0xd77   :  { %v1699_v5 = vmax.f32 %v1696_v50, %v1697_v3 }
 0xd79   :  { %v5403_v62 = vmax.f32 %v1698_v38, %v1699_v5 }
 0xd7b   :  { %v1701_v7 = vsub.f32 %v5359_v53, %v5403_v62  ;;  %v1702_v33 = vsub.f32 %v5357_v61, %v5403_v62  ;;  %v1703_v47 = vsub.f32 %v5355_v14, %v5403_v62  ;;  %v1704_v22 = vsub.f32 %v5365_v42, %v5403_v62 }
 0xd7c   :  { %v1705_v10 = vsub.f32 %v5361_v54, %v5403_v62  ;;  %v1706_v19 = vsub.f32 %v5363_v35, %v5403_v62  ;;  %v1707_v24 = vsub.f32 %v5369_v13, %v5403_v62  ;;  %v1708_v15 = vsub.f32 %v5367_v9, %v5403_v62 }
 0xd7d   :  { %v1717_v25 = vmul.f32 1.442695, %v1701_v7  ;;  %v1719_v16 = vmul.f32 1.442695, %v1702_v33  ;;  %v1721_v29 = vmul.f32 1.442695, %v1703_v47  ;;  %v1709_v43 = vsub.f32 %v5371_v26, %v5403_v62 }
 0xd7e   :  { %v1723_v30 = vmul.f32 1.442695, %v1704_v22  ;;  %v1725_v44 = vmul.f32 1.442695, %v1705_v10  ;;  %v1727_v23 = vmul.f32 1.442695, %v1706_v19  ;;  %v1710_v5 = vsub.f32 %v5373_v12, %v5403_v62 }
 0xd7f   :  { %3386 = vpow2.f32 %v1717_v25  ;;  %v1729_v50 = vmul.f32 1.442695, %v1707_v24  ;;  %v1731_v7 = vmul.f32 1.442695, %v1708_v15  ;;  %v1711_v22 = vsub.f32 %v5375_v17, %v5403_v62 }
 0xd80   :  { %3388 = vpow2.f32 %v1719_v16  ;;  %v1733_v25 = vmul.f32 1.442695, %v1709_v43  ;;  %v1735_v19 = vmul.f32 1.442695, %v1710_v5 }
 0xd81   :  { %3390 = vpow2.f32 %v1721_v29  ;;  %v1712_v29 = vsub.f32 %v5377_v41, %v5403_v62  ;;  %v1737_v15 = vmul.f32 1.442695, %v1711_v22 }
 0xd82   :  { %3392 = vpow2.f32 %v1723_v30 }
 0xd83   :  { %3394 = vpow2.f32 %v1725_v44  ;;  %v1713_v44 = vsub.f32 %v5379_v63, %v5403_v62  ;;  %v1739_v43 = vmul.f32 1.442695, %v1712_v29 }
 0xd84   :  { %3396 = vpow2.f32 %v1727_v23 }
 0xd85   :  { %v3387_v59 = vpop.eup %3386  ;;  %3398 = vpow2.f32 %v1729_v50  ;;  %v1741_v5 = vmul.f32 1.442695, %v1713_v44 }
 0xd86   :  { %v3389_v0 = vpop.eup %3388  ;;  %3400 = vpow2.f32 %v1731_v7 }
 0xd87   :  { %v1749_v3 = vadd.f32 %v3389_v0, %v3387_v59  ;;  %v3391_v38 = vpop.eup %3390  ;;  %3402 = vpow2.f32 %v1733_v25  ;;  %v1714_v0 = vsub.f32 %v5385_v57, %v5403_v62 }
 0xd88   :  { %v3393_v47 = vpop.eup %3392  ;;  %3404 = vpow2.f32 %v1735_v19 }
 0xd89   :  { %v1750_v33 = vadd.f32 %v3391_v38, %v1749_v3  ;;  %v3395_v10 = vpop.eup %3394  ;;  %v1715_v38 = vsub.f32 %v5393_v18, %v5403_v62  ;;  %3406 = vpow2.f32 %v1737_v15  ;;  %v1743_v22 = vmul.f32 1.442695, %v1714_v0 }
 0xd8a   :  { %v3397_v24 = vpop.eup %3396  ;;  %3408 = vpow2.f32 %v1739_v43 }
 0xd8b   :  { %v1751_v16 = vadd.f32 %v3393_v47, %v1750_v33  ;;  %v3399_v59 = vpop.eup %3398  ;;  %v1716_v47 = vsub.f32 %v5399_v1, %v5403_v62  ;;  %3410 = vpow2.f32 %v1741_v5 }
 0xd8c   :  { %v3401_v3 = vpop.eup %3400  ;;  %3412 = vpow2.f32 %v1743_v22 }
 0xd8d   :  { %v1752_v30 = vadd.f32 %v3395_v10, %v1751_v16  ;;  %v3403_v33 = vpop.eup %3402  ;;  %v1745_v10 = vmul.f32 1.442695, %v1715_v38 }
 0xd8e   :  { %v3405_v16 = vpop.eup %3404 }
 0xd8f   :  { %v1753_v23 = vadd.f32 %v3397_v24, %v1752_v30  ;;  %v3407_v29 = vpop.eup %3406  ;;  %v1747_v30 = vmul.f32 1.442695, %v1716_v47  ;;  %3414 = vpow2.f32 %v1745_v10 }
 0xd91   :  { %v1754_v50 = vadd.f32 %v3399_v59, %v1753_v23  ;;  %v3409_v23 = vpop.eup %3408  ;;  %3416 = vpow2.f32 %v1747_v30 }
 0xd92   :  { %v3411_v44 = vpop.eup %3410 }
 0xd93   :  { %v1755_v7 = vadd.f32 %v3401_v3, %v1754_v50  ;;  %v3413_v50 = vpop.eup %3412 }
 0xd95   :  { %v1756_v25 = vadd.f32 %v3403_v33, %v1755_v7  ;;  %v3415_v27 = vpop.eup %3414 }
 0xd97   :  { %v1757_v19 = vadd.f32 %v3405_v16, %v1756_v25  ;;  %v3417_v0 = vpop.eup %3416  ;;  %v5451_v16 = vld [vmem:[%s6457_s1] sm:$0xff] }
 0xd99   :  { %v1758_v24 = vadd.f32 %v3407_v29, %v1757_v19  ;;  %v5473_v29 = vld [vmem:[%s6457_s1 + $0x18] sm:$0xff] }
 0xd9b   :  { %v1759_v15 = vadd.f32 %v3409_v23, %v1758_v24 }
 0xd9d   :  { %v1760_v59 = vadd.f32 %v3411_v44, %v1759_v15  ;;  %v5483_v44 = vld [vmem:[%s6457_s1 + $0x20] sm:$0xff] }
 0xd9f   :  { %v1761_v3 = vadd.f32 %v3413_v50, %v1760_v59 }
 0xda1   :  { %v1762_v43 = vadd.f32 %v3415_v27, %v1761_v3 }
 0xda3   :  { %v1763_v7 = vadd.f32 %v3417_v0, %v1762_v43  ;;  %v5492_v43 = vld [vmem:[%s6457_s1 + $0x28] sm:$0xff] }
 0xda5   :  { %3418 = vlog2.f32 %v1763_v7 }
 0xdab   :  { %v3419_v5 = vpop.eup %3418 }
 0xdac   :  { %v1765_v38 = vmul.f32 0.6931472, %v3419_v5 }
 0xdae   :  { %v5438_v33 = vadd.f32 %v1765_v38, %v5403_v62  ;;  %v5501_v38 = vld [vmem:[%s6457_s1 + $0x30] sm:$0xff] }
 0xdb0   :  { %v1767_v47 = vsub.f32 %v5359_v53, %v5438_v33  ;;  %v1768_v22 = vsub.f32 %v5357_v61, %v5438_v33  ;;  %v1769_v25 = vsub.f32 %v5355_v14, %v5438_v33  ;;  %v1770_v27 = vsub.f32 %v5365_v42, %v5438_v33  ;;  %v5457_v53 = vld [vmem:[%s6457_s1 + $0x8] sm:$0xff]  ;;  %v5465_v42 = vld [vmem:[%s6457_s1 + $0x10] sm:$0xff] }
 0xdb1   :  { %v1771_v14 = vsub.f32 %v5361_v54, %v5438_v33  ;;  %v1772_v19 = vsub.f32 %v5363_v35, %v5438_v33  ;;  %v1773_v15 = vsub.f32 %v5369_v13, %v5438_v33  ;;  %v1774_v3 = vsub.f32 %v5367_v9, %v5438_v33 }
 0xdb2   :  { %v1783_v62 = vmul.f32 %v5451_v16, %v1767_v47  ;;  %v1784_v61 = vmul.f32 %v5457_v53, %v1768_v22  ;;  %v1785_v10 = vmul.f32 %v5465_v42, %v1769_v25  ;;  %v1786_v30 = vmul.f32 %v5473_v29, %v1770_v27  ;;  %v5510_v27 = vld [vmem:[%s6457_s1 + $0x38] sm:$0xff] }
 0xdb3   :  { %v1787_v35 = vmul.f32 %v5483_v44, %v1771_v14  ;;  %v1788_v13 = vmul.f32 %v5492_v43, %v1772_v19  ;;  %v1775_v5 = vsub.f32 %v5371_v26, %v5438_v33  ;;  %v1789_v9 = vmul.f32 %v5501_v38, %v1773_v15 }
 0xdb4   :  { %v1799_v24 = vsel %vm68_vm0, %v1783_v62, 0.0  ;;  %v1800_v54 = vsel %vm68_vm0, %v1784_v61, 0.0  ;;  %v1802_v59 = vsel %vm68_vm0, %v1785_v10, 0.0  ;;  %v1804_v0 = vsel %vm68_vm0, %v1786_v30, 0.0  ;;  %v5519_v10 = vld [vmem:[%s6457_s1 + $0x40] sm:$0xff] }
 0xdb5   :  { %v1801_v23 = vadd.f32 %v1800_v54, %v1799_v24  ;;  %v1806_v47 = vsel %vm68_vm0, %v1787_v35, 0.0  ;;  %v1776_v25 = vsub.f32 %v5373_v12, %v5438_v33  ;;  %v1790_v26 = vmul.f32 %v5510_v27, %v1774_v3  ;;  %v5528_v54 = vld [vmem:[%s6457_s1 + $0x48] sm:$0xff] }
 0xdb6   :  { %v1808_v62 = vsel %vm68_vm0, %v1788_v13, 0.0  ;;  %v1777_v14 = vsub.f32 %v5375_v17, %v5438_v33  ;;  %v1791_v12 = vmul.f32 %v5519_v10, %v1775_v5  ;;  %v1810_v19 = vsel %vm68_vm0, %v1789_v9, 0.0 }
 0xdb7   :  { %v1803_v50 = vadd.f32 %v1802_v59, %v1801_v23  ;;  %v1778_v24 = vsub.f32 %v5377_v41, %v5438_v33  ;;  %v1792_v17 = vmul.f32 %v5528_v54, %v1776_v25  ;;  %v1812_v23 = vsel %vm68_vm0, %v1790_v26, 0.0  ;;  %v5537_v59 = vld [vmem:[%s6457_s1 + $0x50] sm:$0xff] }
 0xdb8   :  { %v1779_v35 = vsub.f32 %v5379_v63, %v5438_v33  ;;  %v1793_v41 = vmul.f32 %v5537_v59, %v1777_v14  ;;  %v1780_v13 = vsub.f32 %v5385_v57, %v5438_v33  ;;  %v1781_v9 = vsub.f32 %v5393_v18, %v5438_v33 }
 0xdb9   :  { %v1805_v7 = vadd.f32 %v1804_v0, %v1803_v50  ;;  %v1814_v50 = vsel %vm68_vm0, %v1791_v12, 0.0  ;;  %v5546_v0 = vld [vmem:[%s6457_s1 + $0x58] sm:$0xff]  ;;  %v1782_v26 = vsub.f32 %v5399_v1, %v5438_v33  ;;  %v5571_v12 = vld [vmem:[%s6457_s1 + $0x70] sm:$0xff] }
 0xdba   :  { %v1794_v63 = vmul.f32 %v5546_v0, %v1778_v24  ;;  %v5578_v33 = vld [vmem:[%s6457_s1 + $0x78] sm:$0xff] }
 0xdbb   :  { %v1807_v22 = vadd.f32 %v1806_v47, %v1805_v7  ;;  %v1816_v7 = vsel %vm68_vm0, %v1792_v17, 0.0  ;;  %v5555_v47 = vld [vmem:[%s6457_s1 + $0x60] sm:$0xff]  ;;  %v1798_v24 = vmul.f32 %v5578_v33, %v1782_v26 }
 0xdbc   :  { %v1795_v57 = vmul.f32 %v5555_v47, %v1779_v35 }
 0xdbd   :  { %v1809_v61 = vadd.f32 %v1808_v62, %v1807_v22  ;;  %v1818_v22 = vsel %vm68_vm0, %v1793_v41, 0.0  ;;  %v5564_v62 = vld [vmem:[%s6457_s1 + $0x68] sm:$0xff]  ;;  %v1828_v41 = vsel %vm68_vm0, %v1798_v24, 0.0 }
 0xdbe   :  { %v1796_v18 = vmul.f32 %v5564_v62, %v1780_v13  ;;  %v5594_v13 = vld [vmem:[%s6460_s7 + $0x10] sm:$0xff] }
 0xdbf   :  { %v1811_v30 = vadd.f32 %v1810_v19, %v1809_v61  ;;  %v1820_v61 = vsel %vm68_vm0, %v1794_v63, 0.0  ;;  %v1797_v19 = vmul.f32 %v5571_v12, %v1781_v9  ;;  %v5600_v63 = vld [vmem:[%s6460_s7 + $0x8] sm:$0xff]  ;;  %v6598_v9 = vld [vmem:[#allocation5_spill] sm:$0xff] }
 0xdc0   :  { %v1824_v17 = vsel %vm68_vm0, %v1796_v18, 0.0 }
 0xdc1   :  { %v1813_v15 = vadd.f32 %v1812_v23, %v1811_v30  ;;  %v1822_v30 = vsel %vm68_vm0, %v1795_v57, 0.0 }
 0xdc3   :  { %v1815_v3 = vadd.f32 %v1814_v50, %v1813_v15  ;;  %v1826_v15 = vsel %vm68_vm0, %v1797_v19, 0.0 }
 0xdc5   :  { %v1817_v5 = vadd.f32 %v1816_v7, %v1815_v3  ;;  %v5588_v3 = vld [vmem:[%s6460_s7 + $0x18] sm:$0xff]  ;;  %v5606_v7 = vld [vmem:[%s6460_s7] sm:$0xff] }
 0xdc7   :  { %v1819_v25 = vadd.f32 %v1818_v22, %v1817_v5  ;;  %v1849_v5 = vpop.f32.mrf.mxu0 }
 0xdc8   :  { %v1852_v57 = vadd.f32 %v1849_v5, %v6598_v9 }
 0xdc9   :  { %v1821_v14 = vadd.f32 %v1820_v61, %v1819_v25 }
 0xdcb   :  { %v1823_v1 = vadd.f32 %v1822_v30, %v1821_v14 }
 0xdcd   :  { %v1825_v23 = vadd.f32 %v1824_v17, %v1823_v1 }
 0xdcf   :  { %v1827_v35 = vadd.f32 %v1826_v15, %v1825_v23 }
 0xdd1   :  { %v1829_v50 = vadd.f32 %v1828_v41, %v1827_v35 }
 0xdd3   :  { %3100 = vmatmul.msk.f32.vlgmr.msrb.gmra.mxu2 %vm68_vm0, %v1829_v50 }
 0xdd4   :  { %2324 = vmatpush.msrb.mxu2 %v5588_v3 }
 0xdd6   :  { %2325 = vmatpush.msrb.mxu2 %v5594_v13 }
 0xdd8   :  { %2326 = vmatpush.msrb.mxu2 %v5600_v63 }
 0xdda   :  { %2327 = vmatpush.msrb.mxu2 %v5606_v7 }
 0xe56   :  { %v1873_v22 = vpop.f32.mrf.mxu2 }
 0xe57   :  { %v1876_v25 = vadd.f32 %v1873_v22, %v1852_v57 }
 0xe59   :  { %3420 = vtanh.f32 %v1876_v25  ;;  %v3101_v18 = vmul.f32 -1.442695, %v1876_v25 }
 0xe5b   :  { %3422 = vpow2.f32 %v3101_v18 }
 0xe5f   :  { %v3421_v26 = vpop.eup %3420 }
 0xe60   :  { %1899 = vrot.lane.b32.xlu2 %v3421_v26, %s3740_s27 }
 0xe61   :  { %v3423_v61 = vpop.eup %3422 }
 0xe62   :  { %v1880_v14 = vadd.f32 1.0, %v3423_v61 }
 0xe64   :  { %3424 = vrcp.f32 %v1880_v14  ;;  %v1892_v23 = vand.u32 2147483648, %v1880_v14  ;;  %vm1886_vm14 = vweird.f32 %v1880_v14  ;;  %v1890_v15 = vand.u32 2147483647, %v1880_v14 }
 0xe66   :  { %v1893_v41 = vor.u32 1.1754944e-38, %v1892_v23  ;;  %vm1891_vm1 = vcmp.eq.f32.partialorder %v1890_v15, 8.507059e+37 }
 0xe6a   :  { %v3425_v19 = vpop.eup %3424 }
 0xe6b   :  { %v1882_v30 = vmul.f32 %v3425_v19, %v1880_v14  ;;  %vm1887_vm13 = vweird.f32 %v3425_v19 }
 0xe6c   :  { %vm1888_vm15 = vmor %vm1886_vm14, %vm1887_vm13 }
 0xe6d   :  { %v1883_v1 = vsub.f32 1.0, %v1882_v30  ;;  %v5640_v30 = vld [vmem:[%s6461_s12 + $0x8] sm:$0xff] }
 0xe6f   :  { %v1884_v24 = vmul.f32 %v3425_v19, %v1883_v1 }
 0xe71   :  { %v1885_v17 = vadd.f32 %v3425_v19, %v1884_v24 }
 0xe73   :  { %v1889_v35 = vsel %vm1888_vm15, %v3425_v19, %v1885_v17  ;;  %v5632_v19 = vld [vmem:[%s6461_s12 + $0x10] sm:$0xff] }
 0xe74   :  { %v1894_v5 = vsel %vm1891_vm1, %v1893_v41, %v1889_v35  ;;  %v5680_v41 = vld [vmem:[%s6463_s9] ss:$0 sm:$0xff] }
 0xe75   :  { %v1897_v57 = vmul.f32 %v1894_v5, %v5219_v48  ;;  %v5624_v48 = vld [vmem:[%s6461_s12 + $0x18] sm:$0xff]  ;;  %6600 = vst [vmem:[#allocation15_spill] sm:$0xff] %v5680_v41 }
 0xeba   :  { %v1900_v50 = vpop.permute.xlu2 %1899 }
 0xebb   :  { %v1902_v9 = vmul.f32 %v1900_v50, %v1894_v5 }
 0xebd   :  { %1904 = vrot.lane.b32.xlu1 %v1902_v9, %s3739_s18 }
 0xf2f   :  { %v1905_v22 = vpop.permute.xlu1 %1904 }
 0xf30   :  { %v5613_v25 = vadd.f32 %v1905_v22, %v1897_v57 }
 0xf32   :  { %3426 = vtanh.f32 %v5613_v25 }
 0xf38   :  { %v3427_v26 = vpop.eup %3426 }
 0xf39   :  { %1910 = vrot.lane.b32.xlu0 %v3427_v26, %s3740_s27 }
 0xfab   :  { %v1911_v18 = vpop.permute.xlu0 %1910 }
 0xfac   :  { %v1913_v61 = vmul.f32 %v1911_v18, %v1894_v5 }
 0xfae   :  { %1915 = vrot.lane.b32.xlu2 %v1913_v61, %s3739_s18 }
0x1008   :  { %v1916_v14 = vpop.permute.xlu2 %1915 }
0x1009   :  { %3102 = vmatmul.msk.f32.vlgmr.msra.gmra.mxu3 %vm68_vm0, %v1916_v14  ;;  %3104 = vmatmul.msk.f32.vlgmr.msra.gmra.mxu0 %vm68_vm0, %v1916_v14 }
0x100a   :  { %3105 = vmatmul.msk.f32.vlgmr.msra.gmra.mxu2 %vm68_vm0, %v1916_v14  ;;  %2586 = vmatpush.msra.mxu3 %v5624_v48 }
0x100b   :  { %2610 = vmatpush.msra.mxu0 %v5231_v34  ;;  %2673 = vmatpush.msra.mxu2 %v5237_v6  ;;  %v5648_v34 = vld [vmem:[%s6461_s12] sm:$0xff] }
0x100c   :  { %2587 = vmatpush.msra.mxu3 %v5632_v19 }
0x100d   :  { %2611 = vmatpush.msra.mxu0 %v5244_v46  ;;  %2674 = vmatpush.msra.mxu2 %v5250_v40  ;;  %v5656_v46 = vld [vmem:[%s6462_s8] ss:$0 sm:$0xff] }
0x100e   :  { %2588 = vmatpush.msra.mxu3 %v5640_v30  ;;  %6599 = vst [vmem:[#allocation4_spill] sm:$0xff] %v5656_v46 }
0x100f   :  { %2612 = vmatpush.msra.mxu0 %v5257_v20  ;;  %2675 = vmatpush.msra.mxu2 %v5263_v52 }
0x1010   :  { %2589 = vmatpush.msra.mxu3 %v5648_v34 }
0x1011   :  { %2613 = vmatpush.msra.mxu0 %v5270_v36  ;;  %2676 = vmatpush.msra.mxu2 %v5276_v39 }
0x1086   :  { %v1958_v6 = vpop.f32.mrf.mxu0 }
0x1087   :  { %v5659_v40 = vadd.f32 %v5656_v46, %v1958_v6 }
0x1089   :  { %v1963_v20 = vadd.f32 %v5659_v40, %v6581_v32  ;;  %v1962_v52 = vadd.f32 %v5659_v40, %v6582_v58  ;;  %v1961_v36 = vadd.f32 %v5659_v40, %v6583_v4  ;;  %v1966_v39 = vadd.f32 %v5659_v40, %v6584_v51 }
0x108a   :  { %v1965_v24 = vadd.f32 %v5659_v40, %v6585_v11  ;;  %v1964_v23 = vadd.f32 %v5659_v40, %v6586_v60  ;;  %v1969_v9 = vadd.f32 %v5659_v40, %v6588_v8  ;;  %v1968_v26 = vadd.f32 %v5659_v40, %v6589_v56 }
0x108b   :  { %3428 = vtanh.f32 %v1963_v20  ;;  %v1967_v14 = vadd.f32 %v5659_v40, %v6590_v45 }
0x108c   :  { %v1936_v1 = vpop.f32.mrf.mxu3  ;;  %3430 = vtanh.f32 %v1962_v52 }
0x108d   :  { %v1937_v17 = vadd.f32 %v5282_v2, %v1936_v1  ;;  %3432 = vtanh.f32 %v1961_v36 }
0x108e   :  { %3434 = vtanh.f32 %v1966_v39 }
0x108f   :  { %3103 = vst [vmem:[%s6467_s16 + $0x18] sm:$0xff] %v1937_v17  ;;  %3436 = vtanh.f32 %v1965_v24  ;;  %v1972_v24 = vadd.f32 %v5659_v40, %v6591_v55 }
0x1090   :  { %3438 = vtanh.f32 %v1964_v23  ;;  %v1971_v23 = vadd.f32 %v5659_v40, %v6592_v49 }
0x1091   :  { %v3429_v15 = vpop.eup %3428  ;;  %3440 = vtanh.f32 %v1969_v9 }
0x1092   :  { %v3431_v35 = vpop.eup %3430  ;;  %v1995_v2 = vmul.f32 %v5680_v41, %v3429_v15  ;;  %3442 = vtanh.f32 %v1968_v26 }
0x1093   :  { %v3433_v50 = vpop.eup %3432  ;;  %v1994_v5 = vmul.f32 %v5680_v41, %v3431_v35  ;;  %3444 = vtanh.f32 %v1967_v14  ;;  %v1974_v14 = vadd.f32 %v5659_v40, %v6595_v31 }
0x1094   :  { %v2015_v57 = vsel %vm68_vm0, %v1995_v2, 0.0  ;;  %v1993_v22 = vmul.f32 %v5680_v41, %v3433_v50  ;;  %v3435_v18 = vpop.eup %3434  ;;  %v1970_v2 = vadd.f32 %v5659_v40, %v6593_v37  ;;  %3446 = vtanh.f32 %v1972_v24 }
0x1095   :  { %2016 = vadd.xlane.f32.xlu2 %v2015_v57  ;;  %v2012_v61 = vsel %vm68_vm0, %v1994_v5, 0.0  ;;  %v3437_v6 = vpop.eup %3436  ;;  %v1998_v36 = vmul.f32 %v5680_v41, %v3435_v18  ;;  %3448 = vtanh.f32 %v1971_v23  ;;  %v1975_v18 = vadd.f32 %v5659_v40, %v6594_v28 }
0x1096   :  { %2013 = vadd.xlane.f32.xlu1 %v2012_v61  ;;  %v2009_v20 = vsel %vm68_vm0, %v1993_v22, 0.0  ;;  %v3439_v52 = vpop.eup %3438  ;;  %v1997_v39 = vmul.f32 %v5680_v41, %v3437_v6  ;;  %3450 = vtanh.f32 %v1970_v2 }
0x1097   :  { %2010 = vadd.xlane.f32.xlu0 %v2009_v20  ;;  %v1996_v1 = vmul.f32 %v5680_v41, %v3439_v52  ;;  %v2024_v17 = vsel %vm68_vm0, %v1998_v36, 0.0  ;;  %v3441_v15 = vpop.eup %3440  ;;  %v1973_v52 = vadd.f32 %v5659_v40, %v6596_v21  ;;  %3452 = vtanh.f32 %v1975_v18 }
0x1098   :  { %v2021_v35 = vsel %vm68_vm0, %v1997_v39, 0.0  ;;  %v3443_v50 = vpop.eup %3442  ;;  %v2001_v57 = vmul.f32 %v5680_v41, %v3441_v15  ;;  %3454 = vtanh.f32 %v1974_v14 }
0x1099   :  { %v2018_v5 = vsel %vm68_vm0, %v1996_v1, 0.0  ;;  %v3445_v9 = vpop.eup %3444  ;;  %v2000_v22 = vmul.f32 %v5680_v41, %v3443_v50  ;;  %3456 = vtanh.f32 %v1973_v52  ;;  %v6601_v50 = vld [vmem:[#allocation25_spill] sm:$0xff] }
0x109a   :  { %v1999_v26 = vmul.f32 %v5680_v41, %v3445_v9  ;;  %v2033_v61 = vsel %vm68_vm0, %v2001_v57, 0.0  ;;  %v3447_v6 = vpop.eup %3446 }
0x109b   :  { %v2030_v20 = vsel %vm68_vm0, %v2000_v22, 0.0  ;;  %v3449_v36 = vpop.eup %3448  ;;  %v2004_v24 = vmul.f32 %v5680_v41, %v3447_v6 }
0x109c   :  { %v2027_v39 = vsel %vm68_vm0, %v1999_v26, 0.0  ;;  %v3451_v1 = vpop.eup %3450 }
0x109d   :  { %2025 = vadd.xlane.f32.xlu2 %v2024_v17  ;;  %v2003_v17 = vmul.f32 %v5680_v41, %v3449_v36  ;;  %v2002_v23 = vmul.f32 %v5680_v41, %v3451_v1  ;;  %v2042_v15 = vsel %vm68_vm0, %v2004_v24, 0.0 }
0x109e   :  { %2022 = vadd.xlane.f32.xlu1 %v2021_v35  ;;  %v3453_v35 = vpop.eup %3452 }
0x109f   :  { %2019 = vadd.xlane.f32.xlu0 %v2018_v5  ;;  %v2039_v2 = vsel %vm68_vm0, %v2003_v17, 0.0  ;;  %v1976_v5 = vadd.f32 %v5659_v40, %v6601_v50  ;;  %v3455_v9 = vpop.eup %3454  ;;  %v2036_v57 = vsel %vm68_vm0, %v2002_v23, 0.0  ;;  %v2007_v26 = vmul.f32 %v5680_v41, %v3453_v35 }
0x10a0   :  { %v3457_v22 = vpop.eup %3456  ;;  %v2006_v18 = vmul.f32 %v5680_v41, %v3455_v9 }
0x10a1   :  { %3458 = vtanh.f32 %v1976_v5  ;;  %v2051_v14 = vsel %vm68_vm0, %v2007_v26, 0.0 }
0x10a2   :  { %v2048_v6 = vsel %vm68_vm0, %v2006_v18, 0.0 }
0x10a5   :  { %2034 = vadd.xlane.f32.xlu2 %v2033_v61  ;;  %v2005_v61 = vmul.f32 %v5680_v41, %v3457_v22 }
0x10a6   :  { %2031 = vadd.xlane.f32.xlu1 %v2030_v20 }
0x10a7   :  { %2028 = vadd.xlane.f32.xlu0 %v2027_v39  ;;  %v2045_v40 = vsel %vm68_vm0, %v2005_v61, 0.0  ;;  %v3459_v20 = vpop.eup %3458 }
0x10a8   :  { %v2008_v52 = vmul.f32 %v5680_v41, %v3459_v20 }
0x10aa   :  { %v2054_v36 = vsel %vm68_vm0, %v2008_v52, 0.0 }
0x10ad   :  { %2043 = vadd.xlane.f32.xlu2 %v2042_v15 }
0x10ae   :  { %2040 = vadd.xlane.f32.xlu1 %v2039_v2 }
0x10af   :  { %2037 = vadd.xlane.f32.xlu0 %v2036_v57 }
0x10b5   :  { %2052 = vadd.xlane.f32.xlu2 %v2051_v14 }
0x10b6   :  { %2049 = vadd.xlane.f32.xlu1 %v2048_v6 }
0x10b7   :  { %2046 = vadd.xlane.f32.xlu0 %v2045_v40 }
0x10bf   :  { %2055 = vadd.xlane.f32.xlu0 %v2054_v36 }
0x1108   :  { %v5734_v39 = vpop.xlane.xlu2 %2016 }
0x1109   :  { %v5736_v1 = vpop.xlane.xlu1 %2013 }
0x110a   :  { %v5738_v24 = vpop.xlane.xlu0 %2010 }
0x1110   :  { %v5742_v23 = vpop.xlane.xlu2 %2025 }
0x1111   :  { %v5740_v17 = vpop.xlane.xlu1 %2022  ;;  %v2058_v18 = vmax.f32 %v5736_v1, %v5742_v23 }
0x1112   :  { %v5744_v15 = vpop.xlane.xlu0 %2019  ;;  %v2057_v61 = vmax.f32 %v5738_v24, %v5740_v17 }
0x1118   :  { %v5750_v5 = vpop.xlane.xlu2 %2034 }
0x1119   :  { %v5746_v35 = vpop.xlane.xlu1 %2031  ;;  %v2061_v6 = vmax.f32 %v2057_v61, %v5750_v5 }
0x111a   :  { %v5748_v2 = vpop.xlane.xlu0 %2028  ;;  %v2060_v40 = vmax.f32 %v5744_v15, %v5746_v35 }
0x111b   :  { %v2059_v20 = vmax.f32 %v5734_v39, %v5748_v2 }
0x1120   :  { %v5756_v22 = vpop.xlane.xlu2 %2043 }
0x1121   :  { %v5754_v57 = vpop.xlane.xlu1 %2040  ;;  %v2064_v28 = vmax.f32 %v2060_v40, %v5756_v22 }
0x1122   :  { %v5752_v9 = vpop.xlane.xlu0 %2037  ;;  %v2063_v55 = vmax.f32 %v2059_v20, %v5754_v57 }
0x1123   :  { %v2062_v52 = vmax.f32 %v2058_v18, %v5752_v9 }
0x1128   :  { %v5772_v36 = vpop.xlane.xlu2 %2052 }
0x1129   :  { %v5764_v14 = vpop.xlane.xlu1 %2049  ;;  %v2067_v61 = vmax.f32 %v2063_v55, %v5772_v36 }
0x112a   :  { %v5758_v26 = vpop.xlane.xlu0 %2046  ;;  %v2066_v31 = vmax.f32 %v2062_v52, %v5764_v14 }
0x112b   :  { %v2065_v50 = vmax.f32 %v2061_v6, %v5758_v26 }
0x112d   :  { %v2069_v21 = vmax.f32 %v2065_v50, %v2066_v31 }
0x1132   :  { %v5778_v8 = vpop.xlane.xlu0 %2055 }
0x1133   :  { %v2068_v49 = vmax.f32 %v2064_v28, %v5778_v8 }
0x1135   :  { %v2070_v51 = vmax.f32 %v2067_v61, %v2068_v49 }
0x1137   :  { %v5782_v56 = vmax.f32 %v2069_v21, %v2070_v51 }
0x1139   :  { %v2072_v18 = vsub.f32 %v5738_v24, %v5782_v56  ;;  %v2073_v40 = vsub.f32 %v5736_v1, %v5782_v56  ;;  %v2074_v20 = vsub.f32 %v5734_v39, %v5782_v56  ;;  %v2075_v6 = vsub.f32 %v5744_v15, %v5782_v56 }
0x113a   :  { %v2076_v28 = vsub.f32 %v5740_v17, %v5782_v56  ;;  %v2077_v51 = vsub.f32 %v5742_v23, %v5782_v56  ;;  %v2078_v21 = vsub.f32 %v5748_v2, %v5782_v56  ;;  %v2079_v61 = vsub.f32 %v5746_v35, %v5782_v56 }
0x113b   :  { %v2088_v52 = vmul.f32 1.442695, %v2072_v18  ;;  %v2090_v55 = vmul.f32 1.442695, %v2073_v40  ;;  %v2092_v49 = vmul.f32 1.442695, %v2074_v20  ;;  %v2080_v20 = vsub.f32 %v5750_v5, %v5782_v56 }
0x113c   :  { %v2094_v31 = vmul.f32 1.442695, %v2075_v6  ;;  %v2096_v50 = vmul.f32 1.442695, %v2076_v28  ;;  %v2098_v18 = vmul.f32 1.442695, %v2077_v51  ;;  %v2081_v6 = vsub.f32 %v5752_v9, %v5782_v56 }
0x113d   :  { %3460 = vpow2.f32 %v2088_v52  ;;  %v2100_v52 = vmul.f32 1.442695, %v2078_v21  ;;  %v2104_v51 = vmul.f32 1.442695, %v2080_v20 }
0x113e   :  { %3462 = vpow2.f32 %v2090_v55 }
0x113f   :  { %3464 = vpow2.f32 %v2092_v49  ;;  %v2102_v49 = vmul.f32 1.442695, %v2079_v61 }
0x1140   :  { %3466 = vpow2.f32 %v2094_v31  ;;  %v2082_v31 = vsub.f32 %v5754_v57, %v5782_v56 }
0x1141   :  { %3468 = vpow2.f32 %v2096_v50  ;;  %v2083_v50 = vsub.f32 %v5756_v22, %v5782_v56 }
0x1142   :  { %3470 = vpow2.f32 %v2098_v18  ;;  %v2084_v18 = vsub.f32 %v5758_v26, %v5782_v56 }
0x1143   :  { %v3461_v40 = vpop.eup %3460  ;;  %3472 = vpow2.f32 %v2100_v52  ;;  %v2085_v52 = vsub.f32 %v5764_v14, %v5782_v56 }
0x1144   :  { %v3463_v37 = vpop.eup %3462  ;;  %3474 = vpow2.f32 %v2102_v49  ;;  %v2086_v49 = vsub.f32 %v5772_v36, %v5782_v56 }
0x1145   :  { %v2120_v41 = vadd.f32 %v3463_v37, %v3461_v40  ;;  %v3465_v55 = vpop.eup %3464  ;;  %v2106_v37 = vmul.f32 1.442695, %v2081_v6  ;;  %3476 = vpow2.f32 %v2104_v51  ;;  %v2087_v51 = vsub.f32 %v5778_v8, %v5782_v56 }
0x1146   :  { %v3467_v60 = vpop.eup %3466  ;;  %v2116_v4 = vmul.f32 1.442695, %v2086_v49 }
0x1147   :  { %v2121_v28 = vadd.f32 %v3465_v55, %v2120_v41  ;;  %v3469_v45 = vpop.eup %3468  ;;  %v2108_v41 = vmul.f32 1.442695, %v2082_v31  ;;  %3478 = vpow2.f32 %v2106_v37  ;;  %v2114_v31 = vmul.f32 1.442695, %v2085_v52 }
0x1148   :  { %v3471_v40 = vpop.eup %3470 }
0x1149   :  { %v2122_v11 = vadd.f32 %v3467_v60, %v2121_v28  ;;  %v3473_v55 = vpop.eup %3472  ;;  %v2110_v60 = vmul.f32 1.442695, %v2083_v50  ;;  %3480 = vpow2.f32 %v2108_v41 }
0x114a   :  { %v3475_v28 = vpop.eup %3474 }
0x114b   :  { %v2123_v21 = vadd.f32 %v3469_v45, %v2122_v11  ;;  %v2112_v11 = vmul.f32 1.442695, %v2084_v18  ;;  %v3477_v6 = vpop.eup %3476  ;;  %3482 = vpow2.f32 %v2110_v60 }
0x114d   :  { %v2124_v61 = vadd.f32 %v3471_v40, %v2123_v21  ;;  %v3479_v40 = vpop.eup %3478  ;;  %3484 = vpow2.f32 %v2112_v11 }
0x114e   :  { %3486 = vpow2.f32 %v2114_v31 }
0x114f   :  { %v2125_v20 = vadd.f32 %v3473_v55, %v2124_v61  ;;  %v3481_v50 = vpop.eup %3480  ;;  %v2118_v61 = vmul.f32 1.442695, %v2087_v51  ;;  %3488 = vpow2.f32 %v2116_v4 }
0x1151   :  { %v2126_v45 = vadd.f32 %v3475_v28, %v2125_v20  ;;  %v3483_v58 = vpop.eup %3482  ;;  %3490 = vpow2.f32 %v2118_v61 }
0x1153   :  { %v2127_v21 = vadd.f32 %v3477_v6, %v2126_v45  ;;  %v3485_v18 = vpop.eup %3484 }
0x1154   :  { %v3487_v28 = vpop.eup %3486 }
0x1155   :  { %v2128_v37 = vadd.f32 %v3479_v40, %v2127_v21  ;;  %v3489_v46 = vpop.eup %3488 }
0x1157   :  { %v2129_v55 = vadd.f32 %v3481_v50, %v2128_v37  ;;  %v3491_v52 = vpop.eup %3490 }
0x1159   :  { %v2130_v41 = vadd.f32 %v3483_v58, %v2129_v55 }
0x115b   :  { %v2131_v20 = vadd.f32 %v3485_v18, %v2130_v41 }
0x115d   :  { %v2132_v32 = vadd.f32 %v3487_v28, %v2131_v20 }
0x115f   :  { %v2133_v60 = vadd.f32 %v3489_v46, %v2132_v32 }
0x1161   :  { %v2134_v45 = vadd.f32 %v3491_v52, %v2133_v60 }
0x1163   :  { %3492 = vlog2.f32 %v2134_v45 }
0x1169   :  { %v3493_v11 = vpop.eup %3492 }
0x116a   :  { %v2136_v49 = vmul.f32 0.6931472, %v3493_v11 }
0x116c   :  { %v2137_v6 = vadd.f32 %v2136_v49, %v5782_v56 }
0x116e   :  { %v2138_v51 = vsub.f32 %v5738_v24, %v2137_v6  ;;  %v2139_v31 = vsub.f32 %v5736_v1, %v2137_v6  ;;  %v2140_v58 = vsub.f32 %v5734_v39, %v2137_v6  ;;  %v2141_v4 = vsub.f32 %v5744_v15, %v2137_v6 }
0x116f   :  { %v2142_v32 = vsub.f32 %v5740_v17, %v2137_v6  ;;  %v2143_v37 = vsub.f32 %v5742_v23, %v2137_v6  ;;  %v2144_v39 = vsub.f32 %v5748_v2, %v2137_v6  ;;  %v2145_v17 = vsub.f32 %v5746_v35, %v2137_v6 }
0x1170   :  { %v2154_v21 = vmul.f32 %v5451_v16, %v2138_v51  ;;  %v2155_v40 = vmul.f32 %v5457_v53, %v2139_v31  ;;  %v2156_v46 = vmul.f32 %v5465_v42, %v2140_v58  ;;  %v2157_v56 = vmul.f32 %v5473_v29, %v2141_v4 }
0x1171   :  { %v2158_v15 = vmul.f32 %v5483_v44, %v2142_v32  ;;  %v2159_v42 = vmul.f32 %v5492_v43, %v2143_v37  ;;  %v2146_v29 = vsub.f32 %v5750_v5, %v2137_v6  ;;  %v2160_v55 = vmul.f32 %v5501_v38, %v2144_v39 }
0x1172   :  { %v2170_v24 = vsel %vm68_vm0, %v2154_v21, 0.0  ;;  %v2171_v1 = vsel %vm68_vm0, %v2155_v40, 0.0  ;;  %v2173_v16 = vsel %vm68_vm0, %v2156_v46, 0.0  ;;  %v2175_v23 = vsel %vm68_vm0, %v2157_v56, 0.0 }
0x1173   :  { %v2172_v50 = vadd.f32 %v2171_v1, %v2170_v24  ;;  %v2177_v41 = vsel %vm68_vm0, %v2158_v15, 0.0  ;;  %v2147_v2 = vsub.f32 %v5752_v9, %v2137_v6  ;;  %v2161_v44 = vmul.f32 %v5510_v27, %v2145_v17 }
0x1174   :  { %v2179_v20 = vsel %vm68_vm0, %v2159_v42, 0.0  ;;  %v2148_v35 = vsub.f32 %v5754_v57, %v2137_v6  ;;  %v2162_v43 = vmul.f32 %v5519_v10, %v2146_v29  ;;  %v2181_v60 = vsel %vm68_vm0, %v2160_v55, 0.0 }
0x1175   :  { %v2174_v53 = vadd.f32 %v2173_v16, %v2172_v50  ;;  %v2149_v5 = vsub.f32 %v5756_v22, %v2137_v6  ;;  %v2163_v38 = vmul.f32 %v5528_v54, %v2147_v2  ;;  %v2183_v45 = vsel %vm68_vm0, %v2161_v44, 0.0 }
0x1176   :  { %v2150_v9 = vsub.f32 %v5758_v26, %v2137_v6  ;;  %v2164_v27 = vmul.f32 %v5537_v59, %v2148_v35  ;;  %v2185_v49 = vsel %vm68_vm0, %v2162_v43, 0.0  ;;  %v2151_v57 = vsub.f32 %v5764_v14, %v2137_v6 }
0x1177   :  { %v2176_v61 = vadd.f32 %v2175_v23, %v2174_v53  ;;  %v2165_v10 = vmul.f32 %v5546_v0, %v2149_v5  ;;  %v2187_v31 = vsel %vm68_vm0, %v2163_v38, 0.0  ;;  %v2152_v22 = vsub.f32 %v5772_v36, %v2137_v6  ;;  %v3713_v5 = vld [vmem:[%s6464_s11 + $0x10] sm:$0xff]  ;;  %v3715_v38 = vld [vmem:[%s6464_s11 + $0x8] sm:$0xff] }
0x1178   :  { %v2166_v54 = vmul.f32 %v5555_v47, %v2150_v9  ;;  %v2189_v4 = vsel %vm68_vm0, %v2164_v27, 0.0  ;;  %v2153_v26 = vsub.f32 %v5778_v8, %v2137_v6  ;;  %v2167_v59 = vmul.f32 %v5564_v62, %v2151_v57  ;;  %v2220_v62 = vpop.f32.mrf.mxu2  ;;  %v5913_v9 = vld [vmem:[%s6466_s15] ss:$0 sm:$0xff]  ;;  %v6604_v57 = vld [vmem:[#allocation10_spill] sm:$0xff] }
0x1179   :  { %v2178_v18 = vadd.f32 %v2177_v41, %v2176_v61  ;;  %v2191_v40 = vsel %vm68_vm0, %v2165_v10, 0.0  ;;  %v2168_v14 = vmul.f32 %v5571_v12, %v2152_v22  ;;  %v6602_v12 = vld [vmem:[#allocation6_spill] sm:$0xff]  ;;  %v6606_v22 = vld [vmem:[#allocation9_spill] sm:$0xff] }
0x117a   :  { %v2193_v0 = vsel %vm68_vm0, %v2166_v54, 0.0  ;;  %v2169_v37 = vmul.f32 %v5578_v33, %v2153_v26  ;;  %v2195_v36 = vsel %vm68_vm0, %v2167_v59, 0.0  ;;  %v2223_v33 = vadd.f32 %v2220_v62, %v6602_v12  ;;  %v6608_v26 = vld [vmem:[#allocation11_spill] sm:$0xff]  ;;  %v6612_v62 = vld [vmem:[#allocation17_spill] sm:$0xff] }
0x117b   :  { %v2180_v28 = vadd.f32 %v2179_v20, %v2178_v18  ;;  %v2197_v56 = vsel %vm68_vm0, %v2168_v14, 0.0 }
0x117c   :  { %v2199_v8 = vsel %vm68_vm0, %v2169_v37, 0.0 }
0x117d   :  { %v2182_v52 = vadd.f32 %v2181_v60, %v2180_v28 }
0x117f   :  { %v2184_v11 = vadd.f32 %v2183_v45, %v2182_v52  ;;  %v3712_v52 = vld [vmem:[%s6465_s14 + $0x18] sm:$0xff]  ;;  %v3717_v45 = vld [vmem:[%s6464_s11] sm:$0xff] }
0x1181   :  { %v2186_v51 = vadd.f32 %v2185_v49, %v2184_v11  ;;  %v6603_v49 = vld [vmem:[#allocation4_spill] sm:$0xff] }
0x1183   :  { %v2188_v58 = vadd.f32 %v2187_v31, %v2186_v51  ;;  %v6605_v31 = vld [vmem:[#allocation14_spill] sm:$0xff] }
0x1185   :  { %v2190_v21 = vadd.f32 %v2189_v4, %v2188_v58  ;;  %v6607_v4 = vld [vmem:[#allocation18_spill] sm:$0xff] }
0x1187   :  { %v2192_v32 = vadd.f32 %v2191_v40, %v2190_v21  ;;  %v6609_v40 = vld [vmem:[#allocation13_spill] sm:$0xff] }
0x1189   :  { %v2194_v46 = vadd.f32 %v2193_v0, %v2192_v32 }
0x118b   :  { %v2196_v47 = vadd.f32 %v2195_v36, %v2194_v46  ;;  %v6610_v46 = vld [vmem:[#allocation15_spill] sm:$0xff] }
0x118d   :  { %v2198_v24 = vadd.f32 %v2197_v56, %v2196_v47  ;;  %v6611_v56 = vld [vmem:[#allocation21_spill] sm:$0xff] }
0x118f   :  { %v2200_v6 = vadd.f32 %v2199_v8, %v2198_v24 }
0x1191   :  { %3106 = vmatmul.msk.f32.vlgmr.msrb.gmra.mxu3 %vm68_vm0, %v2200_v6 }
0x1192   :  { %2695 = vmatpush.msrb.mxu3 %v5588_v3 }
0x1194   :  { %2696 = vmatpush.msrb.mxu3 %v5594_v13 }
0x1196   :  { %2697 = vmatpush.msrb.mxu3 %v5600_v63 }
0x1198   :  { %2698 = vmatpush.msrb.mxu3 %v5606_v7 }
0x1214   :  { %v2244_v1 = vpop.f32.mrf.mxu3 }
0x1215   :  { %v2247_v50 = vadd.f32 %v2244_v1, %v2223_v33 }
0x1217   :  { %3494 = vtanh.f32 %v2247_v50  ;;  %v3107_v15 = vmul.f32 -1.442695, %v2247_v50  ;;  %v6613_v50 = vld [vmem:[#allocation12_spill] sm:$0xff] }
0x1219   :  { %3496 = vpow2.f32 %v3107_v15 }
0x121d   :  { %v3495_v39 = vpop.eup %3494 }
0x121e   :  { %2270 = vrot.lane.b32.xlu1 %v3495_v39, %s3740_s27 }
0x121f   :  { %v3497_v16 = vpop.eup %3496 }
0x1220   :  { %v2251_v53 = vadd.f32 1.0, %v3497_v16 }
0x1222   :  { %3498 = vrcp.f32 %v2251_v53  ;;  %v2263_v7 = vand.u32 2147483648, %v2251_v53  ;;  %vm2257_vm3 = vweird.f32 %v2251_v53  ;;  %v2261_v23 = vand.u32 2147483647, %v2251_v53 }
0x1224   :  { %v2264_v29 = vor.u32 1.1754944e-38, %v2263_v7  ;;  %vm2262_vm5 = vcmp.eq.f32.partialorder %v2261_v23, 8.507059e+37  ;;  %v6615_v23 = vld [vmem:[#allocation20_spill] sm:$0xff] }
0x1228   :  { %v3499_v3 = vpop.eup %3498 }
0x1229   :  { %v2253_v13 = vmul.f32 %v3499_v3, %v2251_v53  ;;  %vm2258_vm2 = vweird.f32 %v3499_v3 }
0x122a   :  { %vm2259_vm4 = vmor %vm2257_vm3, %vm2258_vm2 }
0x122b   :  { %v2254_v17 = vsub.f32 1.0, %v2253_v13 }
0x122d   :  { %v2255_v63 = vmul.f32 %v3499_v3, %v2254_v17 }
0x122f   :  { %v2256_v42 = vadd.f32 %v3499_v3, %v2255_v63  ;;  %v6614_v63 = vld [vmem:[#allocation24_spill] sm:$0xff] }
0x1231   :  { %v2260_v61 = vsel %vm2259_vm4, %v3499_v3, %v2256_v42 }
0x1232   :  { %v2265_v41 = vsel %vm2262_vm5, %v2264_v29, %v2260_v61 }
0x1233   :  { %v2268_v2 = vmul.f32 %v2265_v41, %v5613_v25  ;;  %v3711_v25 = vld [vmem:[%s6464_s11 + $0x18] sm:$0xff] }
0x1290   :  { %v2271_v55 = vpop.permute.xlu1 %2270 }
0x1291   :  { %v2273_v18 = vmul.f32 %v2271_v55, %v2265_v41 }
0x1293   :  { %2275 = vrot.lane.b32.xlu2 %v2273_v18, %s3739_s18 }
0x12ed   :  { %v2276_v44 = vpop.permute.xlu2 %2275 }
0x12ee   :  { %v5874_v20 = vadd.f32 %v2276_v44, %v2268_v2 }
0x12f0   :  { %3500 = vtanh.f32 %v5874_v20 }
0x12f6   :  { %v3501_v28 = vpop.eup %3500 }
0x12f7   :  { %2281 = vrot.lane.b32.xlu0 %v3501_v28, %s3740_s27 }
0x1369   :  { %v2282_v35 = vpop.permute.xlu0 %2281 }
0x136a   :  { %v2284_v43 = vmul.f32 %v2282_v35, %v2265_v41  ;;  %v6616_v41 = vld [vmem:[#allocation16_spill] sm:$0xff] }
0x136c   :  { %2286 = vrot.lane.b32.xlu0 %v2284_v43, %s3739_s18 }
0x13de   :  { %v2287_v60 = vpop.permute.xlu0 %2286 }
0x13df   :  { %3108 = vmatmul.msk.f32.vlgmr.msrb.gmra.mxu0 %vm68_vm0, %v2287_v60  ;;  %3110 = vmatmul.msk.f32.vlgmr.msrb.gmra.mxu2 %vm68_vm0, %v2287_v60 }
0x13e0   :  { %3111 = vmatmul.msk.f32.vlgmr.msra.gmra.mxu3 %vm68_vm0, %v2287_v60  ;;  %2957 = vmatpush.msrb.mxu0 %v5624_v48  ;;  %v3714_v48 = vld [vmem:[%s6465_s14 + $0x10] sm:$0xff] }
0x13e1   :  { %2981 = vmatpush.msrb.mxu2 %v3711_v25  ;;  %3044 = vmatpush.msra.mxu3 %v3712_v52  ;;  %v6617_v25 = vld [vmem:[#allocation25_spill] sm:$0xff] }
0x13e2   :  { %2958 = vmatpush.msrb.mxu0 %v5632_v19  ;;  %v3716_v19 = vld [vmem:[%s6465_s14 + $0x8] sm:$0xff] }
0x13e3   :  { %2982 = vmatpush.msrb.mxu2 %v3713_v5  ;;  %3045 = vmatpush.msra.mxu3 %v3714_v48  ;;  %v6618_v48 = vld [vmem:[#allocation23_spill] sm:$0xff] }
0x13e4   :  { %2959 = vmatpush.msrb.mxu0 %v5640_v30  ;;  %v3718_v30 = vld [vmem:[%s6465_s14] sm:$0xff] }
0x13e5   :  { %2983 = vmatpush.msrb.mxu2 %v3715_v38  ;;  %3046 = vmatpush.msra.mxu3 %v3716_v19 }
0x13e6   :  { %2960 = vmatpush.msrb.mxu0 %v5648_v34 }
0x13e7   :  { %2984 = vmatpush.msrb.mxu2 %v3717_v45  ;;  %3047 = vmatpush.msra.mxu3 %v3718_v30  ;;  %v6619_v30 = vld [vmem:[#allocation19_spill] sm:$0xff] }
0x145c   :  { %v2307_v11 = vpop.f32.mrf.mxu0 }
0x145d   :  { %v2308_v27 = vadd.f32 %v5913_v9, %v2307_v11 }
0x145f   :  { %3109 = vst [vmem:[%s6467_s16 + $0x20] sm:$0xff] %v2308_v27 }
0x1462   :  { %v2329_v34 = vpop.f32.mrf.mxu2 }
0x1463   :  { %v5920_v51 = vadd.f32 %v6603_v49, %v2329_v34 }
0x1465   :  { %v2334_v10 = vadd.f32 %v5920_v51, %v6604_v57  ;;  %v2333_v58 = vadd.f32 %v5920_v51, %v6605_v31  ;;  %v2332_v54 = vadd.f32 %v5920_v51, %v6606_v22  ;;  %v2338_v21 = vadd.f32 %v5920_v51, %v6607_v4 }
0x1466   :  { %v2336_v59 = vadd.f32 %v5920_v51, %v6608_v26  ;;  %v2335_v32 = vadd.f32 %v5920_v51, %v6609_v40  ;;  %v2341_v24 = vadd.f32 %v5920_v51, %v6611_v56  ;;  %v2339_v12 = vadd.f32 %v5920_v51, %v6612_v62 }
0x1467   :  { %3502 = vtanh.f32 %v2334_v10  ;;  %v2337_v39 = vadd.f32 %v5920_v51, %v6613_v50  ;;  %v2344_v42 = vadd.f32 %v5920_v51, %v6614_v63  ;;  %v2342_v61 = vadd.f32 %v5920_v51, %v6615_v23 }
0x1468   :  { %3504 = vtanh.f32 %v2333_v58  ;;  %v2340_v18 = vadd.f32 %v5920_v51, %v6616_v41  ;;  %v2347_v52 = vadd.f32 %v5920_v51, %v6617_v25  ;;  %v2345_v38 = vadd.f32 %v5920_v51, %v6618_v48 }
0x1469   :  { %3506 = vtanh.f32 %v2332_v54  ;;  %v2343_v11 = vadd.f32 %v5920_v51, %v6619_v30 }
0x146a   :  { %3508 = vtanh.f32 %v2338_v21 }
0x146b   :  { %3510 = vtanh.f32 %v2336_v59 }
0x146c   :  { %3512 = vtanh.f32 %v2335_v32 }
0x146d   :  { %v3503_v14 = vpop.eup %3502  ;;  %3514 = vtanh.f32 %v2341_v24 }
0x146e   :  { %v3505_v0 = vpop.eup %3504  ;;  %v2366_v37 = vmul.f32 %v6610_v46, %v3503_v14  ;;  %3516 = vtanh.f32 %v2339_v12  ;;  %v6620_v14 = vld [vmem:[#allocation22_spill] sm:$0xff] }
0x146f   :  { %v3507_v36 = vpop.eup %3506  ;;  %v2365_v47 = vmul.f32 %v6610_v46, %v3505_v0  ;;  %3518 = vtanh.f32 %v2337_v39  ;;  %v2346_v0 = vadd.f32 %v5920_v51, %v6620_v14 }
0x1470   :  { %v2386_v8 = vsel %vm68_vm0, %v2366_v37, 0.0  ;;  %v2364_v6 = vmul.f32 %v6610_v46, %v3507_v36  ;;  %v3509_v33 = vpop.eup %3508  ;;  %3520 = vtanh.f32 %v2344_v42 }
0x1471   :  { %2387 = vadd.xlane.f32.xlu0 %v2386_v8  ;;  %v2383_v1 = vsel %vm68_vm0, %v2365_v47, 0.0  ;;  %v3511_v15 = vpop.eup %3510  ;;  %v2370_v3 = vmul.f32 %v6610_v46, %v3509_v33  ;;  %3522 = vtanh.f32 %v2342_v61 }
0x1472   :  { %2384 = vadd.xlane.f32.xlu1 %v2383_v1  ;;  %v2380_v16 = vsel %vm68_vm0, %v2364_v6, 0.0  ;;  %v3513_v53 = vpop.eup %3512  ;;  %v2368_v13 = vmul.f32 %v6610_v46, %v3511_v15  ;;  %3524 = vtanh.f32 %v2340_v18 }
0x1473   :  { %2381 = vadd.xlane.f32.xlu2 %v2380_v16  ;;  %v2367_v17 = vmul.f32 %v6610_v46, %v3513_v53  ;;  %v2398_v7 = vsel %vm68_vm0, %v2370_v3, 0.0  ;;  %v3515_v29 = vpop.eup %3514  ;;  %3526 = vtanh.f32 %v2347_v52 }
0x1474   :  { %v2392_v55 = vsel %vm68_vm0, %v2368_v13, 0.0  ;;  %v3517_v2 = vpop.eup %3516  ;;  %v2373_v35 = vmul.f32 %v6610_v46, %v3515_v29  ;;  %3528 = vtanh.f32 %v2345_v38 }
0x1475   :  { %v2389_v44 = vsel %vm68_vm0, %v2367_v17, 0.0  ;;  %v3519_v28 = vpop.eup %3518  ;;  %v2371_v43 = vmul.f32 %v6610_v46, %v3517_v2  ;;  %3530 = vtanh.f32 %v2343_v11 }
0x1476   :  { %v2369_v60 = vmul.f32 %v6610_v46, %v3519_v28  ;;  %v2407_v5 = vsel %vm68_vm0, %v2373_v35, 0.0  ;;  %v3521_v19 = vpop.eup %3520  ;;  %3532 = vtanh.f32 %v2346_v0 }
0x1477   :  { %v2401_v45 = vsel %vm68_vm0, %v2371_v43, 0.0  ;;  %v3523_v27 = vpop.eup %3522  ;;  %v2376_v10 = vmul.f32 %v6610_v46, %v3521_v19 }
0x1478   :  { %v2395_v34 = vsel %vm68_vm0, %v2369_v60, 0.0  ;;  %v3525_v49 = vpop.eup %3524  ;;  %v2374_v58 = vmul.f32 %v6610_v46, %v3523_v27 }
0x1479   :  { %2399 = vadd.xlane.f32.xlu0 %v2398_v7  ;;  %v2372_v54 = vmul.f32 %v6610_v46, %v3525_v49  ;;  %v2416_v21 = vsel %vm68_vm0, %v2376_v10, 0.0  ;;  %v3527_v59 = vpop.eup %3526 }
0x147a   :  { %2393 = vadd.xlane.f32.xlu1 %v2392_v55  ;;  %v2410_v32 = vsel %vm68_vm0, %v2374_v58, 0.0  ;;  %v3529_v37 = vpop.eup %3528  ;;  %v2379_v24 = vmul.f32 %v6610_v46, %v3527_v59 }
0x147b   :  { %2390 = vadd.xlane.f32.xlu2 %v2389_v44  ;;  %v2404_v36 = vsel %vm68_vm0, %v2372_v54, 0.0  ;;  %v3531_v47 = vpop.eup %3530  ;;  %v2377_v8 = vmul.f32 %v6610_v46, %v3529_v37 }
0x147c   :  { %v2375_v6 = vmul.f32 %v6610_v46, %v3531_v47  ;;  %v2425_v12 = vsel %vm68_vm0, %v2379_v24, 0.0  ;;  %v3533_v1 = vpop.eup %3532 }
0x147d   :  { %v2419_v33 = vsel %vm68_vm0, %v2377_v8, 0.0  ;;  %v2378_v39 = vmul.f32 %v6610_v46, %v3533_v1 }
0x147e   :  { %v2413_v51 = vsel %vm68_vm0, %v2375_v6, 0.0 }
0x147f   :  { %v2422_v15 = vsel %vm68_vm0, %v2378_v39, 0.0 }
0x1481   :  { %2408 = vadd.xlane.f32.xlu0 %v2407_v5 }
0x1482   :  { %2402 = vadd.xlane.f32.xlu1 %v2401_v45 }
0x1483   :  { %2396 = vadd.xlane.f32.xlu2 %v2395_v34 }
0x1489   :  { %2417 = vadd.xlane.f32.xlu0 %v2416_v21 }
0x148a   :  { %2411 = vadd.xlane.f32.xlu1 %v2410_v32 }
0x148b   :  { %2405 = vadd.xlane.f32.xlu2 %v2404_v36 }
0x1491   :  { %2426 = vadd.xlane.f32.xlu0 %v2425_v12 }
0x1492   :  { %2420 = vadd.xlane.f32.xlu1 %v2419_v33 }
0x1493   :  { %2414 = vadd.xlane.f32.xlu2 %v2413_v51 }
0x149b   :  { %2423 = vadd.xlane.f32.xlu2 %v2422_v15 }
0x14e4   :  { %v5988_v53 = vpop.xlane.xlu0 %2387 }
0x14e5   :  { %v5986_v16 = vpop.xlane.xlu1 %2384 }
0x14e6   :  { %v5990_v3 = vpop.xlane.xlu2 %2381 }
0x14ec   :  { %v5996_v42 = vpop.xlane.xlu0 %2399 }
0x14ed   :  { %v5992_v13 = vpop.xlane.xlu1 %2393  ;;  %v2430_v60 = vmax.f32 %v5988_v53, %v5996_v42 }
0x14ee   :  { %v5994_v17 = vpop.xlane.xlu2 %2390  ;;  %v2428_v28 = vmax.f32 %v5990_v3, %v5992_v13 }
0x14f4   :  { %v6002_v46 = vpop.xlane.xlu0 %2408 }
0x14f5   :  { %v5998_v7 = vpop.xlane.xlu1 %2402 }
0x14f6   :  { %v6000_v61 = vpop.xlane.xlu2 %2396  ;;  %v2431_v35 = vmax.f32 %v5994_v17, %v5998_v7 }
0x14f7   :  { %v2429_v44 = vmax.f32 %v5986_v16, %v6000_v61 }
0x14f9   :  { %v2433_v5 = vmax.f32 %v2429_v44, %v6002_v46 }
0x14fc   :  { %v6008_v18 = vpop.xlane.xlu0 %2417 }
0x14fd   :  { %v6006_v55 = vpop.xlane.xlu1 %2411 }
0x14fe   :  { %v6004_v29 = vpop.xlane.xlu2 %2405  ;;  %v2434_v19 = vmax.f32 %v2430_v60, %v6006_v55 }
0x14ff   :  { %v2432_v52 = vmax.f32 %v2428_v28, %v6004_v29 }
0x1501   :  { %v2436_v34 = vmax.f32 %v2432_v52, %v6008_v18 }
0x1504   :  { %v6027_v11 = vpop.xlane.xlu0 %2426 }
0x1505   :  { %v6018_v43 = vpop.xlane.xlu1 %2420 }
0x1506   :  { %v6010_v2 = vpop.xlane.xlu2 %2414  ;;  %v2437_v45 = vmax.f32 %v2433_v5, %v6018_v43 }
0x1507   :  { %v2435_v38 = vmax.f32 %v2431_v35, %v6010_v2 }
0x1508   :  { %v2440_v58 = vmax.f32 %v2436_v34, %v2437_v45 }
0x1509   :  { %v2439_v49 = vmax.f32 %v2435_v38, %v6027_v11 }
0x150e   :  { %v6029_v27 = vpop.xlane.xlu2 %2423 }
0x150f   :  { %v2438_v10 = vmax.f32 %v2434_v19, %v6029_v27 }
0x1511   :  { %v2441_v54 = vmax.f32 %v2438_v10, %v2439_v49 }
0x1513   :  { %v6034_v21 = vmax.f32 %v2440_v58, %v2441_v54 }
0x1515   :  { %v2443_v59 = vsub.f32 %v5990_v3, %v6034_v21  ;;  %v2444_v32 = vsub.f32 %v5986_v16, %v6034_v21  ;;  %v2445_v0 = vsub.f32 %v5988_v53, %v6034_v21  ;;  %v2446_v37 = vsub.f32 %v5994_v17, %v6034_v21 }
0x1516   :  { %v2447_v24 = vsub.f32 %v5992_v13, %v6034_v21  ;;  %v2448_v6 = vsub.f32 %v6000_v61, %v6034_v21  ;;  %v2449_v33 = vsub.f32 %v5996_v42, %v6034_v21  ;;  %v2450_v1 = vsub.f32 %v5998_v7, %v6034_v21 }
0x1517   :  { %v2459_v36 = vmul.f32 1.442695, %v2443_v59  ;;  %v2461_v47 = vmul.f32 1.442695, %v2444_v32  ;;  %v2463_v8 = vmul.f32 1.442695, %v2445_v0  ;;  %v2451_v28 = vsub.f32 %v6004_v29, %v6034_v21 }
0x1518   :  { %v2465_v12 = vmul.f32 1.442695, %v2446_v37  ;;  %v2467_v51 = vmul.f32 1.442695, %v2447_v24  ;;  %v2469_v39 = vmul.f32 1.442695, %v2448_v6  ;;  %v2452_v5 = vsub.f32 %v6002_v46, %v6034_v21 }
0x1519   :  { %3534 = vpow2.f32 %v2459_v36  ;;  %v2471_v35 = vmul.f32 1.442695, %v2449_v33  ;;  %v2473_v38 = vmul.f32 1.442695, %v2450_v1  ;;  %v2453_v34 = vsub.f32 %v6006_v55, %v6034_v21 }
0x151a   :  { %3536 = vpow2.f32 %v2461_v47  ;;  %v2475_v49 = vmul.f32 1.442695, %v2451_v28  ;;  %v2454_v54 = vsub.f32 %v6010_v2, %v6034_v21  ;;  %v2477_v59 = vmul.f32 1.442695, %v2452_v5 }
0x151b   :  { %3538 = vpow2.f32 %v2463_v8  ;;  %v2455_v37 = vsub.f32 %v6008_v18, %v6034_v21  ;;  %v2479_v36 = vmul.f32 1.442695, %v2453_v34  ;;  %v2456_v8 = vsub.f32 %v6018_v43, %v6034_v21 }
0x151c   :  { %3540 = vpow2.f32 %v2465_v12  ;;  %v2481_v6 = vmul.f32 1.442695, %v2454_v54 }
0x151d   :  { %3542 = vpow2.f32 %v2467_v51  ;;  %v2457_v51 = vsub.f32 %v6029_v27, %v6034_v21  ;;  %v2483_v1 = vmul.f32 1.442695, %v2455_v37  ;;  %v2485_v28 = vmul.f32 1.442695, %v2456_v8 }
0x151e   :  { %3544 = vpow2.f32 %v2469_v39 }
0x151f   :  { %v3535_v15 = vpop.eup %3534  ;;  %3546 = vpow2.f32 %v2471_v35 }
0x1520   :  { %v3537_v44 = vpop.eup %3536  ;;  %3548 = vpow2.f32 %v2473_v38 }
0x1521   :  { %v2491_v60 = vadd.f32 %v3537_v44, %v3535_v15  ;;  %v3539_v52 = vpop.eup %3538  ;;  %3550 = vpow2.f32 %v2475_v49  ;;  %v2458_v44 = vsub.f32 %v6027_v11, %v6034_v21 }
0x1522   :  { %v3541_v45 = vpop.eup %3540  ;;  %3552 = vpow2.f32 %v2477_v59 }
0x1523   :  { %v2492_v19 = vadd.f32 %v3539_v52, %v2491_v60  ;;  %v3543_v58 = vpop.eup %3542  ;;  %3554 = vpow2.f32 %v2479_v36  ;;  %v2487_v52 = vmul.f32 1.442695, %v2457_v51 }
0x1524   :  { %v3545_v0 = vpop.eup %3544  ;;  %3556 = vpow2.f32 %v2481_v6 }
0x1525   :  { %v2493_v10 = vadd.f32 %v3541_v45, %v2492_v19  ;;  %v3547_v24 = vpop.eup %3546  ;;  %3558 = vpow2.f32 %v2483_v1  ;;  %v2489_v19 = vmul.f32 1.442695, %v2458_v44  ;;  %v6082_v1 = vld [vmem:[%s6457_s1] sm:$0xff]  ;;  %v6104_v44 = vld [vmem:[%s6457_s1 + $0x18] sm:$0xff] }
0x1526   :  { %v3549_v33 = vpop.eup %3548  ;;  %3560 = vpow2.f32 %v2485_v28 }
0x1527   :  { %v2494_v32 = vadd.f32 %v3543_v58, %v2493_v10  ;;  %v3551_v15 = vpop.eup %3550  ;;  %3562 = vpow2.f32 %v2487_v52 }
0x1528   :  { %v3553_v60 = vpop.eup %3552  ;;  %3564 = vpow2.f32 %v2489_v19 }
0x1529   :  { %v2495_v47 = vadd.f32 %v3545_v0, %v2494_v32  ;;  %v3555_v38 = vpop.eup %3554 }
0x152a   :  { %v3557_v34 = vpop.eup %3556 }
0x152b   :  { %v2496_v12 = vadd.f32 %v3547_v24, %v2495_v47  ;;  %v3559_v10 = vpop.eup %3558 }
0x152c   :  { %v3561_v54 = vpop.eup %3560 }
0x152d   :  { %v2497_v39 = vadd.f32 %v3549_v33, %v2496_v12  ;;  %v3563_v32 = vpop.eup %3562 }
0x152e   :  { %v3565_v37 = vpop.eup %3564 }
0x152f   :  { %v2498_v35 = vadd.f32 %v3551_v15, %v2497_v39 }
0x1531   :  { %v2499_v5 = vadd.f32 %v3553_v60, %v2498_v35 }
0x1533   :  { %v2500_v45 = vadd.f32 %v3555_v38, %v2499_v5  ;;  %v6114_v5 = vld [vmem:[%s6457_s1 + $0x20] sm:$0xff] }
0x1535   :  { %v2501_v49 = vadd.f32 %v3557_v34, %v2500_v45  ;;  %v6123_v34 = vld [vmem:[%s6457_s1 + $0x28] sm:$0xff] }
0x1537   :  { %v2502_v58 = vadd.f32 %v3559_v10, %v2501_v49 }
0x1539   :  { %v2503_v59 = vadd.f32 %v3561_v54, %v2502_v58  ;;  %v6132_v54 = vld [vmem:[%s6457_s1 + $0x30] sm:$0xff] }
0x153b   :  { %v2504_v0 = vadd.f32 %v3563_v32, %v2503_v59 }
0x153d   :  { %v2505_v36 = vadd.f32 %v3565_v37, %v2504_v0  ;;  %v6141_v37 = vld [vmem:[%s6457_s1 + $0x38] sm:$0xff] }
0x153f   :  { %3566 = vlog2.f32 %v2505_v36 }
0x1545   :  { %v3567_v47 = vpop.eup %3566 }
0x1546   :  { %v2507_v24 = vmul.f32 0.6931472, %v3567_v47 }
0x1548   :  { %v6069_v8 = vadd.f32 %v2507_v24, %v6034_v21 }
0x154a   :  { %v2509_v6 = vsub.f32 %v5990_v3, %v6069_v8  ;;  %v2510_v12 = vsub.f32 %v5986_v16, %v6069_v8  ;;  %v2511_v33 = vsub.f32 %v5988_v53, %v6069_v8  ;;  %v2512_v51 = vsub.f32 %v5994_v17, %v6069_v8  ;;  %v6088_v3 = vld [vmem:[%s6457_s1 + $0x8] sm:$0xff]  ;;  %v6096_v17 = vld [vmem:[%s6457_s1 + $0x10] sm:$0xff] }
0x154b   :  { %v2513_v53 = vsub.f32 %v5992_v13, %v6069_v8  ;;  %v2514_v15 = vsub.f32 %v6000_v61, %v6069_v8  ;;  %v2515_v52 = vsub.f32 %v5996_v42, %v6069_v8  ;;  %v2516_v45 = vsub.f32 %v5998_v7, %v6069_v8 }
0x154c   :  { %v2525_v21 = vmul.f32 %v6082_v1, %v2509_v6  ;;  %v2526_v16 = vmul.f32 %v6088_v3, %v2510_v12  ;;  %v2527_v39 = vmul.f32 %v6096_v17, %v2511_v33  ;;  %v2528_v28 = vmul.f32 %v6104_v44, %v2512_v51  ;;  %v6150_v6 = vld [vmem:[%s6457_s1 + $0x40] sm:$0xff] }
0x154d   :  { %v2529_v61 = vmul.f32 %v6114_v5, %v2513_v53  ;;  %v2530_v42 = vmul.f32 %v6123_v34, %v2514_v15  ;;  %v2517_v58 = vsub.f32 %v6004_v29, %v6069_v8  ;;  %v2531_v7 = vmul.f32 %v6132_v54, %v2515_v52  ;;  %v6168_v15 = vld [vmem:[%s6457_s1 + $0x50] sm:$0xff] }
0x154e   :  { %v2541_v35 = vsel %vm68_vm0, %v2525_v21, 0.0  ;;  %v2542_v13 = vsel %vm68_vm0, %v2526_v16, 0.0  ;;  %v2544_v38 = vsel %vm68_vm0, %v2527_v39, 0.0  ;;  %v2546_v49 = vsel %vm68_vm0, %v2528_v28, 0.0  ;;  %v6159_v21 = vld [vmem:[%s6457_s1 + $0x48] sm:$0xff] }
0x154f   :  { %v2543_v60 = vadd.f32 %v2542_v13, %v2541_v35  ;;  %v2548_v59 = vsel %vm68_vm0, %v2529_v61, 0.0  ;;  %v2518_v0 = vsub.f32 %v6002_v46, %v6069_v8  ;;  %v2532_v29 = vmul.f32 %v6141_v37, %v2516_v45 }
0x1550   :  { %v2550_v36 = vsel %vm68_vm0, %v2530_v42, 0.0  ;;  %v2519_v24 = vsub.f32 %v6006_v55, %v6069_v8  ;;  %v2533_v46 = vmul.f32 %v6150_v6, %v2517_v58  ;;  %v2552_v12 = vsel %vm68_vm0, %v2531_v7, 0.0 }
0x1551   :  { %v2545_v19 = vadd.f32 %v2544_v38, %v2543_v60  ;;  %v2520_v51 = vsub.f32 %v6010_v2, %v6069_v8  ;;  %v2534_v55 = vmul.f32 %v6159_v21, %v2518_v0  ;;  %v2554_v16 = vsel %vm68_vm0, %v2532_v29, 0.0  ;;  %v6177_v60 = vld [vmem:[%s6457_s1 + $0x58] sm:$0xff] }
0x1552   :  { %v2521_v39 = vsub.f32 %v6008_v18, %v6069_v8  ;;  %v2535_v2 = vmul.f32 %v6168_v15, %v2519_v24  ;;  %v2556_v28 = vsel %vm68_vm0, %v2533_v46, 0.0  ;;  %v2522_v13 = vsub.f32 %v6018_v43, %v6069_v8 }
0x1553   :  { %v2547_v10 = vadd.f32 %v2546_v49, %v2545_v19  ;;  %v2536_v18 = vmul.f32 %v6177_v60, %v2520_v51  ;;  %v2558_v52 = vsel %vm68_vm0, %v2534_v55, 0.0  ;;  %v2523_v38 = vsub.f32 %v6029_v27, %v6069_v8  ;;  %v6186_v19 = vld [vmem:[%s6457_s1 + $0x60] sm:$0xff]  ;;  %v2591_v51 = vpop.f32.mrf.mxu3 }
0x1554   :  { %v2537_v43 = vmul.f32 %v6186_v19, %v2521_v39  ;;  %v2560_v45 = vsel %vm68_vm0, %v2535_v2, 0.0  ;;  %v2524_v49 = vsub.f32 %v6027_v11, %v6069_v8  ;;  %v6209_v8 = vld [vmem:[%s6457_s1 + $0x78] sm:$0xff]  ;;  %v6621_v55 = vld [vmem:[#allocation7_spill] sm:$0xff] }
0x1555   :  { %v2549_v32 = vadd.f32 %v2548_v59, %v2547_v10  ;;  %v6195_v10 = vld [vmem:[%s6457_s1 + $0x68] sm:$0xff]  ;;  %v2562_v58 = vsel %vm68_vm0, %v2536_v18, 0.0  ;;  %v6202_v59 = vld [vmem:[%s6457_s1 + $0x70] sm:$0xff] }
0x1556   :  { %v2538_v27 = vmul.f32 %v6195_v10, %v2522_v13  ;;  %v2564_v0 = vsel %vm68_vm0, %v2537_v43, 0.0  ;;  %v2540_v29 = vmul.f32 %v6209_v8, %v2524_v49 }
0x1557   :  { %v2551_v47 = vadd.f32 %v2550_v36, %v2549_v32  ;;  %v2539_v32 = vmul.f32 %v6202_v59, %v2523_v38 }
0x1558   :  { %v2566_v36 = vsel %vm68_vm0, %v2538_v27, 0.0 }
0x1559   :  { %v2553_v33 = vadd.f32 %v2552_v12, %v2551_v47  ;;  %v2568_v24 = vsel %vm68_vm0, %v2539_v32, 0.0  ;;  %v2570_v12 = vsel %vm68_vm0, %v2540_v29, 0.0 }
0x155b   :  { %v2555_v53 = vadd.f32 %v2554_v16, %v2553_v33  ;;  %v2594_v16 = vadd.f32 %v2591_v51, %v6621_v55  ;;  %v3736_v51 = vld [vmem:[%s6462_s8] ss:$0 sm:$0xff] }
0x155d   :  { %v2557_v35 = vadd.f32 %v2556_v28, %v2555_v53 }
0x155f   :  { %v2559_v61 = vadd.f32 %v2558_v52, %v2557_v35 }
0x1561   :  { %v2561_v42 = vadd.f32 %v2560_v45, %v2559_v61 }
0x1563   :  { %v2563_v7 = vadd.f32 %v2562_v58, %v2561_v42 }
0x1565   :  { %v2565_v11 = vadd.f32 %v2564_v0, %v2563_v7 }
0x1567   :  { %v2567_v47 = vadd.f32 %v2566_v36, %v2565_v11 }
0x1569   :  { %v2569_v46 = vadd.f32 %v2568_v24, %v2567_v47 }
0x156b   :  { %v2571_v33 = vadd.f32 %v2570_v12, %v2569_v46 }
0x156d   :  { %3112 = vmatmul.msk.f32.vlgmr.msra.gmra.mxu0 %vm68_vm0, %v2571_v33 }
0x15ea   :  { %v2615_v53 = vpop.f32.mrf.mxu0 }
0x15eb   :  { %v2618_v39 = vadd.f32 %v2615_v53, %v2594_v16 }
0x15ed   :  { %3568 = vtanh.f32 %v2618_v39  ;;  %v3113_v28 = vmul.f32 -1.442695, %v2618_v39 }
0x15ef   :  { %3570 = vpow2.f32 %v3113_v28 }
0x15f3   :  { %v3569_v2 = vpop.eup %3568 }
0x15f4   :  { %2641 = vrot.lane.b32.xlu1 %v3569_v2, %s3740_s27 }
0x15f5   :  { %v3571_v35 = vpop.eup %3570 }
0x15f6   :  { %v2622_v13 = vadd.f32 1.0, %v3571_v35 }
0x15f8   :  { %3572 = vrcp.f32 %v2622_v13  ;;  %v2634_v45 = vand.u32 2147483648, %v2622_v13  ;;  %vm2628_vm7 = vweird.f32 %v2622_v13  ;;  %v2632_v42 = vand.u32 2147483647, %v2622_v13 }
0x15fa   :  { %v2635_v27 = vor.u32 1.1754944e-38, %v2634_v45  ;;  %vm2633_vm9 = vcmp.eq.f32.partialorder %v2632_v42, 8.507059e+37 }
0x15fe   :  { %v3573_v18 = vpop.eup %3572 }
0x15ff   :  { %v2624_v52 = vmul.f32 %v3573_v18, %v2622_v13  ;;  %vm2629_vm6 = vweird.f32 %v3573_v18 }
0x1600   :  { %vm2630_vm8 = vmor %vm2628_vm7, %vm2629_vm6 }
0x1601   :  { %v2625_v61 = vsub.f32 1.0, %v2624_v52 }
0x1603   :  { %v2626_v38 = vmul.f32 %v3573_v18, %v2625_v61 }
0x1605   :  { %v2627_v43 = vadd.f32 %v3573_v18, %v2626_v38 }
0x1607   :  { %v2631_v49 = vsel %vm2630_vm8, %v3573_v18, %v2627_v43 }
0x1608   :  { %v2636_v7 = vsel %vm2633_vm9, %v2635_v27, %v2631_v49 }
0x1609   :  { %v2639_v0 = vmul.f32 %v2636_v7, %v5874_v20 }
0x1666   :  { %v2642_v58 = vpop.permute.xlu1 %2641 }
0x1667   :  { %v2644_v32 = vmul.f32 %v2642_v58, %v2636_v7 }
0x1669   :  { %2646 = vrot.lane.b32.xlu2 %v2644_v32, %s3739_s18 }
0x16c3   :  { %v2647_v11 = vpop.permute.xlu2 %2646 }
0x16c4   :  { %v6220_v29 = vadd.f32 %v2647_v11, %v2639_v0 }
0x16c6   :  { %3574 = vtanh.f32 %v6220_v29 }
0x16cc   :  { %v3575_v36 = vpop.eup %3574 }
0x16cd   :  { %2652 = vrot.lane.b32.xlu0 %v3575_v36, %s3740_s27 }
0x173f   :  { %v2653_v47 = vpop.permute.xlu0 %2652 }
0x1740   :  { %v2655_v24 = vmul.f32 %v2653_v47, %v2636_v7 }
0x1742   :  { %2657 = vrot.lane.b32.xlu1 %v2655_v24, %s3739_s18 }
0x17b4   :  { %v2658_v46 = vpop.permute.xlu1 %2657 }
0x17b5   :  { %3114 = vmatmul.msk.f32.vlgmr.msra.gmra.mxu2 %vm68_vm0, %v2658_v46  ;;  %3116 = vmatmul.msk.f32.vlgmr.msrb.gmra.mxu3 %vm68_vm0, %v2658_v46 }
0x17b6   :  { %3117 = vmatmul.msk.f32.vlgmr.msrb.gmra.mxu0 %vm68_vm0, %v2658_v46 }
0x1838   :  { %v2678_v20 = vpop.f32.mrf.mxu2  ;;  %v2700_v12 = vpop.f32.mrf.mxu3 }
0x1839   :  { %v2679_v33 = vadd.f32 %v5913_v9, %v2678_v20  ;;  %v6232_v55 = vadd.f32 %v3736_v51, %v2700_v12 }
0x183b   :  { %3115 = vst [vmem:[%s6467_s16 + $0x28] sm:$0xff] %v2679_v33  ;;  %v2705_v16 = vadd.f32 %v6232_v55, %v6604_v57  ;;  %v2704_v53 = vadd.f32 %v6232_v55, %v6605_v31  ;;  %v2703_v39 = vadd.f32 %v6232_v55, %v6606_v22  ;;  %v2708_v9 = vadd.f32 %v6232_v55, %v6613_v50  ;;  %v6252_v22 = vld [vmem:[%s6463_s9] ss:$0 sm:$0xff] }
0x183c   :  { %v2707_v2 = vadd.f32 %v6232_v55, %v6608_v26  ;;  %v2706_v28 = vadd.f32 %v6232_v55, %v6609_v40  ;;  %v2711_v26 = vadd.f32 %v6232_v55, %v6616_v41  ;;  %v2710_v52 = vadd.f32 %v6232_v55, %v6612_v62 }
0x183d   :  { %3576 = vtanh.f32 %v2705_v16  ;;  %v2709_v43 = vadd.f32 %v6232_v55, %v6607_v4  ;;  %v2714_v58 = vadd.f32 %v6232_v55, %v6619_v30  ;;  %v2713_v7 = vadd.f32 %v6232_v55, %v6615_v23 }
0x183e   :  { %3578 = vtanh.f32 %v2704_v53  ;;  %v2712_v11 = vadd.f32 %v6232_v55, %v6611_v56  ;;  %v2717_v20 = vadd.f32 %v6232_v55, %v6620_v14  ;;  %v2716_v12 = vadd.f32 %v6232_v55, %v6618_v48 }
0x183f   :  { %3580 = vtanh.f32 %v2703_v39  ;;  %v2715_v16 = vadd.f32 %v6232_v55, %v6614_v63 }
0x1840   :  { %3582 = vtanh.f32 %v2708_v9 }
0x1841   :  { %3584 = vtanh.f32 %v2707_v2 }
0x1842   :  { %3586 = vtanh.f32 %v2706_v28 }
0x1843   :  { %v3577_v57 = vpop.eup %3576  ;;  %3588 = vtanh.f32 %v2711_v26 }
0x1844   :  { %v3579_v31 = vpop.eup %3578  ;;  %v2737_v50 = vmul.f32 %v6252_v22, %v3577_v57  ;;  %3590 = vtanh.f32 %v2710_v52 }
0x1845   :  { %v3581_v35 = vpop.eup %3580  ;;  %v2736_v13 = vmul.f32 %v6252_v22, %v3579_v31  ;;  %3592 = vtanh.f32 %v2709_v43  ;;  %v2718_v31 = vadd.f32 %v6232_v55, %v6617_v25 }
0x1846   :  { %v2757_v40 = vsel %vm68_vm0, %v2737_v50, 0.0  ;;  %v2735_v18 = vmul.f32 %v6252_v22, %v3581_v35  ;;  %v3583_v61 = vpop.eup %3582  ;;  %3594 = vtanh.f32 %v2714_v58 }
0x1847   :  { %2758 = vadd.xlane.f32.xlu1 %v2757_v40  ;;  %v2754_v38 = vsel %vm68_vm0, %v2736_v13, 0.0  ;;  %v3585_v45 = vpop.eup %3584  ;;  %v2740_v41 = vmul.f32 %v6252_v22, %v3583_v61  ;;  %3596 = vtanh.f32 %v2713_v7 }
0x1848   :  { %2755 = vadd.xlane.f32.xlu2 %v2754_v38  ;;  %v2751_v42 = vsel %vm68_vm0, %v2735_v18, 0.0  ;;  %v3587_v49 = vpop.eup %3586  ;;  %v2739_v27 = vmul.f32 %v6252_v22, %v3585_v45  ;;  %3598 = vtanh.f32 %v2712_v11 }
0x1849   :  { %2752 = vadd.xlane.f32.xlu0 %v2751_v42  ;;  %v2738_v62 = vmul.f32 %v6252_v22, %v3587_v49  ;;  %v2766_v4 = vsel %vm68_vm0, %v2740_v41, 0.0  ;;  %v3589_v32 = vpop.eup %3588  ;;  %3600 = vtanh.f32 %v2717_v20 }
0x184a   :  { %v2763_v0 = vsel %vm68_vm0, %v2739_v27, 0.0  ;;  %v3591_v36 = vpop.eup %3590  ;;  %v2743_v30 = vmul.f32 %v6252_v22, %v3589_v32  ;;  %3602 = vtanh.f32 %v2716_v12 }
0x184b   :  { %v2760_v47 = vsel %vm68_vm0, %v2738_v62, 0.0  ;;  %v3593_v24 = vpop.eup %3592  ;;  %v2742_v46 = vmul.f32 %v6252_v22, %v3591_v36  ;;  %3604 = vtanh.f32 %v2715_v16 }
0x184c   :  { %v2741_v23 = vmul.f32 %v6252_v22, %v3593_v24  ;;  %v2775_v56 = vsel %vm68_vm0, %v2743_v30, 0.0  ;;  %v3595_v33 = vpop.eup %3594  ;;  %3606 = vtanh.f32 %v2718_v31 }
0x184d   :  { %v2772_v51 = vsel %vm68_vm0, %v2742_v46, 0.0  ;;  %v3597_v53 = vpop.eup %3596  ;;  %v2746_v14 = vmul.f32 %v6252_v22, %v3595_v33 }
0x184e   :  { %v2769_v39 = vsel %vm68_vm0, %v2741_v23, 0.0  ;;  %v3599_v9 = vpop.eup %3598  ;;  %v2745_v2 = vmul.f32 %v6252_v22, %v3597_v53 }
0x184f   :  { %2767 = vadd.xlane.f32.xlu1 %v2766_v4  ;;  %v2744_v48 = vmul.f32 %v6252_v22, %v3599_v9  ;;  %v2784_v28 = vsel %vm68_vm0, %v2746_v14, 0.0  ;;  %v3601_v57 = vpop.eup %3600 }
0x1850   :  { %2764 = vadd.xlane.f32.xlu2 %v2763_v0  ;;  %v2781_v63 = vsel %vm68_vm0, %v2745_v2, 0.0  ;;  %v3603_v50 = vpop.eup %3602  ;;  %v2749_v26 = vmul.f32 %v6252_v22, %v3601_v57 }
0x1851   :  { %2761 = vadd.xlane.f32.xlu0 %v2760_v47  ;;  %v2778_v35 = vsel %vm68_vm0, %v2744_v48, 0.0  ;;  %v3605_v13 = vpop.eup %3604  ;;  %v2748_v40 = vmul.f32 %v6252_v22, %v3603_v50 }
0x1852   :  { %v2747_v18 = vmul.f32 %v6252_v22, %v3605_v13  ;;  %v2793_v52 = vsel %vm68_vm0, %v2749_v26, 0.0  ;;  %v3607_v55 = vpop.eup %3606 }
0x1853   :  { %v2790_v61 = vsel %vm68_vm0, %v2748_v40, 0.0  ;;  %v2750_v38 = vmul.f32 %v6252_v22, %v3607_v55 }
0x1854   :  { %v2787_v25 = vsel %vm68_vm0, %v2747_v18, 0.0 }
0x1855   :  { %v2796_v43 = vsel %vm68_vm0, %v2750_v38, 0.0 }
0x1857   :  { %2776 = vadd.xlane.f32.xlu1 %v2775_v56 }
0x1858   :  { %2773 = vadd.xlane.f32.xlu2 %v2772_v51 }
0x1859   :  { %2770 = vadd.xlane.f32.xlu0 %v2769_v39 }
0x185f   :  { %2785 = vadd.xlane.f32.xlu1 %v2784_v28 }
0x1860   :  { %2782 = vadd.xlane.f32.xlu2 %v2781_v63 }
0x1861   :  { %2779 = vadd.xlane.f32.xlu0 %v2778_v35 }
0x1867   :  { %2794 = vadd.xlane.f32.xlu1 %v2793_v52 }
0x1868   :  { %2791 = vadd.xlane.f32.xlu2 %v2790_v61 }
0x1869   :  { %2788 = vadd.xlane.f32.xlu0 %v2787_v25 }
0x1871   :  { %2797 = vadd.xlane.f32.xlu0 %v2796_v43 }
0x18ba   :  { %v6306_v45 = vpop.xlane.xlu1 %2758 }
0x18bb   :  { %v6308_v42 = vpop.xlane.xlu2 %2755 }
0x18bc   :  { %v6310_v49 = vpop.xlane.xlu0 %2752 }
0x18c2   :  { %v6314_v27 = vpop.xlane.xlu1 %2767 }
0x18c3   :  { %v6312_v41 = vpop.xlane.xlu2 %2764  ;;  %v2800_v36 = vmax.f32 %v6308_v42, %v6314_v27 }
0x18c4   :  { %v6316_v62 = vpop.xlane.xlu0 %2761  ;;  %v2799_v47 = vmax.f32 %v6310_v49, %v6312_v41 }
0x18ca   :  { %v6322_v22 = vpop.xlane.xlu1 %2776 }
0x18cb   :  { %v6318_v58 = vpop.xlane.xlu2 %2773  ;;  %v2803_v30 = vmax.f32 %v2799_v47, %v6322_v22 }
0x18cc   :  { %v6320_v4 = vpop.xlane.xlu0 %2770  ;;  %v2802_v46 = vmax.f32 %v6316_v62, %v6318_v58 }
0x18cd   :  { %v2801_v23 = vmax.f32 %v6306_v45, %v6320_v4 }
0x18d2   :  { %v6328_v0 = vpop.xlane.xlu1 %2785 }
0x18d3   :  { %v6326_v32 = vpop.xlane.xlu2 %2782  ;;  %v2806_v12 = vmax.f32 %v2802_v46, %v6328_v0 }
0x18d4   :  { %v6324_v7 = vpop.xlane.xlu0 %2779  ;;  %v2805_v33 = vmax.f32 %v2801_v23, %v6326_v32 }
0x18d5   :  { %v2804_v20 = vmax.f32 %v2800_v36, %v6324_v7 }
0x18da   :  { %v6344_v56 = vpop.xlane.xlu1 %2794 }
0x18db   :  { %v6336_v24 = vpop.xlane.xlu2 %2791  ;;  %v2809_v39 = vmax.f32 %v2805_v33, %v6344_v56 }
0x18dc   :  { %v6330_v11 = vpop.xlane.xlu0 %2788  ;;  %v2808_v51 = vmax.f32 %v2804_v20, %v6336_v24 }
0x18dd   :  { %v2807_v16 = vmax.f32 %v2803_v30, %v6330_v11 }
0x18df   :  { %v2811_v14 = vmax.f32 %v2807_v16, %v2808_v51 }
0x18e4   :  { %v6350_v53 = vpop.xlane.xlu0 %2797 }
0x18e5   :  { %v2810_v9 = vmax.f32 %v2806_v12, %v6350_v53 }
0x18e7   :  { %v2812_v2 = vmax.f32 %v2809_v39, %v2810_v9 }
0x18e9   :  { %v6354_v48 = vmax.f32 %v2811_v14, %v2812_v2 }
0x18eb   :  { %v2814_v28 = vsub.f32 %v6310_v49, %v6354_v48  ;;  %v2815_v57 = vsub.f32 %v6308_v42, %v6354_v48  ;;  %v2816_v63 = vsub.f32 %v6306_v45, %v6354_v48  ;;  %v2817_v31 = vsub.f32 %v6316_v62, %v6354_v48 }
0x18ec   :  { %v2818_v13 = vsub.f32 %v6312_v41, %v6354_v48  ;;  %v2819_v40 = vsub.f32 %v6314_v27, %v6354_v48  ;;  %v2820_v52 = vsub.f32 %v6320_v4, %v6354_v48  ;;  %v2821_v25 = vsub.f32 %v6318_v58, %v6354_v48 }
0x18ed   :  { %v2830_v50 = vmul.f32 1.442695, %v2814_v28  ;;  %v2832_v35 = vmul.f32 1.442695, %v2815_v57  ;;  %v2834_v26 = vmul.f32 1.442695, %v2816_v63  ;;  %v2822_v36 = vsub.f32 %v6322_v22, %v6354_v48 }
0x18ee   :  { %v2836_v18 = vmul.f32 1.442695, %v2817_v31  ;;  %v2838_v61 = vmul.f32 1.442695, %v2818_v13  ;;  %v2840_v55 = vmul.f32 1.442695, %v2819_v40  ;;  %v2823_v23 = vsub.f32 %v6324_v7, %v6354_v48 }
0x18ef   :  { %3608 = vpow2.f32 %v2830_v50  ;;  %v2842_v47 = vmul.f32 1.442695, %v2820_v52  ;;  %v2844_v20 = vmul.f32 1.442695, %v2821_v25  ;;  %v2824_v51 = vsub.f32 %v6326_v32, %v6354_v48 }
0x18f0   :  { %3610 = vpow2.f32 %v2832_v35  ;;  %v2846_v16 = vmul.f32 1.442695, %v2822_v36  ;;  %v2825_v14 = vsub.f32 %v6328_v0, %v6354_v48  ;;  %v2848_v2 = vmul.f32 1.442695, %v2823_v23 }
0x18f1   :  { %3612 = vpow2.f32 %v2834_v26  ;;  %v2826_v63 = vsub.f32 %v6330_v11, %v6354_v48  ;;  %v2850_v31 = vmul.f32 1.442695, %v2824_v51  ;;  %v2827_v13 = vsub.f32 %v6336_v24, %v6354_v48 }
0x18f2   :  { %3614 = vpow2.f32 %v2836_v18  ;;  %v2852_v26 = vmul.f32 1.442695, %v2825_v14  ;;  %v2828_v52 = vsub.f32 %v6344_v56, %v6354_v48 }
0x18f3   :  { %3616 = vpow2.f32 %v2838_v61  ;;  %v2854_v61 = vmul.f32 1.442695, %v2826_v63 }
0x18f4   :  { %3618 = vpow2.f32 %v2840_v55 }
0x18f5   :  { %v3609_v38 = vpop.eup %3608  ;;  %3620 = vpow2.f32 %v2842_v47 }
0x18f6   :  { %v3611_v43 = vpop.eup %3610  ;;  %3622 = vpow2.f32 %v2844_v20 }
0x18f7   :  { %v2862_v30 = vadd.f32 %v3611_v43, %v3609_v38  ;;  %v3613_v46 = vpop.eup %3612  ;;  %3624 = vpow2.f32 %v2846_v16  ;;  %v2829_v38 = vsub.f32 %v6350_v53, %v6354_v48  ;;  %v2856_v43 = vmul.f32 1.442695, %v2827_v13 }
0x18f8   :  { %v3615_v33 = vpop.eup %3614  ;;  %3626 = vpow2.f32 %v2848_v2 }
0x18f9   :  { %v2863_v12 = vadd.f32 %v3613_v46, %v2862_v30  ;;  %v3617_v9 = vpop.eup %3616  ;;  %3628 = vpow2.f32 %v2850_v31  ;;  %v2858_v30 = vmul.f32 1.442695, %v2828_v52  ;;  %v2860_v20 = vmul.f32 1.442695, %v2829_v38 }
0x18fa   :  { %v3619_v57 = vpop.eup %3618  ;;  %3630 = vpow2.f32 %v2852_v26 }
0x18fb   :  { %v2864_v39 = vadd.f32 %v3615_v33, %v2863_v12  ;;  %v3621_v35 = vpop.eup %3620  ;;  %3632 = vpow2.f32 %v2854_v61 }
0x18fc   :  { %v3623_v18 = vpop.eup %3622  ;;  %3634 = vpow2.f32 %v2856_v43 }
0x18fd   :  { %v2865_v28 = vadd.f32 %v3617_v9, %v2864_v39  ;;  %v3625_v55 = vpop.eup %3624  ;;  %3636 = vpow2.f32 %v2858_v30 }
0x18fe   :  { %v3627_v47 = vpop.eup %3626  ;;  %3638 = vpow2.f32 %v2860_v20 }
0x18ff   :  { %v2866_v50 = vadd.f32 %v3619_v57, %v2865_v28  ;;  %v3629_v23 = vpop.eup %3628 }
0x1900   :  { %v3631_v33 = vpop.eup %3630 }
0x1901   :  { %v2867_v40 = vadd.f32 %v3621_v35, %v2866_v50  ;;  %v3633_v16 = vpop.eup %3632 }
0x1902   :  { %v3635_v9 = vpop.eup %3634 }
0x1903   :  { %v2868_v25 = vadd.f32 %v3623_v18, %v2867_v40  ;;  %v3637_v2 = vpop.eup %3636 }
0x1904   :  { %v3639_v57 = vpop.eup %3638 }
0x1905   :  { %v2869_v36 = vadd.f32 %v3625_v55, %v2868_v25 }
0x1907   :  { %v2870_v46 = vadd.f32 %v3627_v47, %v2869_v36 }
0x1909   :  { %v2871_v12 = vadd.f32 %v3629_v23, %v2870_v46 }
0x190b   :  { %v2872_v51 = vadd.f32 %v3631_v33, %v2871_v12 }
0x190d   :  { %v2873_v39 = vadd.f32 %v3633_v16, %v2872_v51 }
0x190f   :  { %v2874_v14 = vadd.f32 %v3635_v9, %v2873_v39 }
0x1911   :  { %v2875_v28 = vadd.f32 %v3637_v2, %v2874_v14 }
0x1913   :  { %v2876_v63 = vadd.f32 %v3639_v57, %v2875_v28 }
0x1915   :  { %3640 = vlog2.f32 %v2876_v63 }
0x191b   :  { %v3641_v31 = vpop.eup %3640 }
0x191c   :  { %v2878_v50 = vmul.f32 0.6931472, %v3641_v31 }
0x191e   :  { %v2879_v35 = vadd.f32 %v2878_v50, %v6354_v48 }
0x1920   :  { %v2880_v13 = vsub.f32 %v6310_v49, %v2879_v35  ;;  %v2881_v26 = vsub.f32 %v6308_v42, %v2879_v35  ;;  %v2882_v40 = vsub.f32 %v6306_v45, %v2879_v35  ;;  %v2883_v18 = vsub.f32 %v6316_v62, %v2879_v35 }
0x1921   :  { %v2884_v25 = vsub.f32 %v6312_v41, %v2879_v35  ;;  %v2885_v38 = vsub.f32 %v6314_v27, %v2879_v35  ;;  %v2886_v45 = vsub.f32 %v6320_v4, %v2879_v35  ;;  %v2887_v41 = vsub.f32 %v6318_v58, %v2879_v35 }
0x1922   :  { %v2896_v52 = vmul.f32 %v6082_v1, %v2880_v13  ;;  %v2897_v61 = vmul.f32 %v6088_v3, %v2881_v26  ;;  %v2898_v55 = vmul.f32 %v6096_v17, %v2882_v40  ;;  %v2899_v48 = vmul.f32 %v6104_v44, %v2883_v18  ;;  %v6622_v18 = vld [vmem:[#allocation8_spill] sm:$0xff] }
0x1923   :  { %v2900_v62 = vmul.f32 %v6114_v5, %v2884_v25  ;;  %v2901_v17 = vmul.f32 %v6123_v34, %v2885_v38  ;;  %v2888_v44 = vsub.f32 %v6322_v22, %v2879_v35  ;;  %v2902_v47 = vmul.f32 %v6132_v54, %v2886_v45 }
0x1924   :  { %v2912_v49 = vsel %vm68_vm0, %v2896_v52, 0.0  ;;  %v2913_v42 = vsel %vm68_vm0, %v2897_v61, 0.0  ;;  %v2915_v1 = vsel %vm68_vm0, %v2898_v55, 0.0  ;;  %v2917_v27 = vsel %vm68_vm0, %v2899_v48, 0.0 }
0x1925   :  { %v2914_v43 = vadd.f32 %v2913_v42, %v2912_v49  ;;  %v2919_v30 = vsel %vm68_vm0, %v2900_v62, 0.0  ;;  %v2889_v4 = vsub.f32 %v6324_v7, %v2879_v35  ;;  %v2903_v5 = vmul.f32 %v6141_v37, %v2887_v41 }
0x1926   :  { %v2921_v23 = vsel %vm68_vm0, %v2901_v17, 0.0  ;;  %v2890_v58 = vsub.f32 %v6326_v32, %v2879_v35  ;;  %v2904_v34 = vmul.f32 %v6150_v6, %v2888_v44  ;;  %v2923_v12 = vsel %vm68_vm0, %v2902_v47, 0.0 }
0x1927   :  { %v2916_v3 = vadd.f32 %v2915_v1, %v2914_v43  ;;  %v2891_v22 = vsub.f32 %v6328_v0, %v2879_v35  ;;  %v2905_v54 = vmul.f32 %v6159_v21, %v2889_v4  ;;  %v2925_v51 = vsel %vm68_vm0, %v2903_v5, 0.0 }
0x1928   :  { %v2892_v7 = vsub.f32 %v6330_v11, %v2879_v35  ;;  %v2906_v37 = vmul.f32 %v6168_v15, %v2890_v58  ;;  %v2927_v39 = vsel %vm68_vm0, %v2904_v34, 0.0  ;;  %v2893_v32 = vsub.f32 %v6336_v24, %v2879_v35  ;;  %v3738_v58 = vld [vmem:[%s6466_s15] ss:$0 sm:$0xff] }
0x1929   :  { %v2918_v36 = vadd.f32 %v2917_v27, %v2916_v3  ;;  %v2907_v6 = vmul.f32 %v6177_v60, %v2891_v22  ;;  %v2929_v14 = vsel %vm68_vm0, %v2905_v54, 0.0  ;;  %v2894_v0 = vsub.f32 %v6344_v56, %v2879_v35 }
0x192a   :  { %v2908_v21 = vmul.f32 %v6186_v19, %v2892_v7  ;;  %v2931_v28 = vsel %vm68_vm0, %v2906_v37, 0.0  ;;  %v2895_v11 = vsub.f32 %v6350_v53, %v2879_v35  ;;  %v2909_v15 = vmul.f32 %v6195_v10, %v2893_v32  ;;  %v2962_v10 = vpop.f32.mrf.mxu0 }
0x192b   :  { %v2920_v46 = vadd.f32 %v2919_v30, %v2918_v36  ;;  %v2933_v63 = vsel %vm68_vm0, %v2907_v6, 0.0  ;;  %v2910_v24 = vmul.f32 %v6202_v59, %v2894_v0  ;;  %v2965_v52 = vadd.f32 %v2962_v10, %v6622_v18 }
0x192c   :  { %v2935_v60 = vsel %vm68_vm0, %v2908_v21, 0.0  ;;  %v2911_v13 = vmul.f32 %v6209_v8, %v2895_v11  ;;  %v2937_v56 = vsel %vm68_vm0, %v2909_v15, 0.0 }
0x192d   :  { %v2922_v20 = vadd.f32 %v2921_v23, %v2920_v46  ;;  %v2939_v26 = vsel %vm68_vm0, %v2910_v24, 0.0 }
0x192e   :  { %v2941_v53 = vsel %vm68_vm0, %v2911_v13, 0.0 }
0x192f   :  { %v2924_v33 = vadd.f32 %v2923_v12, %v2922_v20 }
0x1931   :  { %v2926_v16 = vadd.f32 %v2925_v51, %v2924_v33 }
0x1933   :  { %v2928_v9 = vadd.f32 %v2927_v39, %v2926_v16 }
0x1935   :  { %v2930_v2 = vadd.f32 %v2929_v14, %v2928_v9 }
0x1937   :  { %v2932_v57 = vadd.f32 %v2931_v28, %v2930_v2 }
0x1939   :  { %v2934_v31 = vadd.f32 %v2933_v63, %v2932_v57 }
0x193b   :  { %v2936_v50 = vadd.f32 %v2935_v60, %v2934_v31 }
0x193d   :  { %v2938_v19 = vadd.f32 %v2937_v56, %v2936_v50 }
0x193f   :  { %v2940_v40 = vadd.f32 %v2939_v26, %v2938_v19 }
0x1941   :  { %v2942_v35 = vadd.f32 %v2941_v53, %v2940_v40 }
0x1943   :  { %3118 = vmatmul.msk.f32.vlgmr.msrb.gmra.mxu2 %vm68_vm0, %v2942_v35 }
0x19c6   :  { %v2986_v59 = vpop.f32.mrf.mxu2 }
0x19c7   :  { %v2989_v61 = vadd.f32 %v2986_v59, %v2965_v52 }
0x19c9   :  { %3642 = vtanh.f32 %v2989_v61  ;;  %v3119_v8 = vmul.f32 -1.442695, %v2989_v61 }
0x19cb   :  { %3644 = vpow2.f32 %v3119_v8 }
0x19cf   :  { %v3643_v25 = vpop.eup %3642 }
0x19d0   :  { %3012 = vrot.lane.b32.xlu2 %v3643_v25, %s3740_s27 }
0x19d1   :  { %v3645_v55 = vpop.eup %3644 }
0x19d2   :  { %v2993_v38 = vadd.f32 1.0, %v3645_v55 }
0x19d4   :  { %3646 = vrcp.f32 %v2993_v38  ;;  %v3005_v62 = vand.u32 2147483648, %v2993_v38  ;;  %vm2999_vm11 = vweird.f32 %v2993_v38  ;;  %v3003_v1 = vand.u32 2147483647, %v2993_v38 }
0x19d6   :  { %v3006_v41 = vor.u32 1.1754944e-38, %v3005_v62  ;;  %vm3004_vm13 = vcmp.eq.f32.partialorder %v3003_v1, 8.507059e+37 }
0x19da   :  { %v3647_v48 = vpop.eup %3646 }
0x19db   :  { %v2995_v49 = vmul.f32 %v3647_v48, %v2993_v38  ;;  %vm3000_vm10 = vweird.f32 %v3647_v48 }
0x19dc   :  { %vm3001_vm12 = vmor %vm2999_vm11, %vm3000_vm10 }
0x19dd   :  { %v2996_v42 = vsub.f32 1.0, %v2995_v49 }
0x19df   :  { %v2997_v43 = vmul.f32 %v3647_v48, %v2996_v42 }
0x19e1   :  { %v2998_v45 = vadd.f32 %v3647_v48, %v2997_v43 }
0x19e3   :  { %v3002_v3 = vsel %vm3001_vm12, %v3647_v48, %v2998_v45 }
0x19e4   :  { %v3007_v27 = vsel %vm3004_vm13, %v3006_v41, %v3002_v3 }
0x19e5   :  { %v3010_v44 = vmul.f32 %v3007_v27, %v6220_v29 }
0x1a2a   :  { %v3013_v17 = vpop.permute.xlu2 %3012 }
0x1a2b   :  { %v3015_v36 = vmul.f32 %v3013_v17, %v3007_v27 }
0x1a2d   :  { %3017 = vrot.lane.b32.xlu1 %v3015_v36, %s3739_s18 }
0x1a9f   :  { %v3018_v47 = vpop.permute.xlu1 %3017 }
0x1aa0   :  { %v3020_v30 = vadd.f32 %v3018_v47, %v3010_v44 }
0x1aa2   :  { %3648 = vtanh.f32 %v3020_v30 }
0x1aa8   :  { %v3649_v46 = vpop.eup %3648 }
0x1aa9   :  { %3023 = vrot.lane.b32.xlu0 %v3649_v46, %s3740_s27 }
0x1b1b   :  { %v3024_v4 = vpop.permute.xlu0 %3023 }
0x1b1c   :  { %v3026_v5 = vmul.f32 %v3024_v4, %v3007_v27 }
0x1b1e   :  { %3028 = vrot.lane.b32.xlu2 %v3026_v5, %s3739_s18 }
0x1b78   :  { %v3029_v23 = vpop.permute.xlu2 %3028 }
0x1b79   :  { %3120 = vmatmul.msk.f32.vlgmr.msra.gmra.mxu3 %vm68_vm0, %v3029_v23 }
0x1bfc   :  { %v3049_v20 = vpop.f32.mrf.mxu3 }
0x1bfd   :  { %v3050_v34 = vadd.f32 %v3738_v58, %v3049_v20 }
0x1bff   :  { %3121 = vst [vmem:[%s6467_s16 + $0x30] sm:$0xff] %v3050_v34 }

</bundles_post_ra>
